<compile_context>
chip_gen: v6e
topology: v6e:2x2x1
jax: 0.10.0
libtpu: 0.0.40
codegen_flags: <defaults>
</compile_context>

<pallas_src>
import math
import functools

import jax
import jax.numpy as jnp
from jax import lax
from jax.experimental import pallas as pl
from jax.experimental.pallas import tpu as pltpu

MIN_F32 = float(jnp.finfo(jnp.float32).min)


# --------------------------------------------------------------------------
# Small helpers
# --------------------------------------------------------------------------
def _layernorm(x, g, b, eps=1e-5):
    mu = jnp.mean(x, axis=-1, keepdims=True)
    xc = x - mu
    var = jnp.mean(xc * xc, axis=-1, keepdims=True)
    return xc * lax.rsqrt(var + eps) * g + b


def positional_encoding(length, d_model):
    pos = jnp.arange(length, dtype=jnp.float32)[:, None]
    div = jnp.exp(jnp.arange(0, d_model, 2, dtype=jnp.float32)
                  * (-math.log(10000.0) / d_model))
    pe = jnp.zeros((length, d_model), jnp.float32)
    pe = pe.at[:, 0::2].set(jnp.sin(pos * div))
    pe = pe.at[:, 1::2].set(jnp.cos(pos * div))
    return pe


# --------------------------------------------------------------------------
# Pallas kernel 1: fused Conv2dSubsampling tail
#   conv2 (3x3 stride 2) + ReLU + flatten + Linear + PositionalEncoding + mask
# --------------------------------------------------------------------------
def _embed_kernel(y1p_ref, w2_ref, b2_ref, lw_ref, lb_ref, pe_ref, m_ref, o_ref,
                  *, T2, F2, xscale):
    # y1p: phase-split conv1 output (4, F2+1, T2+1, D); phase p = 2*(row%2)+(col%2)
    y1p = y1p_ref[0]
    out = None
    for f in range(F2):                         # conv2 output frequency column
        acc = None
        for i in range(3):                      # 3x3 taps; stride-2 handled by phase split
            for j in range(3):
                ph = (i % 2) * 2 + (j % 2)
                patch = y1p[ph, f + j // 2, i // 2: i // 2 + T2, :]          # (T2, D)
                t = jnp.dot(patch, w2_ref[i, j], preferred_element_type=jnp.float32)
                acc = t if acc is None else acc + t
        y2f = jnp.maximum(acc + b2_ref[...], 0.0)                            # (T2, D)
        t = jnp.dot(y2f, lw_ref[f], preferred_element_type=jnp.float32)      # Linear (col f)
        out = t if out is None else out + t
    out = out + lb_ref[...]
    out = out * xscale + pe_ref[...]            # PositionalEncoding: x*sqrt(d) + pe
    o_ref[0] = out * m_ref[0]                   # masked_fill_(~mask, 0.0)


def embed_pallas(y1p, conv2_w, conv2_b, lin_w, lin_b, pe, maskcol, xscale):
    B, _, F2p, T2p, D = y1p.shape
    T2, F2 = T2p - 1, F2p - 1
    return pl.pallas_call(
        functools.partial(_embed_kernel, T2=T2, F2=F2, xscale=xscale),
        grid=(B,),
        in_specs=[
            pl.BlockSpec((1, 4, F2p, T2p, D), lambda b: (b, 0, 0, 0, 0)),
            pl.BlockSpec(conv2_w.shape, lambda b: (0, 0, 0, 0)),
            pl.BlockSpec(conv2_b.shape, lambda b: (0, 0)),
            pl.BlockSpec(lin_w.shape, lambda b: (0, 0, 0)),
            pl.BlockSpec(lin_b.shape, lambda b: (0, 0)),
            pl.BlockSpec(pe.shape, lambda b: (0, 0)),        # pe passed once, NOT tiled over batch
            pl.BlockSpec((1, T2, 1), lambda b: (b, 0, 0)),
        ],
        out_specs=pl.BlockSpec((1, T2, D), lambda b: (b, 0, 0)),
        out_shape=jax.ShapeDtypeStruct((B, T2, D), jnp.float32),
        compiler_params=pltpu.CompilerParams(dimension_semantics=("parallel",)),
    )(y1p, conv2_w, conv2_b, lin_w, lin_b, pe, maskcol)


# --------------------------------------------------------------------------
# Pallas kernel 2: fused stack of TransformerEncoderLayers
#   grid = (batch, layer); activation carried in the revisited output block.
# --------------------------------------------------------------------------
def _encoder_stack_kernel(x_ref, mk_ref,
                          wq_ref, bq_ref, wk_ref, bk_ref, wv_ref, bv_ref,
                          wo_ref, bo_ref,
                          w1a_ref, b1a_ref, w1b_ref, b1b_ref,
                          w2_ref, b2_ref,
                          g1_ref, be1_ref, g2_ref, be2_ref,
                          o_ref, *, n_head, d_k):
    layer = pl.program_id(1)

    @pl.when(layer == 0)
    def _():
        o_ref[0] = x_ref[0]          # load embed output into the resident activation block

    x = o_ref[0]                     # (Tp, D) resident activation
    mrow = mk_ref[0]                 # (1, Tp) float; 0.0 == masked key
    masked = (mrow == 0.0)

    # ---- multi-head self-attention (per-head contiguous matmuls, no lane slicing) ----
    scale = 1.0 / math.sqrt(d_k)
    att = None
    for h in range(n_head):
        qh = (jnp.dot(x, wq_ref[0, h], preferred_element_type=jnp.float32)
              + bq_ref[0, h]) * scale                                       # (Tp, dk)
        kh = jnp.dot(x, wk_ref[0, h], preferred_element_type=jnp.float32) + bk_ref[0, h]
        vh = jnp.dot(x, wv_ref[0, h], preferred_element_type=jnp.float32) + bv_ref[0, h]
        s = lax.dot_general(qh, kh, (((1,), (1,)), ((), ())),
                            preferred_element_type=jnp.float32)             # (Tp, Tp)
        s = jnp.where(masked, MIN_F32, s)
        s = s - jnp.max(s, axis=-1, keepdims=True)
        e = jnp.exp(s)
        p = e * pl.reciprocal(jnp.sum(e, axis=-1, keepdims=True), approx=True)
        p = jnp.where(masked, 0.0, p)                                       # torch masked_fill
        ctx = jnp.dot(p, vh, preferred_element_type=jnp.float32)            # (Tp, dk)
        oh = jnp.dot(ctx, wo_ref[0, h], preferred_element_type=jnp.float32) # (Tp, D)
        att = oh if att is None else att + oh
    att = att + bo_ref[0]

    x = _layernorm(x + att, g1_ref[0], be1_ref[0])

    # ---- PositionwiseFeedForward: w1 -> GLU -> w2 (GLU halves pre-split on host) ----
    ha = jnp.dot(x, w1a_ref[0], preferred_element_type=jnp.float32) + b1a_ref[0]
    hb = jnp.dot(x, w1b_ref[0], preferred_element_type=jnp.float32) + b1b_ref[0]
    ff = jnp.dot(ha * jax.nn.sigmoid(hb), w2_ref[0],
                 preferred_element_type=jnp.float32) + b2_ref[0]

    x = _layernorm(x + ff, g2_ref[0], be2_ref[0])
    o_ref[0] = x


def encoder_stack(x, mask_f, blocks, n_head, d_k):
    """x:(B,Tp,D), mask_f:(B,1,Tp) float {0,1}; blocks: dict of layer-stacked params."""
    B, Tp, D = x.shape
    order = ('wq', 'bq', 'wk', 'bk', 'wv', 'bv', 'wo', 'bo',
             'w1a', 'b1a', 'w1b', 'b1b', 'w2', 'b2',
             'g1', 'be1', 'g2', 'be2')
    plist = [blocks[k] for k in order]
    L = plist[0].shape[0]

    def wspec(a):
        nd = a.ndim
        return pl.BlockSpec((1,) + a.shape[1:],
                            lambda b, l, _nd=nd: (l,) + (0,) * (_nd - 1))

    in_specs = ([pl.BlockSpec((1, Tp, D), lambda b, l: (b, 0, 0)),
                 pl.BlockSpec((1, 1, Tp), lambda b, l: (b, 0, 0))]
                + [wspec(a) for a in plist])

    return pl.pallas_call(
        functools.partial(_encoder_stack_kernel, n_head=n_head, d_k=d_k),
        grid=(B, L),                                   # layer axis innermost (sequential carry)
        in_specs=in_specs,
        out_specs=pl.BlockSpec((1, Tp, D), lambda b, l: (b, 0, 0)),
        out_shape=jax.ShapeDtypeStruct((B, Tp, D), jnp.float32),
        compiler_params=pltpu.CompilerParams(
            dimension_semantics=("parallel", "arbitrary"),
            vmem_limit_bytes=48 * 1024 * 1024),
    )(x, mask_f, *plist)


# --------------------------------------------------------------------------
# Host-side glue: conv1 (C_in=1) as fused 9-tap MAC + phase split (no im2col in HBM)
# --------------------------------------------------------------------------
def conv1_phase_split(x, w1c, b1c, T1, F1, T2, F2, D):
    """x:(B,T,F) -> relu(conv1) rearranged as (B, 4, F2+1, T2+1, D) phase-split blocks."""
    B = x.shape[0]
    y1 = None
    for i in range(3):
        for j in range(3):
            patch = x[:, i:i + 2 * (T1 - 1) + 1:2, j:j + 2 * (F1 - 1) + 1:2]   # (B,T1,F1)
            contrib = patch[..., None] * w1c[i, j]                              # (B,T1,F1,D)
            y1 = contrib if y1 is None else y1 + contrib
    y1 = jnp.maximum(y1 + b1c, 0.0)
    T2p, F2p = T2 + 1, F2 + 1
    y1 = jnp.pad(y1, ((0, 0), (0, 2 * T2p - T1), (0, 2 * F2p - F1), (0, 0)))
    # y1p[b, 2*pi+pj, f, t, :] = y1[b, 2t+pi, 2f+pj, :]
    y1p = (y1.reshape(B, T2p, 2, F2p, 2, D)
             .transpose(0, 2, 4, 3, 1, 5)
             .reshape(B, 4, F2p, T2p, D))
    return y1p


# --------------------------------------------------------------------------
# Parameter init (uniform +-1/sqrt(fan_in), matching torch defaults' scale)
# --------------------------------------------------------------------------
def init_params(key, idim, d_model, n_head, linear_units, num_blocks):
    D, H, U, L = d_model, n_head, linear_units, num_blocks
    dk = D // H
    F2 = ((idim - 1) // 2 - 1) // 2
    keys = iter(jax.random.split(key, 64))

    def unif(shape, fan_in):
        s = 1.0 / math.sqrt(fan_in)
        return jax.random.uniform(next(keys), shape, jnp.float32, -s, s)

    params = {
        # conv1: torch Conv2d(1, D, 3, 2): weight[o, 0, i, j] == conv1_w[i, j, o]
        'conv1_w': unif((3, 3, D), 9),
        'conv1_b': unif((D,), 9),
        # conv2: torch Conv2d(D, D, 3, 2): weight[o, c, i, j] == conv2_w[i, j, c, o]
        'conv2_w': unif((3, 3, D, D), D * 9),
        'conv2_b': unif((1, D), D * 9),
        'lin_b': unif((1, D), D * F2),
    }
    # Linear(D*F2, D): torch weight W (D, D*F2), channel-major flatten index c*F2+f.
    # Stored reorganized as (F2, D, D): lin_w[f, c, o] = W[o, c*F2+f].
    lin_wt = unif((D * F2, D), D * F2)            # == W.T
    params['lin_w'] = lin_wt.reshape(D, F2, D).transpose(1, 0, 2)

    # Per-layer weights stacked along a leading layer axis; q/k/v/out and GLU halves pre-split.
    params['blocks'] = {
        'wq': unif((L, H, D, dk), D), 'bq': unif((L, H, 1, dk), D),
        'wk': unif((L, H, D, dk), D), 'bk': unif((L, H, 1, dk), D),
        'wv': unif((L, H, D, dk), D), 'bv': unif((L, H, 1, dk), D),
        'wo': unif((L, H, dk, D), D), 'bo': unif((L, 1, D), D),
        'w1a': unif((L, D, U), D), 'b1a': unif((L, 1, U), D),
        'w1b': unif((L, D, U), D), 'b1b': unif((L, 1, U), D),
        'w2': unif((L, U, D), U), 'b2': unif((L, 1, D), U),
        'g1': jnp.ones((L, 1, D), jnp.float32), 'be1': jnp.zeros((L, 1, D), jnp.float32),
        'g2': jnp.ones((L, 1, D), jnp.float32), 'be2': jnp.zeros((L, 1, D), jnp.float32),
    }
    return params


# --------------------------------------------------------------------------
# Model forward
# --------------------------------------------------------------------------
def transformer_encoder(inputs, params, n_head):
    B, T, idim = inputs.shape
    D = params['conv2_w'].shape[-1]
    d_k = D // n_head
    T1, F1 = (T - 3) // 2 + 1, (idim - 3) // 2 + 1
    T2, F2 = (T1 - 3) // 2 + 1, (F1 - 3) // 2 + 1

    # mask: sum(inputs,-1).ne(0).unsqueeze(-2), subsampled [:, :, :-2:2] twice
    enc_mask = (jnp.sum(inputs, axis=-1) != 0)[:, None, :]          # (B,1,T) bool
    mask2 = enc_mask[:, :, :-2:2][:, :, :-2:2]                      # (B,1,T2) bool

    # Conv2dSubsampling: conv1 in XLA glue (C_in=1), conv2+Linear+PE+mask fused in Pallas
    y1p = conv1_phase_split(inputs, params['conv1_w'], params['conv1_b'],
                            T1, F1, T2, F2, D)
    pe = positional_encoding(T2, D)
    maskcol = jnp.transpose(mask2.astype(jnp.float32), (0, 2, 1))   # (B,T2,1)
    emb = embed_pallas(y1p, params['conv2_w'], params['conv2_b'],
                       params['lin_w'], params['lin_b'], pe, maskcol,
                       math.sqrt(D))                                # (B,T2,D)

    # fused TransformerEncoderLayer stack (time padded to a sublane multiple; padded
    # key positions carry mask==0 so they never influence valid rows)
    Tp = ((T2 + 7) // 8) * 8
    x = jnp.pad(emb, ((0, 0), (0, Tp - T2), (0, 0)))
    mask_f = jnp.pad(mask2.astype(jnp.float32), ((0, 0), (0, 0), (0, Tp - T2)))
    out = encoder_stack(x, mask_f, params['blocks'], n_head, d_k)   # (B,Tp,D)
    return out[:, :T2, :], mask2


# --------------------------------------------------------------------------
if __name__ == "__main__":
    B, T, idim = 2, 32, 16
    d_model, n_head, linear_units, num_blocks = 32, 4, 64, 2

    key = jax.random.PRNGKey(0)
    k_in, k_p = jax.random.split(key)
    inputs = jax.random.normal(k_in, (B, T, idim), jnp.float32)
    # zero out trailing frames of batch element 1 so the padding mask is non-trivial
    inputs = inputs.at[1, 24:, :].set(0.0)

    params = init_params(k_p, idim, d_model, n_head, linear_units, num_blocks)

    fwd = jax.jit(functools.partial(transformer_encoder, n_head=n_head))
    enc_out, enc_mask = fwd(inputs, params)
    jax.block_until_ready((enc_out, enc_mask))

    assert enc_out.shape == (B, 7, d_model), enc_out.shape
    assert enc_mask.shape == (B, 1, 7), enc_mask.shape
    assert bool(jnp.all(jnp.isfinite(enc_out)))
    print("KERNEL_OK")
</pallas_src>

<mosaic_0001>
module attributes {stable_mosaic.version = 11 : i64} {
  func.func @_embed_kernel(%arg0: i32, %arg1: memref<1x4x4x8x32xf32, #tpu.memory_space<vmem>>, %arg2: memref<3x3x32x32xf32, #tpu.memory_space<vmem>>, %arg3: memref<1x32xf32, #tpu.memory_space<vmem>>, %arg4: memref<3x32x32xf32, #tpu.memory_space<vmem>>, %arg5: memref<1x32xf32, #tpu.memory_space<vmem>>, %arg6: memref<7x32xf32, #tpu.memory_space<vmem>>, %arg7: memref<1x7x1xf32, #tpu.memory_space<vmem>>, %arg8: memref<1x7x32xf32, #tpu.memory_space<vmem>>) attributes {dimension_semantics = [#tpu.dimension_semantics<parallel>], iteration_bounds = array<i64: 2>, scalar_prefetch = 0 : i64, scratch_operands = 0 : i64, tpu.core_type = #tpu.core_type<tc>, window_params = [{transform_indices = @transform_0, window_bounds = array<i64: 1, 4, 4, 8, 32>}, {pipeline_mode = #tpu.pipeline_mode<synchronous>, transform_indices = @transform_1, window_bounds = array<i64: 3, 3, 32, 32>}, {pipeline_mode = #tpu.pipeline_mode<synchronous>, transform_indices = @transform_2, window_bounds = array<i64: 1, 32>}, {pipeline_mode = #tpu.pipeline_mode<synchronous>, transform_indices = @transform_3, window_bounds = array<i64: 3, 32, 32>}, {pipeline_mode = #tpu.pipeline_mode<synchronous>, transform_indices = @transform_4, window_bounds = array<i64: 1, 32>}, {pipeline_mode = #tpu.pipeline_mode<synchronous>, transform_indices = @transform_5, window_bounds = array<i64: 7, 32>}, {transform_indices = @transform_6, window_bounds = array<i64: 1, 7, 1>}, {transform_indices = @transform_7, window_bounds = array<i64: 1, 7, 32>}]} {
    %c0 = arith.constant 0 : index
    %c0_0 = arith.constant 0 : index
    %c0_1 = arith.constant 0 : index
    %c0_2 = arith.constant 0 : index
    %c0_3 = arith.constant 0 : index
    %0 = vector.load %arg1[%c0, %c0_0, %c0_1, %c0_2, %c0_3] : memref<1x4x4x8x32xf32, #tpu.memory_space<vmem>>, vector<1x4x4x8x32xf32>
    %1 = vector.shape_cast %0 : vector<1x4x4x8x32xf32> to vector<4x4x8x32xf32>
    %2 = vector.extract_strided_slice %1 {offsets = [0, 0, 0, 0], sizes = [1, 1, 7, 32], strides = [1, 1, 1, 1]} : vector<4x4x8x32xf32> to vector<1x1x7x32xf32>
    %3 = vector.shape_cast %2 : vector<1x1x7x32xf32> to vector<7x32xf32>
    %c0_4 = arith.constant 0 : index
    %c0_5 = arith.constant 0 : index
    %c0_6 = arith.constant 0 : index
    %c0_7 = arith.constant 0 : index
    %4 = vector.load %arg2[%c0_4, %c0_5, %c0_6, %c0_7] : memref<3x3x32x32xf32, #tpu.memory_space<vmem>>, vector<1x1x32x32xf32>
    %5 = vector.shape_cast %4 : vector<1x1x32x32xf32> to vector<32x32xf32>
    %cst = arith.constant dense<0.000000e+00> : vector<7x32xf32>
    %6 = tpu.matmul %3, %5, %cst {dimension_numbers = #tpu.dot_dimension_numbers<[1], [0], [0], [1], [0, 0, 1, 1], [], []>} : vector<7x32xf32>, vector<32x32xf32>, vector<7x32xf32> -> vector<7x32xf32>
    %7 = vector.extract_strided_slice %1 {offsets = [1, 0, 0, 0], sizes = [1, 1, 7, 32], strides = [1, 1, 1, 1]} : vector<4x4x8x32xf32> to vector<1x1x7x32xf32>
    %8 = vector.shape_cast %7 : vector<1x1x7x32xf32> to vector<7x32xf32>
    %c0_8 = arith.constant 0 : index
    %c1 = arith.constant 1 : index
    %c0_9 = arith.constant 0 : index
    %c0_10 = arith.constant 0 : index
    %9 = vector.load %arg2[%c0_8, %c1, %c0_9, %c0_10] : memref<3x3x32x32xf32, #tpu.memory_space<vmem>>, vector<1x1x32x32xf32>
    %10 = vector.shape_cast %9 : vector<1x1x32x32xf32> to vector<32x32xf32>
    %cst_11 = arith.constant dense<0.000000e+00> : vector<7x32xf32>
    %11 = tpu.matmul %8, %10, %cst_11 {dimension_numbers = #tpu.dot_dimension_numbers<[1], [0], [0], [1], [0, 0, 1, 1], [], []>} : vector<7x32xf32>, vector<32x32xf32>, vector<7x32xf32> -> vector<7x32xf32>
    %12 = arith.addf %6, %11 : vector<7x32xf32>
    %13 = vector.extract_strided_slice %1 {offsets = [0, 1, 0, 0], sizes = [1, 1, 7, 32], strides = [1, 1, 1, 1]} : vector<4x4x8x32xf32> to vector<1x1x7x32xf32>
    %14 = vector.shape_cast %13 : vector<1x1x7x32xf32> to vector<7x32xf32>
    %c0_12 = arith.constant 0 : index
    %c2 = arith.constant 2 : index
    %c0_13 = arith.constant 0 : index
    %c0_14 = arith.constant 0 : index
    %15 = vector.load %arg2[%c0_12, %c2, %c0_13, %c0_14] : memref<3x3x32x32xf32, #tpu.memory_space<vmem>>, vector<1x1x32x32xf32>
    %16 = vector.shape_cast %15 : vector<1x1x32x32xf32> to vector<32x32xf32>
    %cst_15 = arith.constant dense<0.000000e+00> : vector<7x32xf32>
    %17 = tpu.matmul %14, %16, %cst_15 {dimension_numbers = #tpu.dot_dimension_numbers<[1], [0], [0], [1], [0, 0, 1, 1], [], []>} : vector<7x32xf32>, vector<32x32xf32>, vector<7x32xf32> -> vector<7x32xf32>
    %18 = arith.addf %12, %17 : vector<7x32xf32>
    %19 = vector.extract_strided_slice %1 {offsets = [2, 0, 0, 0], sizes = [1, 1, 7, 32], strides = [1, 1, 1, 1]} : vector<4x4x8x32xf32> to vector<1x1x7x32xf32>
    %20 = vector.shape_cast %19 : vector<1x1x7x32xf32> to vector<7x32xf32>
    %c1_16 = arith.constant 1 : index
    %c0_17 = arith.constant 0 : index
    %c0_18 = arith.constant 0 : index
    %c0_19 = arith.constant 0 : index
    %21 = vector.load %arg2[%c1_16, %c0_17, %c0_18, %c0_19] : memref<3x3x32x32xf32, #tpu.memory_space<vmem>>, vector<1x1x32x32xf32>
    %22 = vector.shape_cast %21 : vector<1x1x32x32xf32> to vector<32x32xf32>
    %cst_20 = arith.constant dense<0.000000e+00> : vector<7x32xf32>
    %23 = tpu.matmul %20, %22, %cst_20 {dimension_numbers = #tpu.dot_dimension_numbers<[1], [0], [0], [1], [0, 0, 1, 1], [], []>} : vector<7x32xf32>, vector<32x32xf32>, vector<7x32xf32> -> vector<7x32xf32>
    %24 = arith.addf %18, %23 : vector<7x32xf32>
    %25 = vector.extract_strided_slice %1 {offsets = [3, 0, 0, 0], sizes = [1, 1, 7, 32], strides = [1, 1, 1, 1]} : vector<4x4x8x32xf32> to vector<1x1x7x32xf32>
    %26 = vector.shape_cast %25 : vector<1x1x7x32xf32> to vector<7x32xf32>
    %c1_21 = arith.constant 1 : index
    %c1_22 = arith.constant 1 : index
    %c0_23 = arith.constant 0 : index
    %c0_24 = arith.constant 0 : index
    %27 = vector.load %arg2[%c1_21, %c1_22, %c0_23, %c0_24] : memref<3x3x32x32xf32, #tpu.memory_space<vmem>>, vector<1x1x32x32xf32>
    %28 = vector.shape_cast %27 : vector<1x1x32x32xf32> to vector<32x32xf32>
    %cst_25 = arith.constant dense<0.000000e+00> : vector<7x32xf32>
    %29 = tpu.matmul %26, %28, %cst_25 {dimension_numbers = #tpu.dot_dimension_numbers<[1], [0], [0], [1], [0, 0, 1, 1], [], []>} : vector<7x32xf32>, vector<32x32xf32>, vector<7x32xf32> -> vector<7x32xf32>
    %30 = arith.addf %24, %29 : vector<7x32xf32>
    %31 = vector.extract_strided_slice %1 {offsets = [2, 1, 0, 0], sizes = [1, 1, 7, 32], strides = [1, 1, 1, 1]} : vector<4x4x8x32xf32> to vector<1x1x7x32xf32>
    %32 = vector.shape_cast %31 : vector<1x1x7x32xf32> to vector<7x32xf32>
    %c1_26 = arith.constant 1 : index
    %c2_27 = arith.constant 2 : index
    %c0_28 = arith.constant 0 : index
    %c0_29 = arith.constant 0 : index
    %33 = vector.load %arg2[%c1_26, %c2_27, %c0_28, %c0_29] : memref<3x3x32x32xf32, #tpu.memory_space<vmem>>, vector<1x1x32x32xf32>
    %34 = vector.shape_cast %33 : vector<1x1x32x32xf32> to vector<32x32xf32>
    %cst_30 = arith.constant dense<0.000000e+00> : vector<7x32xf32>
    %35 = tpu.matmul %32, %34, %cst_30 {dimension_numbers = #tpu.dot_dimension_numbers<[1], [0], [0], [1], [0, 0, 1, 1], [], []>} : vector<7x32xf32>, vector<32x32xf32>, vector<7x32xf32> -> vector<7x32xf32>
    %36 = arith.addf %30, %35 : vector<7x32xf32>
    %37 = vector.extract_strided_slice %1 {offsets = [0, 0, 1, 0], sizes = [1, 1, 7, 32], strides = [1, 1, 1, 1]} : vector<4x4x8x32xf32> to vector<1x1x7x32xf32>
    %38 = vector.shape_cast %37 : vector<1x1x7x32xf32> to vector<7x32xf32>
    %c2_31 = arith.constant 2 : index
    %c0_32 = arith.constant 0 : index
    %c0_33 = arith.constant 0 : index
    %c0_34 = arith.constant 0 : index
    %39 = vector.load %arg2[%c2_31, %c0_32, %c0_33, %c0_34] : memref<3x3x32x32xf32, #tpu.memory_space<vmem>>, vector<1x1x32x32xf32>
    %40 = vector.shape_cast %39 : vector<1x1x32x32xf32> to vector<32x32xf32>
    %cst_35 = arith.constant dense<0.000000e+00> : vector<7x32xf32>
    %41 = tpu.matmul %38, %40, %cst_35 {dimension_numbers = #tpu.dot_dimension_numbers<[1], [0], [0], [1], [0, 0, 1, 1], [], []>} : vector<7x32xf32>, vector<32x32xf32>, vector<7x32xf32> -> vector<7x32xf32>
    %42 = arith.addf %36, %41 : vector<7x32xf32>
    %43 = vector.extract_strided_slice %1 {offsets = [1, 0, 1, 0], sizes = [1, 1, 7, 32], strides = [1, 1, 1, 1]} : vector<4x4x8x32xf32> to vector<1x1x7x32xf32>
    %44 = vector.shape_cast %43 : vector<1x1x7x32xf32> to vector<7x32xf32>
    %c2_36 = arith.constant 2 : index
    %c1_37 = arith.constant 1 : index
    %c0_38 = arith.constant 0 : index
    %c0_39 = arith.constant 0 : index
    %45 = vector.load %arg2[%c2_36, %c1_37, %c0_38, %c0_39] : memref<3x3x32x32xf32, #tpu.memory_space<vmem>>, vector<1x1x32x32xf32>
    %46 = vector.shape_cast %45 : vector<1x1x32x32xf32> to vector<32x32xf32>
    %cst_40 = arith.constant dense<0.000000e+00> : vector<7x32xf32>
    %47 = tpu.matmul %44, %46, %cst_40 {dimension_numbers = #tpu.dot_dimension_numbers<[1], [0], [0], [1], [0, 0, 1, 1], [], []>} : vector<7x32xf32>, vector<32x32xf32>, vector<7x32xf32> -> vector<7x32xf32>
    %48 = arith.addf %42, %47 : vector<7x32xf32>
    %49 = vector.extract_strided_slice %1 {offsets = [0, 1, 1, 0], sizes = [1, 1, 7, 32], strides = [1, 1, 1, 1]} : vector<4x4x8x32xf32> to vector<1x1x7x32xf32>
    %50 = vector.shape_cast %49 : vector<1x1x7x32xf32> to vector<7x32xf32>
    %c2_41 = arith.constant 2 : index
    %c2_42 = arith.constant 2 : index
    %c0_43 = arith.constant 0 : index
    %c0_44 = arith.constant 0 : index
    %51 = vector.load %arg2[%c2_41, %c2_42, %c0_43, %c0_44] : memref<3x3x32x32xf32, #tpu.memory_space<vmem>>, vector<1x1x32x32xf32>
    %52 = vector.shape_cast %51 : vector<1x1x32x32xf32> to vector<32x32xf32>
    %cst_45 = arith.constant dense<0.000000e+00> : vector<7x32xf32>
    %53 = tpu.matmul %50, %52, %cst_45 {dimension_numbers = #tpu.dot_dimension_numbers<[1], [0], [0], [1], [0, 0, 1, 1], [], []>} : vector<7x32xf32>, vector<32x32xf32>, vector<7x32xf32> -> vector<7x32xf32>
    %54 = arith.addf %48, %53 : vector<7x32xf32>
    %c0_46 = arith.constant 0 : index
    %c0_47 = arith.constant 0 : index
    %55 = vector.load %arg3[%c0_46, %c0_47] : memref<1x32xf32, #tpu.memory_space<vmem>>, vector<1x32xf32>
    %56 = vector.broadcast %55 : vector<1x32xf32> to vector<7x32xf32>
    %57 = arith.addf %54, %56 : vector<7x32xf32>
    %cst_48 = arith.constant 0.000000e+00 : f32
    %58 = vector.broadcast %cst_48 : f32 to vector<7x32xf32>
    %59 = arith.maximumf %57, %58 : vector<7x32xf32>
    %c0_49 = arith.constant 0 : index
    %c0_50 = arith.constant 0 : index
    %c0_51 = arith.constant 0 : index
    %60 = vector.load %arg4[%c0_49, %c0_50, %c0_51] : memref<3x32x32xf32, #tpu.memory_space<vmem>>, vector<1x32x32xf32>
    %61 = vector.shape_cast %60 : vector<1x32x32xf32> to vector<32x32xf32>
    %cst_52 = arith.constant dense<0.000000e+00> : vector<7x32xf32>
    %62 = tpu.matmul %59, %61, %cst_52 {dimension_numbers = #tpu.dot_dimension_numbers<[1], [0], [0], [1], [0, 0, 1, 1], [], []>} : vector<7x32xf32>, vector<32x32xf32>, vector<7x32xf32> -> vector<7x32xf32>
    %63 = vector.extract_strided_slice %1 {offsets = [0, 1, 0, 0], sizes = [1, 1, 7, 32], strides = [1, 1, 1, 1]} : vector<4x4x8x32xf32> to vector<1x1x7x32xf32>
    %64 = vector.shape_cast %63 : vector<1x1x7x32xf32> to vector<7x32xf32>
    %c0_53 = arith.constant 0 : index
    %c0_54 = arith.constant 0 : index
    %c0_55 = arith.constant 0 : index
    %c0_56 = arith.constant 0 : index
    %65 = vector.load %arg2[%c0_53, %c0_54, %c0_55, %c0_56] : memref<3x3x32x32xf32, #tpu.memory_space<vmem>>, vector<1x1x32x32xf32>
    %66 = vector.shape_cast %65 : vector<1x1x32x32xf32> to vector<32x32xf32>
    %cst_57 = arith.constant dense<0.000000e+00> : vector<7x32xf32>
    %67 = tpu.matmul %64, %66, %cst_57 {dimension_numbers = #tpu.dot_dimension_numbers<[1], [0], [0], [1], [0, 0, 1, 1], [], []>} : vector<7x32xf32>, vector<32x32xf32>, vector<7x32xf32> -> vector<7x32xf32>
    %68 = vector.extract_strided_slice %1 {offsets = [1, 1, 0, 0], sizes = [1, 1, 7, 32], strides = [1, 1, 1, 1]} : vector<4x4x8x32xf32> to vector<1x1x7x32xf32>
    %69 = vector.shape_cast %68 : vector<1x1x7x32xf32> to vector<7x32xf32>
    %c0_58 = arith.constant 0 : index
    %c1_59 = arith.constant 1 : index
    %c0_60 = arith.constant 0 : index
    %c0_61 = arith.constant 0 : index
    %70 = vector.load %arg2[%c0_58, %c1_59, %c0_60, %c0_61] : memref<3x3x32x32xf32, #tpu.memory_space<vmem>>, vector<1x1x32x32xf32>
    %71 = vector.shape_cast %70 : vector<1x1x32x32xf32> to vector<32x32xf32>
    %cst_62 = arith.constant dense<0.000000e+00> : vector<7x32xf32>
    %72 = tpu.matmul %69, %71, %cst_62 {dimension_numbers = #tpu.dot_dimension_numbers<[1], [0], [0], [1], [0, 0, 1, 1], [], []>} : vector<7x32xf32>, vector<32x32xf32>, vector<7x32xf32> -> vector<7x32xf32>
    %73 = arith.addf %67, %72 : vector<7x32xf32>
    %74 = vector.extract_strided_slice %1 {offsets = [0, 2, 0, 0], sizes = [1, 1, 7, 32], strides = [1, 1, 1, 1]} : vector<4x4x8x32xf32> to vector<1x1x7x32xf32>
    %75 = vector.shape_cast %74 : vector<1x1x7x32xf32> to vector<7x32xf32>
    %c0_63 = arith.constant 0 : index
    %c2_64 = arith.constant 2 : index
    %c0_65 = arith.constant 0 : index
    %c0_66 = arith.constant 0 : index
    %76 = vector.load %arg2[%c0_63, %c2_64, %c0_65, %c0_66] : memref<3x3x32x32xf32, #tpu.memory_space<vmem>>, vector<1x1x32x32xf32>
    %77 = vector.shape_cast %76 : vector<1x1x32x32xf32> to vector<32x32xf32>
    %cst_67 = arith.constant dense<0.000000e+00> : vector<7x32xf32>
    %78 = tpu.matmul %75, %77, %cst_67 {dimension_numbers = #tpu.dot_dimension_numbers<[1], [0], [0], [1], [0, 0, 1, 1], [], []>} : vector<7x32xf32>, vector<32x32xf32>, vector<7x32xf32> -> vector<7x32xf32>
    %79 = arith.addf %73, %78 : vector<7x32xf32>
    %80 = vector.extract_strided_slice %1 {offsets = [2, 1, 0, 0], sizes = [1, 1, 7, 32], strides = [1, 1, 1, 1]} : vector<4x4x8x32xf32> to vector<1x1x7x32xf32>
    %81 = vector.shape_cast %80 : vector<1x1x7x32xf32> to vector<7x32xf32>
    %c1_68 = arith.constant 1 : index
    %c0_69 = arith.constant 0 : index
    %c0_70 = arith.constant 0 : index
    %c0_71 = arith.constant 0 : index
    %82 = vector.load %arg2[%c1_68, %c0_69, %c0_70, %c0_71] : memref<3x3x32x32xf32, #tpu.memory_space<vmem>>, vector<1x1x32x32xf32>
    %83 = vector.shape_cast %82 : vector<1x1x32x32xf32> to vector<32x32xf32>
    %cst_72 = arith.constant dense<0.000000e+00> : vector<7x32xf32>
    %84 = tpu.matmul %81, %83, %cst_72 {dimension_numbers = #tpu.dot_dimension_numbers<[1], [0], [0], [1], [0, 0, 1, 1], [], []>} : vector<7x32xf32>, vector<32x32xf32>, vector<7x32xf32> -> vector<7x32xf32>
    %85 = arith.addf %79, %84 : vector<7x32xf32>
    %86 = vector.extract_strided_slice %1 {offsets = [3, 1, 0, 0], sizes = [1, 1, 7, 32], strides = [1, 1, 1, 1]} : vector<4x4x8x32xf32> to vector<1x1x7x32xf32>
    %87 = vector.shape_cast %86 : vector<1x1x7x32xf32> to vector<7x32xf32>
    %c1_73 = arith.constant 1 : index
    %c1_74 = arith.constant 1 : index
    %c0_75 = arith.constant 0 : index
    %c0_76 = arith.constant 0 : index
    %88 = vector.load %arg2[%c1_73, %c1_74, %c0_75, %c0_76] : memref<3x3x32x32xf32, #tpu.memory_space<vmem>>, vector<1x1x32x32xf32>
    %89 = vector.shape_cast %88 : vector<1x1x32x32xf32> to vector<32x32xf32>
    %cst_77 = arith.constant dense<0.000000e+00> : vector<7x32xf32>
    %90 = tpu.matmul %87, %89, %cst_77 {dimension_numbers = #tpu.dot_dimension_numbers<[1], [0], [0], [1], [0, 0, 1, 1], [], []>} : vector<7x32xf32>, vector<32x32xf32>, vector<7x32xf32> -> vector<7x32xf32>
    %91 = arith.addf %85, %90 : vector<7x32xf32>
    %92 = vector.extract_strided_slice %1 {offsets = [2, 2, 0, 0], sizes = [1, 1, 7, 32], strides = [1, 1, 1, 1]} : vector<4x4x8x32xf32> to vector<1x1x7x32xf32>
    %93 = vector.shape_cast %92 : vector<1x1x7x32xf32> to vector<7x32xf32>
    %c1_78 = arith.constant 1 : index
    %c2_79 = arith.constant 2 : index
    %c0_80 = arith.constant 0 : index
    %c0_81 = arith.constant 0 : index
    %94 = vector.load %arg2[%c1_78, %c2_79, %c0_80, %c0_81] : memref<3x3x32x32xf32, #tpu.memory_space<vmem>>, vector<1x1x32x32xf32>
    %95 = vector.shape_cast %94 : vector<1x1x32x32xf32> to vector<32x32xf32>
    %cst_82 = arith.constant dense<0.000000e+00> : vector<7x32xf32>
    %96 = tpu.matmul %93, %95, %cst_82 {dimension_numbers = #tpu.dot_dimension_numbers<[1], [0], [0], [1], [0, 0, 1, 1], [], []>} : vector<7x32xf32>, vector<32x32xf32>, vector<7x32xf32> -> vector<7x32xf32>
    %97 = arith.addf %91, %96 : vector<7x32xf32>
    %98 = vector.extract_strided_slice %1 {offsets = [0, 1, 1, 0], sizes = [1, 1, 7, 32], strides = [1, 1, 1, 1]} : vector<4x4x8x32xf32> to vector<1x1x7x32xf32>
    %99 = vector.shape_cast %98 : vector<1x1x7x32xf32> to vector<7x32xf32>
    %c2_83 = arith.constant 2 : index
    %c0_84 = arith.constant 0 : index
    %c0_85 = arith.constant 0 : index
    %c0_86 = arith.constant 0 : index
    %100 = vector.load %arg2[%c2_83, %c0_84, %c0_85, %c0_86] : memref<3x3x32x32xf32, #tpu.memory_space<vmem>>, vector<1x1x32x32xf32>
    %101 = vector.shape_cast %100 : vector<1x1x32x32xf32> to vector<32x32xf32>
    %cst_87 = arith.constant dense<0.000000e+00> : vector<7x32xf32>
    %102 = tpu.matmul %99, %101, %cst_87 {dimension_numbers = #tpu.dot_dimension_numbers<[1], [0], [0], [1], [0, 0, 1, 1], [], []>} : vector<7x32xf32>, vector<32x32xf32>, vector<7x32xf32> -> vector<7x32xf32>
    %103 = arith.addf %97, %102 : vector<7x32xf32>
    %104 = vector.extract_strided_slice %1 {offsets = [1, 1, 1, 0], sizes = [1, 1, 7, 32], strides = [1, 1, 1, 1]} : vector<4x4x8x32xf32> to vector<1x1x7x32xf32>
    %105 = vector.shape_cast %104 : vector<1x1x7x32xf32> to vector<7x32xf32>
    %c2_88 = arith.constant 2 : index
    %c1_89 = arith.constant 1 : index
    %c0_90 = arith.constant 0 : index
    %c0_91 = arith.constant 0 : index
    %106 = vector.load %arg2[%c2_88, %c1_89, %c0_90, %c0_91] : memref<3x3x32x32xf32, #tpu.memory_space<vmem>>, vector<1x1x32x32xf32>
    %107 = vector.shape_cast %106 : vector<1x1x32x32xf32> to vector<32x32xf32>
    %cst_92 = arith.constant dense<0.000000e+00> : vector<7x32xf32>
    %108 = tpu.matmul %105, %107, %cst_92 {dimension_numbers = #tpu.dot_dimension_numbers<[1], [0], [0], [1], [0, 0, 1, 1], [], []>} : vector<7x32xf32>, vector<32x32xf32>, vector<7x32xf32> -> vector<7x32xf32>
    %109 = arith.addf %103, %108 : vector<7x32xf32>
    %110 = vector.extract_strided_slice %1 {offsets = [0, 2, 1, 0], sizes = [1, 1, 7, 32], strides = [1, 1, 1, 1]} : vector<4x4x8x32xf32> to vector<1x1x7x32xf32>
    %111 = vector.shape_cast %110 : vector<1x1x7x32xf32> to vector<7x32xf32>
    %c2_93 = arith.constant 2 : index
    %c2_94 = arith.constant 2 : index
    %c0_95 = arith.constant 0 : index
    %c0_96 = arith.constant 0 : index
    %112 = vector.load %arg2[%c2_93, %c2_94, %c0_95, %c0_96] : memref<3x3x32x32xf32, #tpu.memory_space<vmem>>, vector<1x1x32x32xf32>
    %113 = vector.shape_cast %112 : vector<1x1x32x32xf32> to vector<32x32xf32>
    %cst_97 = arith.constant dense<0.000000e+00> : vector<7x32xf32>
    %114 = tpu.matmul %111, %113, %cst_97 {dimension_numbers = #tpu.dot_dimension_numbers<[1], [0], [0], [1], [0, 0, 1, 1], [], []>} : vector<7x32xf32>, vector<32x32xf32>, vector<7x32xf32> -> vector<7x32xf32>
    %115 = arith.addf %109, %114 : vector<7x32xf32>
    %c0_98 = arith.constant 0 : index
    %c0_99 = arith.constant 0 : index
    %116 = vector.load %arg3[%c0_98, %c0_99] : memref<1x32xf32, #tpu.memory_space<vmem>>, vector<1x32xf32>
    %117 = vector.broadcast %116 : vector<1x32xf32> to vector<7x32xf32>
    %118 = arith.addf %115, %117 : vector<7x32xf32>
    %cst_100 = arith.constant 0.000000e+00 : f32
    %119 = vector.broadcast %cst_100 : f32 to vector<7x32xf32>
    %120 = arith.maximumf %118, %119 : vector<7x32xf32>
    %c1_101 = arith.constant 1 : index
    %c0_102 = arith.constant 0 : index
    %c0_103 = arith.constant 0 : index
    %121 = vector.load %arg4[%c1_101, %c0_102, %c0_103] : memref<3x32x32xf32, #tpu.memory_space<vmem>>, vector<1x32x32xf32>
    %122 = vector.shape_cast %121 : vector<1x32x32xf32> to vector<32x32xf32>
    %cst_104 = arith.constant dense<0.000000e+00> : vector<7x32xf32>
    %123 = tpu.matmul %120, %122, %cst_104 {dimension_numbers = #tpu.dot_dimension_numbers<[1], [0], [0], [1], [0, 0, 1, 1], [], []>} : vector<7x32xf32>, vector<32x32xf32>, vector<7x32xf32> -> vector<7x32xf32>
    %124 = arith.addf %62, %123 : vector<7x32xf32>
    %125 = vector.extract_strided_slice %1 {offsets = [0, 2, 0, 0], sizes = [1, 1, 7, 32], strides = [1, 1, 1, 1]} : vector<4x4x8x32xf32> to vector<1x1x7x32xf32>
    %126 = vector.shape_cast %125 : vector<1x1x7x32xf32> to vector<7x32xf32>
    %c0_105 = arith.constant 0 : index
    %c0_106 = arith.constant 0 : index
    %c0_107 = arith.constant 0 : index
    %c0_108 = arith.constant 0 : index
    %127 = vector.load %arg2[%c0_105, %c0_106, %c0_107, %c0_108] : memref<3x3x32x32xf32, #tpu.memory_space<vmem>>, vector<1x1x32x32xf32>
    %128 = vector.shape_cast %127 : vector<1x1x32x32xf32> to vector<32x32xf32>
    %cst_109 = arith.constant dense<0.000000e+00> : vector<7x32xf32>
    %129 = tpu.matmul %126, %128, %cst_109 {dimension_numbers = #tpu.dot_dimension_numbers<[1], [0], [0], [1], [0, 0, 1, 1], [], []>} : vector<7x32xf32>, vector<32x32xf32>, vector<7x32xf32> -> vector<7x32xf32>
    %130 = vector.extract_strided_slice %1 {offsets = [1, 2, 0, 0], sizes = [1, 1, 7, 32], strides = [1, 1, 1, 1]} : vector<4x4x8x32xf32> to vector<1x1x7x32xf32>
    %131 = vector.shape_cast %130 : vector<1x1x7x32xf32> to vector<7x32xf32>
    %c0_110 = arith.constant 0 : index
    %c1_111 = arith.constant 1 : index
    %c0_112 = arith.constant 0 : index
    %c0_113 = arith.constant 0 : index
    %132 = vector.load %arg2[%c0_110, %c1_111, %c0_112, %c0_113] : memref<3x3x32x32xf32, #tpu.memory_space<vmem>>, vector<1x1x32x32xf32>
    %133 = vector.shape_cast %132 : vector<1x1x32x32xf32> to vector<32x32xf32>
    %cst_114 = arith.constant dense<0.000000e+00> : vector<7x32xf32>
    %134 = tpu.matmul %131, %133, %cst_114 {dimension_numbers = #tpu.dot_dimension_numbers<[1], [0], [0], [1], [0, 0, 1, 1], [], []>} : vector<7x32xf32>, vector<32x32xf32>, vector<7x32xf32> -> vector<7x32xf32>
    %135 = arith.addf %129, %134 : vector<7x32xf32>
    %136 = vector.extract_strided_slice %1 {offsets = [0, 3, 0, 0], sizes = [1, 1, 7, 32], strides = [1, 1, 1, 1]} : vector<4x4x8x32xf32> to vector<1x1x7x32xf32>
    %137 = vector.shape_cast %136 : vector<1x1x7x32xf32> to vector<7x32xf32>
    %c0_115 = arith.constant 0 : index
    %c2_116 = arith.constant 2 : index
    %c0_117 = arith.constant 0 : index
    %c0_118 = arith.constant 0 : index
    %138 = vector.load %arg2[%c0_115, %c2_116, %c0_117, %c0_118] : memref<3x3x32x32xf32, #tpu.memory_space<vmem>>, vector<1x1x32x32xf32>
    %139 = vector.shape_cast %138 : vector<1x1x32x32xf32> to vector<32x32xf32>
    %cst_119 = arith.constant dense<0.000000e+00> : vector<7x32xf32>
    %140 = tpu.matmul %137, %139, %cst_119 {dimension_numbers = #tpu.dot_dimension_numbers<[1], [0], [0], [1], [0, 0, 1, 1], [], []>} : vector<7x32xf32>, vector<32x32xf32>, vector<7x32xf32> -> vector<7x32xf32>
    %141 = arith.addf %135, %140 : vector<7x32xf32>
    %142 = vector.extract_strided_slice %1 {offsets = [2, 2, 0, 0], sizes = [1, 1, 7, 32], strides = [1, 1, 1, 1]} : vector<4x4x8x32xf32> to vector<1x1x7x32xf32>
    %143 = vector.shape_cast %142 : vector<1x1x7x32xf32> to vector<7x32xf32>
    %c1_120 = arith.constant 1 : index
    %c0_121 = arith.constant 0 : index
    %c0_122 = arith.constant 0 : index
    %c0_123 = arith.constant 0 : index
    %144 = vector.load %arg2[%c1_120, %c0_121, %c0_122, %c0_123] : memref<3x3x32x32xf32, #tpu.memory_space<vmem>>, vector<1x1x32x32xf32>
    %145 = vector.shape_cast %144 : vector<1x1x32x32xf32> to vector<32x32xf32>
    %cst_124 = arith.constant dense<0.000000e+00> : vector<7x32xf32>
    %146 = tpu.matmul %143, %145, %cst_124 {dimension_numbers = #tpu.dot_dimension_numbers<[1], [0], [0], [1], [0, 0, 1, 1], [], []>} : vector<7x32xf32>, vector<32x32xf32>, vector<7x32xf32> -> vector<7x32xf32>
    %147 = arith.addf %141, %146 : vector<7x32xf32>
    %148 = vector.extract_strided_slice %1 {offsets = [3, 2, 0, 0], sizes = [1, 1, 7, 32], strides = [1, 1, 1, 1]} : vector<4x4x8x32xf32> to vector<1x1x7x32xf32>
    %149 = vector.shape_cast %148 : vector<1x1x7x32xf32> to vector<7x32xf32>
    %c1_125 = arith.constant 1 : index
    %c1_126 = arith.constant 1 : index
    %c0_127 = arith.constant 0 : index
    %c0_128 = arith.constant 0 : index
    %150 = vector.load %arg2[%c1_125, %c1_126, %c0_127, %c0_128] : memref<3x3x32x32xf32, #tpu.memory_space<vmem>>, vector<1x1x32x32xf32>
    %151 = vector.shape_cast %150 : vector<1x1x32x32xf32> to vector<32x32xf32>
    %cst_129 = arith.constant dense<0.000000e+00> : vector<7x32xf32>
    %152 = tpu.matmul %149, %151, %cst_129 {dimension_numbers = #tpu.dot_dimension_numbers<[1], [0], [0], [1], [0, 0, 1, 1], [], []>} : vector<7x32xf32>, vector<32x32xf32>, vector<7x32xf32> -> vector<7x32xf32>
    %153 = arith.addf %147, %152 : vector<7x32xf32>
    %154 = vector.extract_strided_slice %1 {offsets = [2, 3, 0, 0], sizes = [1, 1, 7, 32], strides = [1, 1, 1, 1]} : vector<4x4x8x32xf32> to vector<1x1x7x32xf32>
    %155 = vector.shape_cast %154 : vector<1x1x7x32xf32> to vector<7x32xf32>
    %c1_130 = arith.constant 1 : index
    %c2_131 = arith.constant 2 : index
    %c0_132 = arith.constant 0 : index
    %c0_133 = arith.constant 0 : index
    %156 = vector.load %arg2[%c1_130, %c2_131, %c0_132, %c0_133] : memref<3x3x32x32xf32, #tpu.memory_space<vmem>>, vector<1x1x32x32xf32>
    %157 = vector.shape_cast %156 : vector<1x1x32x32xf32> to vector<32x32xf32>
    %cst_134 = arith.constant dense<0.000000e+00> : vector<7x32xf32>
    %158 = tpu.matmul %155, %157, %cst_134 {dimension_numbers = #tpu.dot_dimension_numbers<[1], [0], [0], [1], [0, 0, 1, 1], [], []>} : vector<7x32xf32>, vector<32x32xf32>, vector<7x32xf32> -> vector<7x32xf32>
    %159 = arith.addf %153, %158 : vector<7x32xf32>
    %160 = vector.extract_strided_slice %1 {offsets = [0, 2, 1, 0], sizes = [1, 1, 7, 32], strides = [1, 1, 1, 1]} : vector<4x4x8x32xf32> to vector<1x1x7x32xf32>
    %161 = vector.shape_cast %160 : vector<1x1x7x32xf32> to vector<7x32xf32>
    %c2_135 = arith.constant 2 : index
    %c0_136 = arith.constant 0 : index
    %c0_137 = arith.constant 0 : index
    %c0_138 = arith.constant 0 : index
    %162 = vector.load %arg2[%c2_135, %c0_136, %c0_137, %c0_138] : memref<3x3x32x32xf32, #tpu.memory_space<vmem>>, vector<1x1x32x32xf32>
    %163 = vector.shape_cast %162 : vector<1x1x32x32xf32> to vector<32x32xf32>
    %cst_139 = arith.constant dense<0.000000e+00> : vector<7x32xf32>
    %164 = tpu.matmul %161, %163, %cst_139 {dimension_numbers = #tpu.dot_dimension_numbers<[1], [0], [0], [1], [0, 0, 1, 1], [], []>} : vector<7x32xf32>, vector<32x32xf32>, vector<7x32xf32> -> vector<7x32xf32>
    %165 = arith.addf %159, %164 : vector<7x32xf32>
    %166 = vector.extract_strided_slice %1 {offsets = [1, 2, 1, 0], sizes = [1, 1, 7, 32], strides = [1, 1, 1, 1]} : vector<4x4x8x32xf32> to vector<1x1x7x32xf32>
    %167 = vector.shape_cast %166 : vector<1x1x7x32xf32> to vector<7x32xf32>
    %c2_140 = arith.constant 2 : index
    %c1_141 = arith.constant 1 : index
    %c0_142 = arith.constant 0 : index
    %c0_143 = arith.constant 0 : index
    %168 = vector.load %arg2[%c2_140, %c1_141, %c0_142, %c0_143] : memref<3x3x32x32xf32, #tpu.memory_space<vmem>>, vector<1x1x32x32xf32>
    %169 = vector.shape_cast %168 : vector<1x1x32x32xf32> to vector<32x32xf32>
    %cst_144 = arith.constant dense<0.000000e+00> : vector<7x32xf32>
    %170 = tpu.matmul %167, %169, %cst_144 {dimension_numbers = #tpu.dot_dimension_numbers<[1], [0], [0], [1], [0, 0, 1, 1], [], []>} : vector<7x32xf32>, vector<32x32xf32>, vector<7x32xf32> -> vector<7x32xf32>
    %171 = arith.addf %165, %170 : vector<7x32xf32>
    %172 = vector.extract_strided_slice %1 {offsets = [0, 3, 1, 0], sizes = [1, 1, 7, 32], strides = [1, 1, 1, 1]} : vector<4x4x8x32xf32> to vector<1x1x7x32xf32>
    %173 = vector.shape_cast %172 : vector<1x1x7x32xf32> to vector<7x32xf32>
    %c2_145 = arith.constant 2 : index
    %c2_146 = arith.constant 2 : index
    %c0_147 = arith.constant 0 : index
    %c0_148 = arith.constant 0 : index
    %174 = vector.load %arg2[%c2_145, %c2_146, %c0_147, %c0_148] : memref<3x3x32x32xf32, #tpu.memory_space<vmem>>, vector<1x1x32x32xf32>
    %175 = vector.shape_cast %174 : vector<1x1x32x32xf32> to vector<32x32xf32>
    %cst_149 = arith.constant dense<0.000000e+00> : vector<7x32xf32>
    %176 = tpu.matmul %173, %175, %cst_149 {dimension_numbers = #tpu.dot_dimension_numbers<[1], [0], [0], [1], [0, 0, 1, 1], [], []>} : vector<7x32xf32>, vector<32x32xf32>, vector<7x32xf32> -> vector<7x32xf32>
    %177 = arith.addf %171, %176 : vector<7x32xf32>
    %c0_150 = arith.constant 0 : index
    %c0_151 = arith.constant 0 : index
    %178 = vector.load %arg3[%c0_150, %c0_151] : memref<1x32xf32, #tpu.memory_space<vmem>>, vector<1x32xf32>
    %179 = vector.broadcast %178 : vector<1x32xf32> to vector<7x32xf32>
    %180 = arith.addf %177, %179 : vector<7x32xf32>
    %cst_152 = arith.constant 0.000000e+00 : f32
    %181 = vector.broadcast %cst_152 : f32 to vector<7x32xf32>
    %182 = arith.maximumf %180, %181 : vector<7x32xf32>
    %c2_153 = arith.constant 2 : index
    %c0_154 = arith.constant 0 : index
    %c0_155 = arith.constant 0 : index
    %183 = vector.load %arg4[%c2_153, %c0_154, %c0_155] : memref<3x32x32xf32, #tpu.memory_space<vmem>>, vector<1x32x32xf32>
    %184 = vector.shape_cast %183 : vector<1x32x32xf32> to vector<32x32xf32>
    %cst_156 = arith.constant dense<0.000000e+00> : vector<7x32xf32>
    %185 = tpu.matmul %182, %184, %cst_156 {dimension_numbers = #tpu.dot_dimension_numbers<[1], [0], [0], [1], [0, 0, 1, 1], [], []>} : vector<7x32xf32>, vector<32x32xf32>, vector<7x32xf32> -> vector<7x32xf32>
    %186 = arith.addf %124, %185 : vector<7x32xf32>
    %c0_157 = arith.constant 0 : index
    %c0_158 = arith.constant 0 : index
    %187 = vector.load %arg5[%c0_157, %c0_158] : memref<1x32xf32, #tpu.memory_space<vmem>>, vector<1x32xf32>
    %188 = vector.broadcast %187 : vector<1x32xf32> to vector<7x32xf32>
    %189 = arith.addf %186, %188 : vector<7x32xf32>
    %cst_159 = arith.constant 5.65685415 : f32
    %190 = vector.broadcast %cst_159 : f32 to vector<7x32xf32>
    %191 = arith.mulf %189, %190 : vector<7x32xf32>
    %c0_160 = arith.constant 0 : index
    %c0_161 = arith.constant 0 : index
    %192 = vector.load %arg6[%c0_160, %c0_161] : memref<7x32xf32, #tpu.memory_space<vmem>>, vector<7x32xf32>
    %193 = arith.addf %191, %192 : vector<7x32xf32>
    %c0_162 = arith.constant 0 : index
    %c0_163 = arith.constant 0 : index
    %c0_164 = arith.constant 0 : index
    %194 = vector.load %arg7[%c0_162, %c0_163, %c0_164] : memref<1x7x1xf32, #tpu.memory_space<vmem>>, vector<1x7x1xf32>
    %195 = vector.shape_cast %194 : vector<1x7x1xf32> to vector<7x1xf32>
    %196 = vector.broadcast %195 : vector<7x1xf32> to vector<7x32xf32>
    %197 = arith.mulf %193, %196 : vector<7x32xf32>
    %c0_165 = arith.constant 0 : index
    %c0_166 = arith.constant 0 : index
    %c0_167 = arith.constant 0 : index
    %198 = vector.load %arg8[%c0_165, %c0_166, %c0_167] : memref<1x7x32xf32, #tpu.memory_space<vmem>>, vector<1x7x32xf32>
    %199 = vector.shape_cast %198 : vector<1x7x32xf32> to vector<7x32xf32>
    %200 = vector.shape_cast %197 : vector<7x32xf32> to vector<1x7x32xf32>
    tpu.vector_store %arg8[%c0_165, %c0_166, %c0_167], %200 {strides = array<i32>} : memref<1x7x32xf32, #tpu.memory_space<vmem>>, vector<1x7x32xf32>,
    return
  }
  func.func @transform_0(%arg0: i32) -> (i32, i32, i32, i32, i32) {
    %c0_i32 = arith.constant 0 : i32
    %c0_i32_0 = arith.constant 0 : i32
    %c0_i32_1 = arith.constant 0 : i32
    %c0_i32_2 = arith.constant 0 : i32
    %c0_i32_3 = arith.constant 0 : i32
    return %arg0, %c0_i32, %c0_i32_0, %c0_i32_1, %c0_i32_2 : i32, i32, i32, i32, i32
  }
  func.func @transform_1(%arg0: i32) -> (i32, i32, i32, i32) {
    %c0_i32 = arith.constant 0 : i32
    %c0_i32_0 = arith.constant 0 : i32
    %c0_i32_1 = arith.constant 0 : i32
    %c0_i32_2 = arith.constant 0 : i32
    %c0_i32_3 = arith.constant 0 : i32
    return %c0_i32, %c0_i32_0, %c0_i32_1, %c0_i32_2 : i32, i32, i32, i32
  }
  func.func @transform_2(%arg0: i32) -> (i32, i32) {
    %c0_i32 = arith.constant 0 : i32
    %c0_i32_0 = arith.constant 0 : i32
    %c0_i32_1 = arith.constant 0 : i32
    return %c0_i32, %c0_i32_0 : i32, i32
  }
  func.func @transform_3(%arg0: i32) -> (i32, i32, i32) {
    %c0_i32 = arith.constant 0 : i32
    %c0_i32_0 = arith.constant 0 : i32
    %c0_i32_1 = arith.constant 0 : i32
    %c0_i32_2 = arith.constant 0 : i32
    return %c0_i32, %c0_i32_0, %c0_i32_1 : i32, i32, i32
  }
  func.func @transform_4(%arg0: i32) -> (i32, i32) {
    %c0_i32 = arith.constant 0 : i32
    %c0_i32_0 = arith.constant 0 : i32
    %c0_i32_1 = arith.constant 0 : i32
    return %c0_i32, %c0_i32_0 : i32, i32
  }
  func.func @transform_5(%arg0: i32) -> (i32, i32) {
    %c0_i32 = arith.constant 0 : i32
    %c0_i32_0 = arith.constant 0 : i32
    %c0_i32_1 = arith.constant 0 : i32
    return %c0_i32, %c0_i32_0 : i32, i32
  }
  func.func @transform_6(%arg0: i32) -> (i32, i32, i32) {
    %c0_i32 = arith.constant 0 : i32
    %c0_i32_0 = arith.constant 0 : i32
    %c0_i32_1 = arith.constant 0 : i32
    return %arg0, %c0_i32, %c0_i32_0 : i32, i32, i32
  }
  func.func @transform_7(%arg0: i32) -> (i32, i32, i32) {
    %c0_i32 = arith.constant 0 : i32
    %c0_i32_0 = arith.constant 0 : i32
    %c0_i32_1 = arith.constant 0 : i32
    return %arg0, %c0_i32, %c0_i32_0 : i32, i32, i32
  }
}

module attributes {stable_mosaic.version = 11 : i64} {
  func.func @_encoder_stack_kernel(%arg0: i32, %arg1: i32, %arg2: memref<1x8x32xf32, #tpu.memory_space<vmem>>, %arg3: memref<1x1x8xf32, #tpu.memory_space<vmem>>, %arg4: memref<1x4x32x8xf32, #tpu.memory_space<vmem>>, %arg5: memref<1x4x1x8xf32, #tpu.memory_space<vmem>>, %arg6: memref<1x4x32x8xf32, #tpu.memory_space<vmem>>, %arg7: memref<1x4x1x8xf32, #tpu.memory_space<vmem>>, %arg8: memref<1x4x32x8xf32, #tpu.memory_space<vmem>>, %arg9: memref<1x4x1x8xf32, #tpu.memory_space<vmem>>, %arg10: memref<1x4x8x32xf32, #tpu.memory_space<vmem>>, %arg11: memref<1x1x32xf32, #tpu.memory_space<vmem>>, %arg12: memref<1x32x64xf32, #tpu.memory_space<vmem>>, %arg13: memref<1x1x64xf32, #tpu.memory_space<vmem>>, %arg14: memref<1x32x64xf32, #tpu.memory_space<vmem>>, %arg15: memref<1x1x64xf32, #tpu.memory_space<vmem>>, %arg16: memref<1x64x32xf32, #tpu.memory_space<vmem>>, %arg17: memref<1x1x32xf32, #tpu.memory_space<vmem>>, %arg18: memref<1x1x32xf32, #tpu.memory_space<vmem>>, %arg19: memref<1x1x32xf32, #tpu.memory_space<vmem>>, %arg20: memref<1x1x32xf32, #tpu.memory_space<vmem>>, %arg21: memref<1x1x32xf32, #tpu.memory_space<vmem>>, %arg22: memref<1x8x32xf32, #tpu.memory_space<vmem>>) attributes {dimension_semantics = [#tpu.dimension_semantics<parallel>, #tpu.dimension_semantics<arbitrary>], iteration_bounds = array<i64: 2, 2>, scalar_prefetch = 0 : i64, scratch_operands = 0 : i64, tpu.core_type = #tpu.core_type<tc>, window_params = [{transform_indices = @transform_0, window_bounds = array<i64: 1, 8, 32>}, {transform_indices = @transform_1, window_bounds = array<i64: 1, 1, 8>}, {transform_indices = @transform_2, window_bounds = array<i64: 1, 4, 32, 8>}, {transform_indices = @transform_3, window_bounds = array<i64: 1, 4, 1, 8>}, {transform_indices = @transform_4, window_bounds = array<i64: 1, 4, 32, 8>}, {transform_indices = @transform_5, window_bounds = array<i64: 1, 4, 1, 8>}, {transform_indices = @transform_6, window_bounds = array<i64: 1, 4, 32, 8>}, {transform_indices = @transform_7, window_bounds = array<i64: 1, 4, 1, 8>}, {transform_indices = @transform_8, window_bounds = array<i64: 1, 4, 8, 32>}, {transform_indices = @transform_9, window_bounds = array<i64: 1, 1, 32>}, {transform_indices = @transform_10, window_bounds = array<i64: 1, 32, 64>}, {transform_indices = @transform_11, window_bounds = array<i64: 1, 1, 64>}, {transform_indices = @transform_12, window_bounds = array<i64: 1, 32, 64>}, {transform_indices = @transform_13, window_bounds = array<i64: 1, 1, 64>}, {transform_indices = @transform_14, window_bounds = array<i64: 1, 64, 32>}, {transform_indices = @transform_15, window_bounds = array<i64: 1, 1, 32>}, {transform_indices = @transform_16, window_bounds = array<i64: 1, 1, 32>}, {transform_indices = @transform_17, window_bounds = array<i64: 1, 1, 32>}, {transform_indices = @transform_18, window_bounds = array<i64: 1, 1, 32>}, {transform_indices = @transform_19, window_bounds = array<i64: 1, 1, 32>}, {transform_indices = @transform_20, window_bounds = array<i64: 1, 8, 32>}]} {
    %c0_i32 = arith.constant 0 : i32
    %0 = arith.cmpi eq, %arg1, %c0_i32 : i32
    %1 = arith.extui %0 : i1 to i32
    %c0_i32_0 = arith.constant 0 : i32
    %2 = arith.cmpi ne, %1, %c0_i32_0 : i32
    scf.if %2 {
      %c0_209 = arith.constant 0 : index
      %c0_210 = arith.constant 0 : index
      %c0_211 = arith.constant 0 : index
      %280 = vector.load %arg2[%c0_209, %c0_210, %c0_211] : memref<1x8x32xf32, #tpu.memory_space<vmem>>, vector<1x8x32xf32>
      %281 = vector.shape_cast %280 : vector<1x8x32xf32> to vector<8x32xf32>
      %c0_212 = arith.constant 0 : index
      %c0_213 = arith.constant 0 : index
      %c0_214 = arith.constant 0 : index
      %282 = vector.load %arg22[%c0_212, %c0_213, %c0_214] : memref<1x8x32xf32, #tpu.memory_space<vmem>>, vector<1x8x32xf32>
      %283 = vector.shape_cast %282 : vector<1x8x32xf32> to vector<8x32xf32>
      %284 = vector.shape_cast %281 : vector<8x32xf32> to vector<1x8x32xf32>
      tpu.vector_store %arg22[%c0_212, %c0_213, %c0_214], %284 {strides = array<i32>} : memref<1x8x32xf32, #tpu.memory_space<vmem>>, vector<1x8x32xf32>,
    } else {
    }
    %c0 = arith.constant 0 : index
    %c0_1 = arith.constant 0 : index
    %c0_2 = arith.constant 0 : index
    %3 = vector.load %arg22[%c0, %c0_1, %c0_2] : memref<1x8x32xf32, #tpu.memory_space<vmem>>, vector<1x8x32xf32>
    %4 = vector.shape_cast %3 : vector<1x8x32xf32> to vector<8x32xf32>
    %c0_3 = arith.constant 0 : index
    %c0_4 = arith.constant 0 : index
    %c0_5 = arith.constant 0 : index
    %5 = vector.load %arg3[%c0_3, %c0_4, %c0_5] : memref<1x1x8xf32, #tpu.memory_space<vmem>>, vector<1x1x8xf32>
    %6 = vector.shape_cast %5 : vector<1x1x8xf32> to vector<1x8xf32>
    %cst = arith.constant 0.000000e+00 : f32
    %7 = vector.broadcast %cst : f32 to vector<1x8xf32>
    %8 = arith.cmpf oeq, %6, %7 : vector<1x8xf32>
    %c0_6 = arith.constant 0 : index
    %c0_7 = arith.constant 0 : index
    %c0_8 = arith.constant 0 : index
    %c0_9 = arith.constant 0 : index
    %9 = vector.load %arg4[%c0_6, %c0_7, %c0_8, %c0_9] : memref<1x4x32x8xf32, #tpu.memory_space<vmem>>, vector<1x1x32x8xf32>
    %10 = vector.shape_cast %9 : vector<1x1x32x8xf32> to vector<32x8xf32>
    %cst_10 = arith.constant dense<0.000000e+00> : vector<8x8xf32>
    %11 = tpu.matmul %4, %10, %cst_10 {dimension_numbers = #tpu.dot_dimension_numbers<[1], [0], [0], [1], [0, 0, 1, 1], [], []>} : vector<8x32xf32>, vector<32x8xf32>, vector<8x8xf32> -> vector<8x8xf32>
    %c0_11 = arith.constant 0 : index
    %c0_12 = arith.constant 0 : index
    %c0_13 = arith.constant 0 : index
    %c0_14 = arith.constant 0 : index
    %12 = vector.load %arg5[%c0_11, %c0_12, %c0_13, %c0_14] : memref<1x4x1x8xf32, #tpu.memory_space<vmem>>, vector<1x1x1x8xf32>
    %13 = vector.shape_cast %12 : vector<1x1x1x8xf32> to vector<1x8xf32>
    %14 = vector.broadcast %13 : vector<1x8xf32> to vector<8x8xf32>
    %15 = arith.addf %11, %14 : vector<8x8xf32>
    %cst_15 = arith.constant 0.353553385 : f32
    %16 = vector.broadcast %cst_15 : f32 to vector<8x8xf32>
    %17 = arith.mulf %15, %16 : vector<8x8xf32>
    %c0_16 = arith.constant 0 : index
    %c0_17 = arith.constant 0 : index
    %c0_18 = arith.constant 0 : index
    %c0_19 = arith.constant 0 : index
    %18 = vector.load %arg6[%c0_16, %c0_17, %c0_18, %c0_19] : memref<1x4x32x8xf32, #tpu.memory_space<vmem>>, vector<1x1x32x8xf32>
    %19 = vector.shape_cast %18 : vector<1x1x32x8xf32> to vector<32x8xf32>
    %cst_20 = arith.constant dense<0.000000e+00> : vector<8x8xf32>
    %20 = tpu.matmul %4, %19, %cst_20 {dimension_numbers = #tpu.dot_dimension_numbers<[1], [0], [0], [1], [0, 0, 1, 1], [], []>} : vector<8x32xf32>, vector<32x8xf32>, vector<8x8xf32> -> vector<8x8xf32>
    %c0_21 = arith.constant 0 : index
    %c0_22 = arith.constant 0 : index
    %c0_23 = arith.constant 0 : index
    %c0_24 = arith.constant 0 : index
    %21 = vector.load %arg7[%c0_21, %c0_22, %c0_23, %c0_24] : memref<1x4x1x8xf32, #tpu.memory_space<vmem>>, vector<1x1x1x8xf32>
    %22 = vector.shape_cast %21 : vector<1x1x1x8xf32> to vector<1x8xf32>
    %23 = vector.broadcast %22 : vector<1x8xf32> to vector<8x8xf32>
    %24 = arith.addf %20, %23 : vector<8x8xf32>
    %c0_25 = arith.constant 0 : index
    %c0_26 = arith.constant 0 : index
    %c0_27 = arith.constant 0 : index
    %c0_28 = arith.constant 0 : index
    %25 = vector.load %arg8[%c0_25, %c0_26, %c0_27, %c0_28] : memref<1x4x32x8xf32, #tpu.memory_space<vmem>>, vector<1x1x32x8xf32>
    %26 = vector.shape_cast %25 : vector<1x1x32x8xf32> to vector<32x8xf32>
    %cst_29 = arith.constant dense<0.000000e+00> : vector<8x8xf32>
    %27 = tpu.matmul %4, %26, %cst_29 {dimension_numbers = #tpu.dot_dimension_numbers<[1], [0], [0], [1], [0, 0, 1, 1], [], []>} : vector<8x32xf32>, vector<32x8xf32>, vector<8x8xf32> -> vector<8x8xf32>
    %c0_30 = arith.constant 0 : index
    %c0_31 = arith.constant 0 : index
    %c0_32 = arith.constant 0 : index
    %c0_33 = arith.constant 0 : index
    %28 = vector.load %arg9[%c0_30, %c0_31, %c0_32, %c0_33] : memref<1x4x1x8xf32, #tpu.memory_space<vmem>>, vector<1x1x1x8xf32>
    %29 = vector.shape_cast %28 : vector<1x1x1x8xf32> to vector<1x8xf32>
    %30 = vector.broadcast %29 : vector<1x8xf32> to vector<8x8xf32>
    %31 = arith.addf %27, %30 : vector<8x8xf32>
    %cst_34 = arith.constant dense<0.000000e+00> : vector<8x8xf32>
    %32 = tpu.matmul %17, %24, %cst_34 {dimension_numbers = #tpu.dot_dimension_numbers<[1], [1], [0], [0], [0, 0, 1, 0], [], []>} : vector<8x8xf32>, vector<8x8xf32>, vector<8x8xf32> -> vector<8x8xf32>
    %cst_35 = arith.constant -3.40282347E+38 : f32
    %33 = vector.shape_cast %8 : vector<1x8xi1> to vector<1x8xi1>
    %34 = vector.broadcast %33 : vector<1x8xi1> to vector<8x8xi1>
    %35 = vector.broadcast %cst_35 : f32 to vector<8x8xf32>
    %36 = arith.select %34, %35, %32 : vector<8x8xi1>, vector<8x8xf32>
    %cst_36 = arith.constant dense<0xFF800000> : vector<8xf32>
    %37 = vector.multi_reduction <maximumf>, %36, %cst_36 [1] : vector<8x8xf32> to vector<8xf32>
    %38 = vector.shape_cast %37 : vector<8xf32> to vector<8x1xf32>
    %39 = vector.broadcast %38 : vector<8x1xf32> to vector<8x8xf32>
    %40 = arith.subf %36, %39 : vector<8x8xf32>
    %41 = math.exp %40 : vector<8x8xf32>
    %cst_37 = arith.constant dense<0.000000e+00> : vector<8xf32>
    %42 = vector.multi_reduction <add>, %41, %cst_37 [1] : vector<8x8xf32> to vector<8xf32>
    %43 = vector.shape_cast %42 : vector<8xf32> to vector<8x1xf32>
    %44 = tpu.reciprocal %43 {approx = true} : vector<8x1xf32> -> vector<8x1xf32>
    %45 = vector.broadcast %44 : vector<8x1xf32> to vector<8x8xf32>
    %46 = arith.mulf %41, %45 : vector<8x8xf32>
    %cst_38 = arith.constant 0.000000e+00 : f32
    %47 = vector.shape_cast %8 : vector<1x8xi1> to vector<1x8xi1>
    %48 = vector.broadcast %47 : vector<1x8xi1> to vector<8x8xi1>
    %49 = vector.broadcast %cst_38 : f32 to vector<8x8xf32>
    %50 = arith.select %48, %49, %46 : vector<8x8xi1>, vector<8x8xf32>
    %cst_39 = arith.constant dense<0.000000e+00> : vector<8x8xf32>
    %51 = tpu.matmul %50, %31, %cst_39 {dimension_numbers = #tpu.dot_dimension_numbers<[1], [0], [0], [1], [0, 0, 1, 1], [], []>} : vector<8x8xf32>, vector<8x8xf32>, vector<8x8xf32> -> vector<8x8xf32>
    %c0_40 = arith.constant 0 : index
    %c0_41 = arith.constant 0 : index
    %c0_42 = arith.constant 0 : index
    %c0_43 = arith.constant 0 : index
    %52 = vector.load %arg10[%c0_40, %c0_41, %c0_42, %c0_43] : memref<1x4x8x32xf32, #tpu.memory_space<vmem>>, vector<1x1x8x32xf32>
    %53 = vector.shape_cast %52 : vector<1x1x8x32xf32> to vector<8x32xf32>
    %cst_44 = arith.constant dense<0.000000e+00> : vector<8x32xf32>
    %54 = tpu.matmul %51, %53, %cst_44 {dimension_numbers = #tpu.dot_dimension_numbers<[1], [0], [0], [1], [0, 0, 1, 1], [], []>} : vector<8x8xf32>, vector<8x32xf32>, vector<8x32xf32> -> vector<8x32xf32>
    %c0_45 = arith.constant 0 : index
    %c1 = arith.constant 1 : index
    %c0_46 = arith.constant 0 : index
    %c0_47 = arith.constant 0 : index
    %55 = vector.load %arg4[%c0_45, %c1, %c0_46, %c0_47] : memref<1x4x32x8xf32, #tpu.memory_space<vmem>>, vector<1x1x32x8xf32>
    %56 = vector.shape_cast %55 : vector<1x1x32x8xf32> to vector<32x8xf32>
    %cst_48 = arith.constant dense<0.000000e+00> : vector<8x8xf32>
    %57 = tpu.matmul %4, %56, %cst_48 {dimension_numbers = #tpu.dot_dimension_numbers<[1], [0], [0], [1], [0, 0, 1, 1], [], []>} : vector<8x32xf32>, vector<32x8xf32>, vector<8x8xf32> -> vector<8x8xf32>
    %c0_49 = arith.constant 0 : index
    %c1_50 = arith.constant 1 : index
    %c0_51 = arith.constant 0 : index
    %c0_52 = arith.constant 0 : index
    %58 = vector.load %arg5[%c0_49, %c1_50, %c0_51, %c0_52] : memref<1x4x1x8xf32, #tpu.memory_space<vmem>>, vector<1x1x1x8xf32>
    %59 = vector.shape_cast %58 : vector<1x1x1x8xf32> to vector<1x8xf32>
    %60 = vector.broadcast %59 : vector<1x8xf32> to vector<8x8xf32>
    %61 = arith.addf %57, %60 : vector<8x8xf32>
    %cst_53 = arith.constant 0.353553385 : f32
    %62 = vector.broadcast %cst_53 : f32 to vector<8x8xf32>
    %63 = arith.mulf %61, %62 : vector<8x8xf32>
    %c0_54 = arith.constant 0 : index
    %c1_55 = arith.constant 1 : index
    %c0_56 = arith.constant 0 : index
    %c0_57 = arith.constant 0 : index
    %64 = vector.load %arg6[%c0_54, %c1_55, %c0_56, %c0_57] : memref<1x4x32x8xf32, #tpu.memory_space<vmem>>, vector<1x1x32x8xf32>
    %65 = vector.shape_cast %64 : vector<1x1x32x8xf32> to vector<32x8xf32>
    %cst_58 = arith.constant dense<0.000000e+00> : vector<8x8xf32>
    %66 = tpu.matmul %4, %65, %cst_58 {dimension_numbers = #tpu.dot_dimension_numbers<[1], [0], [0], [1], [0, 0, 1, 1], [], []>} : vector<8x32xf32>, vector<32x8xf32>, vector<8x8xf32> -> vector<8x8xf32>
    %c0_59 = arith.constant 0 : index
    %c1_60 = arith.constant 1 : index
    %c0_61 = arith.constant 0 : index
    %c0_62 = arith.constant 0 : index
    %67 = vector.load %arg7[%c0_59, %c1_60, %c0_61, %c0_62] : memref<1x4x1x8xf32, #tpu.memory_space<vmem>>, vector<1x1x1x8xf32>
    %68 = vector.shape_cast %67 : vector<1x1x1x8xf32> to vector<1x8xf32>
    %69 = vector.broadcast %68 : vector<1x8xf32> to vector<8x8xf32>
    %70 = arith.addf %66, %69 : vector<8x8xf32>
    %c0_63 = arith.constant 0 : index
    %c1_64 = arith.constant 1 : index
    %c0_65 = arith.constant 0 : index
    %c0_66 = arith.constant 0 : index
    %71 = vector.load %arg8[%c0_63, %c1_64, %c0_65, %c0_66] : memref<1x4x32x8xf32, #tpu.memory_space<vmem>>, vector<1x1x32x8xf32>
    %72 = vector.shape_cast %71 : vector<1x1x32x8xf32> to vector<32x8xf32>
    %cst_67 = arith.constant dense<0.000000e+00> : vector<8x8xf32>
    %73 = tpu.matmul %4, %72, %cst_67 {dimension_numbers = #tpu.dot_dimension_numbers<[1], [0], [0], [1], [0, 0, 1, 1], [], []>} : vector<8x32xf32>, vector<32x8xf32>, vector<8x8xf32> -> vector<8x8xf32>
    %c0_68 = arith.constant 0 : index
    %c1_69 = arith.constant 1 : index
    %c0_70 = arith.constant 0 : index
    %c0_71 = arith.constant 0 : index
    %74 = vector.load %arg9[%c0_68, %c1_69, %c0_70, %c0_71] : memref<1x4x1x8xf32, #tpu.memory_space<vmem>>, vector<1x1x1x8xf32>
    %75 = vector.shape_cast %74 : vector<1x1x1x8xf32> to vector<1x8xf32>
    %76 = vector.broadcast %75 : vector<1x8xf32> to vector<8x8xf32>
    %77 = arith.addf %73, %76 : vector<8x8xf32>
    %cst_72 = arith.constant dense<0.000000e+00> : vector<8x8xf32>
    %78 = tpu.matmul %63, %70, %cst_72 {dimension_numbers = #tpu.dot_dimension_numbers<[1], [1], [0], [0], [0, 0, 1, 0], [], []>} : vector<8x8xf32>, vector<8x8xf32>, vector<8x8xf32> -> vector<8x8xf32>
    %cst_73 = arith.constant -3.40282347E+38 : f32
    %79 = vector.shape_cast %8 : vector<1x8xi1> to vector<1x8xi1>
    %80 = vector.broadcast %79 : vector<1x8xi1> to vector<8x8xi1>
    %81 = vector.broadcast %cst_73 : f32 to vector<8x8xf32>
    %82 = arith.select %80, %81, %78 : vector<8x8xi1>, vector<8x8xf32>
    %cst_74 = arith.constant dense<0xFF800000> : vector<8xf32>
    %83 = vector.multi_reduction <maximumf>, %82, %cst_74 [1] : vector<8x8xf32> to vector<8xf32>
    %84 = vector.shape_cast %83 : vector<8xf32> to vector<8x1xf32>
    %85 = vector.broadcast %84 : vector<8x1xf32> to vector<8x8xf32>
    %86 = arith.subf %82, %85 : vector<8x8xf32>
    %87 = math.exp %86 : vector<8x8xf32>
    %cst_75 = arith.constant dense<0.000000e+00> : vector<8xf32>
    %88 = vector.multi_reduction <add>, %87, %cst_75 [1] : vector<8x8xf32> to vector<8xf32>
    %89 = vector.shape_cast %88 : vector<8xf32> to vector<8x1xf32>
    %90 = tpu.reciprocal %89 {approx = true} : vector<8x1xf32> -> vector<8x1xf32>
    %91 = vector.broadcast %90 : vector<8x1xf32> to vector<8x8xf32>
    %92 = arith.mulf %87, %91 : vector<8x8xf32>
    %cst_76 = arith.constant 0.000000e+00 : f32
    %93 = vector.shape_cast %8 : vector<1x8xi1> to vector<1x8xi1>
    %94 = vector.broadcast %93 : vector<1x8xi1> to vector<8x8xi1>
    %95 = vector.broadcast %cst_76 : f32 to vector<8x8xf32>
    %96 = arith.select %94, %95, %92 : vector<8x8xi1>, vector<8x8xf32>
    %cst_77 = arith.constant dense<0.000000e+00> : vector<8x8xf32>
    %97 = tpu.matmul %96, %77, %cst_77 {dimension_numbers = #tpu.dot_dimension_numbers<[1], [0], [0], [1], [0, 0, 1, 1], [], []>} : vector<8x8xf32>, vector<8x8xf32>, vector<8x8xf32> -> vector<8x8xf32>
    %c0_78 = arith.constant 0 : index
    %c1_79 = arith.constant 1 : index
    %c0_80 = arith.constant 0 : index
    %c0_81 = arith.constant 0 : index
    %98 = vector.load %arg10[%c0_78, %c1_79, %c0_80, %c0_81] : memref<1x4x8x32xf32, #tpu.memory_space<vmem>>, vector<1x1x8x32xf32>
    %99 = vector.shape_cast %98 : vector<1x1x8x32xf32> to vector<8x32xf32>
    %cst_82 = arith.constant dense<0.000000e+00> : vector<8x32xf32>
    %100 = tpu.matmul %97, %99, %cst_82 {dimension_numbers = #tpu.dot_dimension_numbers<[1], [0], [0], [1], [0, 0, 1, 1], [], []>} : vector<8x8xf32>, vector<8x32xf32>, vector<8x32xf32> -> vector<8x32xf32>
    %101 = arith.addf %54, %100 : vector<8x32xf32>
    %c0_83 = arith.constant 0 : index
    %c2 = arith.constant 2 : index
    %c0_84 = arith.constant 0 : index
    %c0_85 = arith.constant 0 : index
    %102 = vector.load %arg4[%c0_83, %c2, %c0_84, %c0_85] : memref<1x4x32x8xf32, #tpu.memory_space<vmem>>, vector<1x1x32x8xf32>
    %103 = vector.shape_cast %102 : vector<1x1x32x8xf32> to vector<32x8xf32>
    %cst_86 = arith.constant dense<0.000000e+00> : vector<8x8xf32>
    %104 = tpu.matmul %4, %103, %cst_86 {dimension_numbers = #tpu.dot_dimension_numbers<[1], [0], [0], [1], [0, 0, 1, 1], [], []>} : vector<8x32xf32>, vector<32x8xf32>, vector<8x8xf32> -> vector<8x8xf32>
    %c0_87 = arith.constant 0 : index
    %c2_88 = arith.constant 2 : index
    %c0_89 = arith.constant 0 : index
    %c0_90 = arith.constant 0 : index
    %105 = vector.load %arg5[%c0_87, %c2_88, %c0_89, %c0_90] : memref<1x4x1x8xf32, #tpu.memory_space<vmem>>, vector<1x1x1x8xf32>
    %106 = vector.shape_cast %105 : vector<1x1x1x8xf32> to vector<1x8xf32>
    %107 = vector.broadcast %106 : vector<1x8xf32> to vector<8x8xf32>
    %108 = arith.addf %104, %107 : vector<8x8xf32>
    %cst_91 = arith.constant 0.353553385 : f32
    %109 = vector.broadcast %cst_91 : f32 to vector<8x8xf32>
    %110 = arith.mulf %108, %109 : vector<8x8xf32>
    %c0_92 = arith.constant 0 : index
    %c2_93 = arith.constant 2 : index
    %c0_94 = arith.constant 0 : index
    %c0_95 = arith.constant 0 : index
    %111 = vector.load %arg6[%c0_92, %c2_93, %c0_94, %c0_95] : memref<1x4x32x8xf32, #tpu.memory_space<vmem>>, vector<1x1x32x8xf32>
    %112 = vector.shape_cast %111 : vector<1x1x32x8xf32> to vector<32x8xf32>
    %cst_96 = arith.constant dense<0.000000e+00> : vector<8x8xf32>
    %113 = tpu.matmul %4, %112, %cst_96 {dimension_numbers = #tpu.dot_dimension_numbers<[1], [0], [0], [1], [0, 0, 1, 1], [], []>} : vector<8x32xf32>, vector<32x8xf32>, vector<8x8xf32> -> vector<8x8xf32>
    %c0_97 = arith.constant 0 : index
    %c2_98 = arith.constant 2 : index
    %c0_99 = arith.constant 0 : index
    %c0_100 = arith.constant 0 : index
    %114 = vector.load %arg7[%c0_97, %c2_98, %c0_99, %c0_100] : memref<1x4x1x8xf32, #tpu.memory_space<vmem>>, vector<1x1x1x8xf32>
    %115 = vector.shape_cast %114 : vector<1x1x1x8xf32> to vector<1x8xf32>
    %116 = vector.broadcast %115 : vector<1x8xf32> to vector<8x8xf32>
    %117 = arith.addf %113, %116 : vector<8x8xf32>
    %c0_101 = arith.constant 0 : index
    %c2_102 = arith.constant 2 : index
    %c0_103 = arith.constant 0 : index
    %c0_104 = arith.constant 0 : index
    %118 = vector.load %arg8[%c0_101, %c2_102, %c0_103, %c0_104] : memref<1x4x32x8xf32, #tpu.memory_space<vmem>>, vector<1x1x32x8xf32>
    %119 = vector.shape_cast %118 : vector<1x1x32x8xf32> to vector<32x8xf32>
    %cst_105 = arith.constant dense<0.000000e+00> : vector<8x8xf32>
    %120 = tpu.matmul %4, %119, %cst_105 {dimension_numbers = #tpu.dot_dimension_numbers<[1], [0], [0], [1], [0, 0, 1, 1], [], []>} : vector<8x32xf32>, vector<32x8xf32>, vector<8x8xf32> -> vector<8x8xf32>
    %c0_106 = arith.constant 0 : index
    %c2_107 = arith.constant 2 : index
    %c0_108 = arith.constant 0 : index
    %c0_109 = arith.constant 0 : index
    %121 = vector.load %arg9[%c0_106, %c2_107, %c0_108, %c0_109] : memref<1x4x1x8xf32, #tpu.memory_space<vmem>>, vector<1x1x1x8xf32>
    %122 = vector.shape_cast %121 : vector<1x1x1x8xf32> to vector<1x8xf32>
    %123 = vector.broadcast %122 : vector<1x8xf32> to vector<8x8xf32>
    %124 = arith.addf %120, %123 : vector<8x8xf32>
    %cst_110 = arith.constant dense<0.000000e+00> : vector<8x8xf32>
    %125 = tpu.matmul %110, %117, %cst_110 {dimension_numbers = #tpu.dot_dimension_numbers<[1], [1], [0], [0], [0, 0, 1, 0], [], []>} : vector<8x8xf32>, vector<8x8xf32>, vector<8x8xf32> -> vector<8x8xf32>
    %cst_111 = arith.constant -3.40282347E+38 : f32
    %126 = vector.shape_cast %8 : vector<1x8xi1> to vector<1x8xi1>
    %127 = vector.broadcast %126 : vector<1x8xi1> to vector<8x8xi1>
    %128 = vector.broadcast %cst_111 : f32 to vector<8x8xf32>
    %129 = arith.select %127, %128, %125 : vector<8x8xi1>, vector<8x8xf32>
    %cst_112 = arith.constant dense<0xFF800000> : vector<8xf32>
    %130 = vector.multi_reduction <maximumf>, %129, %cst_112 [1] : vector<8x8xf32> to vector<8xf32>
    %131 = vector.shape_cast %130 : vector<8xf32> to vector<8x1xf32>
    %132 = vector.broadcast %131 : vector<8x1xf32> to vector<8x8xf32>
    %133 = arith.subf %129, %132 : vector<8x8xf32>
    %134 = math.exp %133 : vector<8x8xf32>
    %cst_113 = arith.constant dense<0.000000e+00> : vector<8xf32>
    %135 = vector.multi_reduction <add>, %134, %cst_113 [1] : vector<8x8xf32> to vector<8xf32>
    %136 = vector.shape_cast %135 : vector<8xf32> to vector<8x1xf32>
    %137 = tpu.reciprocal %136 {approx = true} : vector<8x1xf32> -> vector<8x1xf32>
    %138 = vector.broadcast %137 : vector<8x1xf32> to vector<8x8xf32>
    %139 = arith.mulf %134, %138 : vector<8x8xf32>
    %cst_114 = arith.constant 0.000000e+00 : f32
    %140 = vector.shape_cast %8 : vector<1x8xi1> to vector<1x8xi1>
    %141 = vector.broadcast %140 : vector<1x8xi1> to vector<8x8xi1>
    %142 = vector.broadcast %cst_114 : f32 to vector<8x8xf32>
    %143 = arith.select %141, %142, %139 : vector<8x8xi1>, vector<8x8xf32>
    %cst_115 = arith.constant dense<0.000000e+00> : vector<8x8xf32>
    %144 = tpu.matmul %143, %124, %cst_115 {dimension_numbers = #tpu.dot_dimension_numbers<[1], [0], [0], [1], [0, 0, 1, 1], [], []>} : vector<8x8xf32>, vector<8x8xf32>, vector<8x8xf32> -> vector<8x8xf32>
    %c0_116 = arith.constant 0 : index
    %c2_117 = arith.constant 2 : index
    %c0_118 = arith.constant 0 : index
    %c0_119 = arith.constant 0 : index
    %145 = vector.load %arg10[%c0_116, %c2_117, %c0_118, %c0_119] : memref<1x4x8x32xf32, #tpu.memory_space<vmem>>, vector<1x1x8x32xf32>
    %146 = vector.shape_cast %145 : vector<1x1x8x32xf32> to vector<8x32xf32>
    %cst_120 = arith.constant dense<0.000000e+00> : vector<8x32xf32>
    %147 = tpu.matmul %144, %146, %cst_120 {dimension_numbers = #tpu.dot_dimension_numbers<[1], [0], [0], [1], [0, 0, 1, 1], [], []>} : vector<8x8xf32>, vector<8x32xf32>, vector<8x32xf32> -> vector<8x32xf32>
    %148 = arith.addf %101, %147 : vector<8x32xf32>
    %c0_121 = arith.constant 0 : index
    %c3 = arith.constant 3 : index
    %c0_122 = arith.constant 0 : index
    %c0_123 = arith.constant 0 : index
    %149 = vector.load %arg4[%c0_121, %c3, %c0_122, %c0_123] : memref<1x4x32x8xf32, #tpu.memory_space<vmem>>, vector<1x1x32x8xf32>
    %150 = vector.shape_cast %149 : vector<1x1x32x8xf32> to vector<32x8xf32>
    %cst_124 = arith.constant dense<0.000000e+00> : vector<8x8xf32>
    %151 = tpu.matmul %4, %150, %cst_124 {dimension_numbers = #tpu.dot_dimension_numbers<[1], [0], [0], [1], [0, 0, 1, 1], [], []>} : vector<8x32xf32>, vector<32x8xf32>, vector<8x8xf32> -> vector<8x8xf32>
    %c0_125 = arith.constant 0 : index
    %c3_126 = arith.constant 3 : index
    %c0_127 = arith.constant 0 : index
    %c0_128 = arith.constant 0 : index
    %152 = vector.load %arg5[%c0_125, %c3_126, %c0_127, %c0_128] : memref<1x4x1x8xf32, #tpu.memory_space<vmem>>, vector<1x1x1x8xf32>
    %153 = vector.shape_cast %152 : vector<1x1x1x8xf32> to vector<1x8xf32>
    %154 = vector.broadcast %153 : vector<1x8xf32> to vector<8x8xf32>
    %155 = arith.addf %151, %154 : vector<8x8xf32>
    %cst_129 = arith.constant 0.353553385 : f32
    %156 = vector.broadcast %cst_129 : f32 to vector<8x8xf32>
    %157 = arith.mulf %155, %156 : vector<8x8xf32>
    %c0_130 = arith.constant 0 : index
    %c3_131 = arith.constant 3 : index
    %c0_132 = arith.constant 0 : index
    %c0_133 = arith.constant 0 : index
    %158 = vector.load %arg6[%c0_130, %c3_131, %c0_132, %c0_133] : memref<1x4x32x8xf32, #tpu.memory_space<vmem>>, vector<1x1x32x8xf32>
    %159 = vector.shape_cast %158 : vector<1x1x32x8xf32> to vector<32x8xf32>
    %cst_134 = arith.constant dense<0.000000e+00> : vector<8x8xf32>
    %160 = tpu.matmul %4, %159, %cst_134 {dimension_numbers = #tpu.dot_dimension_numbers<[1], [0], [0], [1], [0, 0, 1, 1], [], []>} : vector<8x32xf32>, vector<32x8xf32>, vector<8x8xf32> -> vector<8x8xf32>
    %c0_135 = arith.constant 0 : index
    %c3_136 = arith.constant 3 : index
    %c0_137 = arith.constant 0 : index
    %c0_138 = arith.constant 0 : index
    %161 = vector.load %arg7[%c0_135, %c3_136, %c0_137, %c0_138] : memref<1x4x1x8xf32, #tpu.memory_space<vmem>>, vector<1x1x1x8xf32>
    %162 = vector.shape_cast %161 : vector<1x1x1x8xf32> to vector<1x8xf32>
    %163 = vector.broadcast %162 : vector<1x8xf32> to vector<8x8xf32>
    %164 = arith.addf %160, %163 : vector<8x8xf32>
    %c0_139 = arith.constant 0 : index
    %c3_140 = arith.constant 3 : index
    %c0_141 = arith.constant 0 : index
    %c0_142 = arith.constant 0 : index
    %165 = vector.load %arg8[%c0_139, %c3_140, %c0_141, %c0_142] : memref<1x4x32x8xf32, #tpu.memory_space<vmem>>, vector<1x1x32x8xf32>
    %166 = vector.shape_cast %165 : vector<1x1x32x8xf32> to vector<32x8xf32>
    %cst_143 = arith.constant dense<0.000000e+00> : vector<8x8xf32>
    %167 = tpu.matmul %4, %166, %cst_143 {dimension_numbers = #tpu.dot_dimension_numbers<[1], [0], [0], [1], [0, 0, 1, 1], [], []>} : vector<8x32xf32>, vector<32x8xf32>, vector<8x8xf32> -> vector<8x8xf32>
    %c0_144 = arith.constant 0 : index
    %c3_145 = arith.constant 3 : index
    %c0_146 = arith.constant 0 : index
    %c0_147 = arith.constant 0 : index
    %168 = vector.load %arg9[%c0_144, %c3_145, %c0_146, %c0_147] : memref<1x4x1x8xf32, #tpu.memory_space<vmem>>, vector<1x1x1x8xf32>
    %169 = vector.shape_cast %168 : vector<1x1x1x8xf32> to vector<1x8xf32>
    %170 = vector.broadcast %169 : vector<1x8xf32> to vector<8x8xf32>
    %171 = arith.addf %167, %170 : vector<8x8xf32>
    %cst_148 = arith.constant dense<0.000000e+00> : vector<8x8xf32>
    %172 = tpu.matmul %157, %164, %cst_148 {dimension_numbers = #tpu.dot_dimension_numbers<[1], [1], [0], [0], [0, 0, 1, 0], [], []>} : vector<8x8xf32>, vector<8x8xf32>, vector<8x8xf32> -> vector<8x8xf32>
    %cst_149 = arith.constant -3.40282347E+38 : f32
    %173 = vector.shape_cast %8 : vector<1x8xi1> to vector<1x8xi1>
    %174 = vector.broadcast %173 : vector<1x8xi1> to vector<8x8xi1>
    %175 = vector.broadcast %cst_149 : f32 to vector<8x8xf32>
    %176 = arith.select %174, %175, %172 : vector<8x8xi1>, vector<8x8xf32>
    %cst_150 = arith.constant dense<0xFF800000> : vector<8xf32>
    %177 = vector.multi_reduction <maximumf>, %176, %cst_150 [1] : vector<8x8xf32> to vector<8xf32>
    %178 = vector.shape_cast %177 : vector<8xf32> to vector<8x1xf32>
    %179 = vector.broadcast %178 : vector<8x1xf32> to vector<8x8xf32>
    %180 = arith.subf %176, %179 : vector<8x8xf32>
    %181 = math.exp %180 : vector<8x8xf32>
    %cst_151 = arith.constant dense<0.000000e+00> : vector<8xf32>
    %182 = vector.multi_reduction <add>, %181, %cst_151 [1] : vector<8x8xf32> to vector<8xf32>
    %183 = vector.shape_cast %182 : vector<8xf32> to vector<8x1xf32>
    %184 = tpu.reciprocal %183 {approx = true} : vector<8x1xf32> -> vector<8x1xf32>
    %185 = vector.broadcast %184 : vector<8x1xf32> to vector<8x8xf32>
    %186 = arith.mulf %181, %185 : vector<8x8xf32>
    %cst_152 = arith.constant 0.000000e+00 : f32
    %187 = vector.shape_cast %8 : vector<1x8xi1> to vector<1x8xi1>
    %188 = vector.broadcast %187 : vector<1x8xi1> to vector<8x8xi1>
    %189 = vector.broadcast %cst_152 : f32 to vector<8x8xf32>
    %190 = arith.select %188, %189, %186 : vector<8x8xi1>, vector<8x8xf32>
    %cst_153 = arith.constant dense<0.000000e+00> : vector<8x8xf32>
    %191 = tpu.matmul %190, %171, %cst_153 {dimension_numbers = #tpu.dot_dimension_numbers<[1], [0], [0], [1], [0, 0, 1, 1], [], []>} : vector<8x8xf32>, vector<8x8xf32>, vector<8x8xf32> -> vector<8x8xf32>
    %c0_154 = arith.constant 0 : index
    %c3_155 = arith.constant 3 : index
    %c0_156 = arith.constant 0 : index
    %c0_157 = arith.constant 0 : index
    %192 = vector.load %arg10[%c0_154, %c3_155, %c0_156, %c0_157] : memref<1x4x8x32xf32, #tpu.memory_space<vmem>>, vector<1x1x8x32xf32>
    %193 = vector.shape_cast %192 : vector<1x1x8x32xf32> to vector<8x32xf32>
    %cst_158 = arith.constant dense<0.000000e+00> : vector<8x32xf32>
    %194 = tpu.matmul %191, %193, %cst_158 {dimension_numbers = #tpu.dot_dimension_numbers<[1], [0], [0], [1], [0, 0, 1, 1], [], []>} : vector<8x8xf32>, vector<8x32xf32>, vector<8x32xf32> -> vector<8x32xf32>
    %195 = arith.addf %148, %194 : vector<8x32xf32>
    %c0_159 = arith.constant 0 : index
    %c0_160 = arith.constant 0 : index
    %c0_161 = arith.constant 0 : index
    %196 = vector.load %arg11[%c0_159, %c0_160, %c0_161] : memref<1x1x32xf32, #tpu.memory_space<vmem>>, vector<1x1x32xf32>
    %197 = vector.shape_cast %196 : vector<1x1x32xf32> to vector<1x32xf32>
    %198 = vector.broadcast %197 : vector<1x32xf32> to vector<8x32xf32>
    %199 = arith.addf %195, %198 : vector<8x32xf32>
    %200 = arith.addf %4, %199 : vector<8x32xf32>
    %c0_162 = arith.constant 0 : index
    %c0_163 = arith.constant 0 : index
    %c0_164 = arith.constant 0 : index
    %201 = vector.load %arg18[%c0_162, %c0_163, %c0_164] : memref<1x1x32xf32, #tpu.memory_space<vmem>>, vector<1x1x32xf32>
    %202 = vector.shape_cast %201 : vector<1x1x32xf32> to vector<1x32xf32>
    %c0_165 = arith.constant 0 : index
    %c0_166 = arith.constant 0 : index
    %c0_167 = arith.constant 0 : index
    %203 = vector.load %arg19[%c0_165, %c0_166, %c0_167] : memref<1x1x32xf32, #tpu.memory_space<vmem>>, vector<1x1x32xf32>
    %204 = vector.shape_cast %203 : vector<1x1x32xf32> to vector<1x32xf32>
    %cst_168 = arith.constant dense<0.000000e+00> : vector<8xf32>
    %205 = vector.multi_reduction <add>, %200, %cst_168 [1] : vector<8x32xf32> to vector<8xf32>
    %206 = vector.shape_cast %205 : vector<8xf32> to vector<8x1xf32>
    %cst_169 = arith.constant 3.200000e+01 : f32
    %207 = vector.broadcast %cst_169 : f32 to vector<8x1xf32>
    %208 = arith.divf %206, %207 : vector<8x1xf32>
    %209 = vector.broadcast %208 : vector<8x1xf32> to vector<8x32xf32>
    %210 = arith.subf %200, %209 : vector<8x32xf32>
    %211 = arith.mulf %210, %210 : vector<8x32xf32>
    %cst_170 = arith.constant dense<0.000000e+00> : vector<8xf32>
    %212 = vector.multi_reduction <add>, %211, %cst_170 [1] : vector<8x32xf32> to vector<8xf32>
    %213 = vector.shape_cast %212 : vector<8xf32> to vector<8x1xf32>
    %cst_171 = arith.constant 3.200000e+01 : f32
    %214 = vector.broadcast %cst_171 : f32 to vector<8x1xf32>
    %215 = arith.divf %213, %214 : vector<8x1xf32>
    %cst_172 = arith.constant 9.99999974E-6 : f32
    %216 = vector.broadcast %cst_172 : f32 to vector<8x1xf32>
    %217 = arith.addf %215, %216 : vector<8x1xf32>
    %218 = math.rsqrt %217 : vector<8x1xf32>
    %219 = vector.broadcast %218 : vector<8x1xf32> to vector<8x32xf32>
    %220 = arith.mulf %210, %219 : vector<8x32xf32>
    %221 = vector.broadcast %202 : vector<1x32xf32> to vector<8x32xf32>
    %222 = arith.mulf %220, %221 : vector<8x32xf32>
    %223 = vector.broadcast %204 : vector<1x32xf32> to vector<8x32xf32>
    %224 = arith.addf %222, %223 : vector<8x32xf32>
    %c0_173 = arith.constant 0 : index
    %c0_174 = arith.constant 0 : index
    %c0_175 = arith.constant 0 : index
    %225 = vector.load %arg12[%c0_173, %c0_174, %c0_175] : memref<1x32x64xf32, #tpu.memory_space<vmem>>, vector<1x32x64xf32>
    %226 = vector.shape_cast %225 : vector<1x32x64xf32> to vector<32x64xf32>
    %cst_176 = arith.constant dense<0.000000e+00> : vector<8x64xf32>
    %227 = tpu.matmul %224, %226, %cst_176 {dimension_numbers = #tpu.dot_dimension_numbers<[1], [0], [0], [1], [0, 0, 1, 1], [], []>} : vector<8x32xf32>, vector<32x64xf32>, vector<8x64xf32> -> vector<8x64xf32>
    %c0_177 = arith.constant 0 : index
    %c0_178 = arith.constant 0 : index
    %c0_179 = arith.constant 0 : index
    %228 = vector.load %arg13[%c0_177, %c0_178, %c0_179] : memref<1x1x64xf32, #tpu.memory_space<vmem>>, vector<1x1x64xf32>
    %229 = vector.shape_cast %228 : vector<1x1x64xf32> to vector<1x64xf32>
    %230 = vector.broadcast %229 : vector<1x64xf32> to vector<8x64xf32>
    %231 = arith.addf %227, %230 : vector<8x64xf32>
    %c0_180 = arith.constant 0 : index
    %c0_181 = arith.constant 0 : index
    %c0_182 = arith.constant 0 : index
    %232 = vector.load %arg14[%c0_180, %c0_181, %c0_182] : memref<1x32x64xf32, #tpu.memory_space<vmem>>, vector<1x32x64xf32>
    %233 = vector.shape_cast %232 : vector<1x32x64xf32> to vector<32x64xf32>
    %cst_183 = arith.constant dense<0.000000e+00> : vector<8x64xf32>
    %234 = tpu.matmul %224, %233, %cst_183 {dimension_numbers = #tpu.dot_dimension_numbers<[1], [0], [0], [1], [0, 0, 1, 1], [], []>} : vector<8x32xf32>, vector<32x64xf32>, vector<8x64xf32> -> vector<8x64xf32>
    %c0_184 = arith.constant 0 : index
    %c0_185 = arith.constant 0 : index
    %c0_186 = arith.constant 0 : index
    %235 = vector.load %arg15[%c0_184, %c0_185, %c0_186] : memref<1x1x64xf32, #tpu.memory_space<vmem>>, vector<1x1x64xf32>
    %236 = vector.shape_cast %235 : vector<1x1x64xf32> to vector<1x64xf32>
    %237 = vector.broadcast %236 : vector<1x64xf32> to vector<8x64xf32>
    %238 = arith.addf %234, %237 : vector<8x64xf32>
    %239 = arith.negf %238 : vector<8x64xf32>
    %240 = math.exp %239 : vector<8x64xf32>
    %cst_187 = arith.constant 1.000000e+00 : f32
    %241 = vector.broadcast %cst_187 : f32 to vector<8x64xf32>
    %242 = arith.addf %241, %240 : vector<8x64xf32>
    %243 = arith.divf %241, %242 : vector<8x64xf32>
    %244 = arith.mulf %231, %243 : vector<8x64xf32>
    %c0_188 = arith.constant 0 : index
    %c0_189 = arith.constant 0 : index
    %c0_190 = arith.constant 0 : index
    %245 = vector.load %arg16[%c0_188, %c0_189, %c0_190] : memref<1x64x32xf32, #tpu.memory_space<vmem>>, vector<1x64x32xf32>
    %246 = vector.shape_cast %245 : vector<1x64x32xf32> to vector<64x32xf32>
    %cst_191 = arith.constant dense<0.000000e+00> : vector<8x32xf32>
    %247 = tpu.matmul %244, %246, %cst_191 {dimension_numbers = #tpu.dot_dimension_numbers<[1], [0], [0], [1], [0, 0, 1, 1], [], []>} : vector<8x64xf32>, vector<64x32xf32>, vector<8x32xf32> -> vector<8x32xf32>
    %c0_192 = arith.constant 0 : index
    %c0_193 = arith.constant 0 : index
    %c0_194 = arith.constant 0 : index
    %248 = vector.load %arg17[%c0_192, %c0_193, %c0_194] : memref<1x1x32xf32, #tpu.memory_space<vmem>>, vector<1x1x32xf32>
    %249 = vector.shape_cast %248 : vector<1x1x32xf32> to vector<1x32xf32>
    %250 = vector.broadcast %249 : vector<1x32xf32> to vector<8x32xf32>
    %251 = arith.addf %247, %250 : vector<8x32xf32>
    %252 = arith.addf %224, %251 : vector<8x32xf32>
    %c0_195 = arith.constant 0 : index
    %c0_196 = arith.constant 0 : index
    %c0_197 = arith.constant 0 : index
    %253 = vector.load %arg20[%c0_195, %c0_196, %c0_197] : memref<1x1x32xf32, #tpu.memory_space<vmem>>, vector<1x1x32xf32>
    %254 = vector.shape_cast %253 : vector<1x1x32xf32> to vector<1x32xf32>
    %c0_198 = arith.constant 0 : index
    %c0_199 = arith.constant 0 : index
    %c0_200 = arith.constant 0 : index
    %255 = vector.load %arg21[%c0_198, %c0_199, %c0_200] : memref<1x1x32xf32, #tpu.memory_space<vmem>>, vector<1x1x32xf32>
    %256 = vector.shape_cast %255 : vector<1x1x32xf32> to vector<1x32xf32>
    %cst_201 = arith.constant dense<0.000000e+00> : vector<8xf32>
    %257 = vector.multi_reduction <add>, %252, %cst_201 [1] : vector<8x32xf32> to vector<8xf32>
    %258 = vector.shape_cast %257 : vector<8xf32> to vector<8x1xf32>
    %cst_202 = arith.constant 3.200000e+01 : f32
    %259 = vector.broadcast %cst_202 : f32 to vector<8x1xf32>
    %260 = arith.divf %258, %259 : vector<8x1xf32>
    %261 = vector.broadcast %260 : vector<8x1xf32> to vector<8x32xf32>
    %262 = arith.subf %252, %261 : vector<8x32xf32>
    %263 = arith.mulf %262, %262 : vector<8x32xf32>
    %cst_203 = arith.constant dense<0.000000e+00> : vector<8xf32>
    %264 = vector.multi_reduction <add>, %263, %cst_203 [1] : vector<8x32xf32> to vector<8xf32>
    %265 = vector.shape_cast %264 : vector<8xf32> to vector<8x1xf32>
    %cst_204 = arith.constant 3.200000e+01 : f32
    %266 = vector.broadcast %cst_204 : f32 to vector<8x1xf32>
    %267 = arith.divf %265, %266 : vector<8x1xf32>
    %cst_205 = arith.constant 9.99999974E-6 : f32
    %268 = vector.broadcast %cst_205 : f32 to vector<8x1xf32>
    %269 = arith.addf %267, %268 : vector<8x1xf32>
    %270 = math.rsqrt %269 : vector<8x1xf32>
    %271 = vector.broadcast %270 : vector<8x1xf32> to vector<8x32xf32>
    %272 = arith.mulf %262, %271 : vector<8x32xf32>
    %273 = vector.broadcast %254 : vector<1x32xf32> to vector<8x32xf32>
    %274 = arith.mulf %272, %273 : vector<8x32xf32>
    %275 = vector.broadcast %256 : vector<1x32xf32> to vector<8x32xf32>
    %276 = arith.addf %274, %275 : vector<8x32xf32>
    %c0_206 = arith.constant 0 : index
    %c0_207 = arith.constant 0 : index
    %c0_208 = arith.constant 0 : index
    %277 = vector.load %arg22[%c0_206, %c0_207, %c0_208] : memref<1x8x32xf32, #tpu.memory_space<vmem>>, vector<1x8x32xf32>
    %278 = vector.shape_cast %277 : vector<1x8x32xf32> to vector<8x32xf32>
    %279 = vector.shape_cast %276 : vector<8x32xf32> to vector<1x8x32xf32>
    tpu.vector_store %arg22[%c0_206, %c0_207, %c0_208], %279 {strides = array<i32>} : memref<1x8x32xf32, #tpu.memory_space<vmem>>, vector<1x8x32xf32>,
    return
  }
  func.func @transform_0(%arg0: i32, %arg1: i32) -> (i32, i32, i32) {
    %c0_i32 = arith.constant 0 : i32
    %c0_i32_0 = arith.constant 0 : i32
    %c0_i32_1 = arith.constant 0 : i32
    return %arg0, %c0_i32, %c0_i32_0 : i32, i32, i32
  }
  func.func @transform_1(%arg0: i32, %arg1: i32) -> (i32, i32, i32) {
    %c0_i32 = arith.constant 0 : i32
    %c0_i32_0 = arith.constant 0 : i32
    %c0_i32_1 = arith.constant 0 : i32
    return %arg0, %c0_i32, %c0_i32_0 : i32, i32, i32
  }
  func.func @transform_2(%arg0: i32, %arg1: i32) -> (i32, i32, i32, i32) {
    %c0_i32 = arith.constant 0 : i32
    %c0_i32_0 = arith.constant 0 : i32
    %c0_i32_1 = arith.constant 0 : i32
    %c0_i32_2 = arith.constant 0 : i32
    return %arg1, %c0_i32, %c0_i32_0, %c0_i32_1 : i32, i32, i32, i32
  }
  func.func @transform_3(%arg0: i32, %arg1: i32) -> (i32, i32, i32, i32) {
    %c0_i32 = arith.constant 0 : i32
    %c0_i32_0 = arith.constant 0 : i32
    %c0_i32_1 = arith.constant 0 : i32
    %c0_i32_2 = arith.constant 0 : i32
    return %arg1, %c0_i32, %c0_i32_0, %c0_i32_1 : i32, i32, i32, i32
  }
  func.func @transform_4(%arg0: i32, %arg1: i32) -> (i32, i32, i32, i32) {
    %c0_i32 = arith.constant 0 : i32
    %c0_i32_0 = arith.constant 0 : i32
    %c0_i32_1 = arith.constant 0 : i32
    %c0_i32_2 = arith.constant 0 : i32
    return %arg1, %c0_i32, %c0_i32_0, %c0_i32_1 : i32, i32, i32, i32
  }
  func.func @transform_5(%arg0: i32, %arg1: i32) -> (i32, i32, i32, i32) {
    %c0_i32 = arith.constant 0 : i32
    %c0_i32_0 = arith.constant 0 : i32
    %c0_i32_1 = arith.constant 0 : i32
    %c0_i32_2 = arith.constant 0 : i32
    return %arg1, %c0_i32, %c0_i32_0, %c0_i32_1 : i32, i32, i32, i32
  }
  func.func @transform_6(%arg0: i32, %arg1: i32) -> (i32, i32, i32, i32) {
    %c0_i32 = arith.constant 0 : i32
    %c0_i32_0 = arith.constant 0 : i32
    %c0_i32_1 = arith.constant 0 : i32
    %c0_i32_2 = arith.constant 0 : i32
    return %arg1, %c0_i32, %c0_i32_0, %c0_i32_1 : i32, i32, i32, i32
  }
  func.func @transform_7(%arg0: i32, %arg1: i32) -> (i32, i32, i32, i32) {
    %c0_i32 = arith.constant 0 : i32
    %c0_i32_0 = arith.constant 0 : i32
    %c0_i32_1 = arith.constant 0 : i32
    %c0_i32_2 = arith.constant 0 : i32
    return %arg1, %c0_i32, %c0_i32_0, %c0_i32_1 : i32, i32, i32, i32
  }
  func.func @transform_8(%arg0: i32, %arg1: i32) -> (i32, i32, i32, i32) {
    %c0_i32 = arith.constant 0 : i32
    %c0_i32_0 = arith.constant 0 : i32
    %c0_i32_1 = arith.constant 0 : i32
    %c0_i32_2 = arith.constant 0 : i32
    return %arg1, %c0_i32, %c0_i32_0, %c0_i32_1 : i32, i32, i32, i32
  }
  func.func @transform_9(%arg0: i32, %arg1: i32) -> (i32, i32, i32) {
    %c0_i32 = arith.constant 0 : i32
    %c0_i32_0 = arith.constant 0 : i32
    %c0_i32_1 = arith.constant 0 : i32
    return %arg1, %c0_i32, %c0_i32_0 : i32, i32, i32
  }
  func.func @transform_10(%arg0: i32, %arg1: i32) -> (i32, i32, i32) {
    %c0_i32 = arith.constant 0 : i32
    %c0_i32_0 = arith.constant 0 : i32
    %c0_i32_1 = arith.constant 0 : i32
    return %arg1, %c0_i32, %c0_i32_0 : i32, i32, i32
  }
  func.func @transform_11(%arg0: i32, %arg1: i32) -> (i32, i32, i32) {
    %c0_i32 = arith.constant 0 : i32
    %c0_i32_0 = arith.constant 0 : i32
    %c0_i32_1 = arith.constant 0 : i32
    return %arg1, %c0_i32, %c0_i32_0 : i32, i32, i32
  }
  func.func @transform_12(%arg0: i32, %arg1: i32) -> (i32, i32, i32) {
    %c0_i32 = arith.constant 0 : i32
    %c0_i32_0 = arith.constant 0 : i32
    %c0_i32_1 = arith.constant 0 : i32
    return %arg1, %c0_i32, %c0_i32_0 : i32, i32, i32
  }
  func.func @transform_13(%arg0: i32, %arg1: i32) -> (i32, i32, i32) {
    %c0_i32 = arith.constant 0 : i32
    %c0_i32_0 = arith.constant 0 : i32
    %c0_i32_1 = arith.constant 0 : i32
    return %arg1, %c0_i32, %c0_i32_0 : i32, i32, i32
  }
  func.func @transform_14(%arg0: i32, %arg1: i32) -> (i32, i32, i32) {
    %c0_i32 = arith.constant 0 : i32
    %c0_i32_0 = arith.constant 0 : i32
    %c0_i32_1 = arith.constant 0 : i32
    return %arg1, %c0_i32, %c0_i32_0 : i32, i32, i32
  }
  func.func @transform_15(%arg0: i32, %arg1: i32) -> (i32, i32, i32) {
    %c0_i32 = arith.constant 0 : i32
    %c0_i32_0 = arith.constant 0 : i32
    %c0_i32_1 = arith.constant 0 : i32
    return %arg1, %c0_i32, %c0_i32_0 : i32, i32, i32
  }
  func.func @transform_16(%arg0: i32, %arg1: i32) -> (i32, i32, i32) {
    %c0_i32 = arith.constant 0 : i32
    %c0_i32_0 = arith.constant 0 : i32
    %c0_i32_1 = arith.constant 0 : i32
    return %arg1, %c0_i32, %c0_i32_0 : i32, i32, i32
  }
  func.func @transform_17(%arg0: i32, %arg1: i32) -> (i32, i32, i32) {
    %c0_i32 = arith.constant 0 : i32
    %c0_i32_0 = arith.constant 0 : i32
    %c0_i32_1 = arith.constant 0 : i32
    return %arg1, %c0_i32, %c0_i32_0 : i32, i32, i32
  }
  func.func @transform_18(%arg0: i32, %arg1: i32) -> (i32, i32, i32) {
    %c0_i32 = arith.constant 0 : i32
    %c0_i32_0 = arith.constant 0 : i32
    %c0_i32_1 = arith.constant 0 : i32
    return %arg1, %c0_i32, %c0_i32_0 : i32, i32, i32
  }
  func.func @transform_19(%arg0: i32, %arg1: i32) -> (i32, i32, i32) {
    %c0_i32 = arith.constant 0 : i32
    %c0_i32_0 = arith.constant 0 : i32
    %c0_i32_1 = arith.constant 0 : i32
    return %arg1, %c0_i32, %c0_i32_0 : i32, i32, i32
  }
  func.func @transform_20(%arg0: i32, %arg1: i32) -> (i32, i32, i32) {
    %c0_i32 = arith.constant 0 : i32
    %c0_i32_0 = arith.constant 0 : i32
    %c0_i32_1 = arith.constant 0 : i32
    return %arg0, %c0_i32, %c0_i32_0 : i32, i32, i32
  }
}

</mosaic_0001>

<bundles_post_ra>
// kernel: transformer_encoder.2
= control target key start
LH: loop header
LB: loop body
LE: loop exit
PB: predicated region body
PF: predicated region fallthrough
CT: control target
= control target key end

     0   :  { %s3286_s24 = smov 0   ;;  %s3916_s0 = inlined_call_operand.vmem [shape: f32[2,4,4,8,32], index: 0, kind: input, shape index: {}]   ;;  %s3917_s1 = inlined_call_operand.vmem [shape: f32[3,3,32,32], index: 1, kind: input, shape index: {}]   ;;  %s3918_s2 = inlined_call_operand.vmem [shape: f32[1,32], index: 2, kind: input, shape index: {}]   ;;  %s3919_s3 = inlined_call_operand.vmem [shape: f32[3,32,32], index: 3, kind: input, shape index: {}]   ;;  %s3920_s4 = inlined_call_operand.vmem [shape: f32[1,32], index: 4, kind: input, shape index: {}]   ;;  %s3921_s5 = inlined_call_operand.vmem [shape: f32[7,32], index: 5, kind: input, shape index: {}]   ;;  %s3922_s6 = inlined_call_operand.vmem [shape: f32[2,7,1], index: 6, kind: input, shape index: {}]   ;;  %s3923_s7 = inlined_call_operand.vmem [shape: f32[2,7,32], index: 7, kind: output, shape index: {}]  }
   0x1 LB: > { %s2659_s25 = sadd.s32 4294967295, %s3241_s24   ;;  %p2663_p0 = scmp.ge.s32.totalorder %s3241_s24, 1  ;;  %s3241_s24 = sphi %s3286_s24, %s17_s24  }
   0x2   : > { %p246_p1 = scmp.lt.s32.totalorder %s3241_s24, 3 }
   0x4   : > { %p247_p2 = pnand %p2663_p0, %p246_p1 }
   0x5   : > { %p281_p3 = scmp.lt.s32.totalorder (!%p247_p2), %s2659_s25, 1 }
   0x6   : > { %250 = sbr.rel (%p247_p2) target bundleno = 745 (0x2e9), region = 48 }
   0xb   : > { %v3297_v0 = vld [vmem:[%s3917_s1 + $0x38] sm:$0xff]  ;;  %v3243_v2 = vmov 0.0   ;;  %v3309_v3 = vld [vmem:[%s3917_s1 + $0x30] sm:$0xff]  ;;  %s3925_s25 = smov (!%p281_p3, %s2659_s25), 1  ;;  %v3325_v5 = vld [vmem:[%s3917_s1 + $0x28] sm:$0xff]  ;;  %vm317_vm0 = vcmask 261120  }
   0xc   : > { %v3302_v1 = vld [vmem:[%s3917_s1 + $0x18] sm:$0xff]  ;;  %2893 = vmatprep.subr.mxu0 %v3243_v2  ;;  %2904 = vmatprep.subr.mxu1 %v3243_v2  ;;  %v3314_v4 = vld [vmem:[%s3917_s1 + $0x10] sm:$0xff]  ;;  %v3330_v6 = vld [vmem:[%s3917_s1 + $0x8] sm:$0xff]  ;;  %s2742_s15 = sshll.u32 %s3925_s25, 7  ;;  %vm3244_vm1 = vmmov 0   ;;  %s2666_s26 = sshll.u32 %s3925_s25, 3 }
   0xd   : > { %2894 = vmatpush3.msra.mxu0 %v3297_v0  ;;  %2905 = vmatpush3.msra.mxu1 %v3302_v1  ;;  %v3340_v7 = vld [vmem:[%s3917_s1 + $0x20] sm:$0xff]  ;;  %s3345_s20 = scalar_lea.vmem %s3916_s0, %s2742_s15  ;;  %v3371_v11 = vld [vmem:[%s3917_s1 + $0x58] sm:$0xff]  ;;  %v3387_v13 = vld [vmem:[%s3917_s1 + $0x50] sm:$0xff]  ;;  %s289_s29 = scalar_lea.vmem %s3922_s6, %s2666_s26  ;;  %vm2592_vm2 = vcmask 260096  }
   0xe   : > { %2895 = vmatprep.subr.mxu0 %v3243_v2  ;;  %2906 = vmatprep.subr.mxu1 %v3243_v2  ;;  %v3352_v8 = vld [vmem:[%s3917_s1] sm:$0xff]  ;;  %v3376_v12 = vld [vmem:[%s3917_s1 + $0x78] sm:$0xff]  ;;  %v3392_v14 = vld [vmem:[%s3917_s1 + $0x70] sm:$0xff]  ;;  %s293_s13 = scalar_lea.vmem %s3923_s7, %s2666_s26 }
   0xf   : > { %2896 = vmatpush3.msra.mxu0 %v3309_v3  ;;  %2907 = vmatpush3.msra.mxu1 %v3314_v4  ;;  %v3355_v9 = vld [vmem:[%s3345_s20 + $0x20] sm:$0xff]  ;;  %v3401_v15 = vld [vmem:[%s3917_s1 + $0x48] sm:$0xff]  ;;  %v3439_v21 = vld [vmem:[%s3917_s1 + $0x98] sm:$0xff] }
  0x10   : > { %2897 = vmatprep.subr.mxu0 %v3243_v2  ;;  %2908 = vmatprep.subr.mxu1 %v3243_v2  ;;  %v3363_v10 = vld [vmem:[%s3345_s20] sm:$0xff]  ;;  %v3406_v16 = vld [vmem:[%s3917_s1 + $0x68] sm:$0xff]  ;;  %v3444_v22 = vld [vmem:[%s3917_s1 + $0xb8] sm:$0xff]  ;;  %v864_v40 = vrot.slane %v3355_v9, 1 }
  0x11   : > { %2898 = vmatpush3.msra.mxu0 %v3325_v5  ;;  %2909 = vmatpush3.msra.mxu1 %v3330_v6  ;;  %v3415_v17 = vld [vmem:[%s3917_s1 + $0x40] sm:$0xff]  ;;  %v3425_v19 = vld [vmem:[%s3345_s20 + $0x8] sm:$0xff]  ;;  %v3454_v23 = vld [vmem:[%s3917_s1 + $0x90] sm:$0xff]  ;;  %v785_v37 = vrot.slane %v3363_v10, 1 }
  0x12   : > { %2899 = vmatprep.subr.mxu0 %v3243_v2  ;;  %2910 = vmatprep.subr.mxu1 %v3243_v2  ;;  %v3422_v18 = vld [vmem:[%s3917_s1 + $0x60] sm:$0xff]  ;;  %v3459_v24 = vld [vmem:[%s3917_s1 + $0xb0] sm:$0xff]  ;;  %v3468_v25 = vld [vmem:[%s3917_s1 + $0x88] sm:$0xff]  ;;  %v943_v44 = vrot.slane %v3425_v19, 1 }
  0x13   : > { %2900 = vmatpush3.msra.mxu0 %v3340_v7  ;;  %2901 = vmatprep.mubr.msk.f32.mxu0 %vm3244_vm1, %v3243_v2  ;;  %v301_v20 = vld [vmem:[%s3345_s20 + $0x40] sm:$0xff]  ;;  %v3473_v26 = vld [vmem:[%s3917_s1 + $0xa8] sm:$0xff]  ;;  %v3505_v31 = vld [vmem:[%s3917_s1 + $0xd8] sm:$0xff] }
  0x14   : > { %2911 = vmatpush3.msra.mxu1 %v3352_v8  ;;  %2902 = vmatmul.mubr.msk.f32.vlgmr.msra.gmra.mxu0 %vm317_vm0, %v3355_v9  ;;  %v3482_v27 = vld [vmem:[%s3917_s1 + $0x80] sm:$0xff]  ;;  %v3498_v30 = vld [vmem:[%s3345_s20 + $0x48] sm:$0xff]  ;;  %v3510_v32 = vld [vmem:[%s3917_s1 + $0xf8] sm:$0xff] }
  0x15   : > { %2912 = vmatprep.mubr.msk.f32.mxu1 %vm3244_vm1, %v3243_v2  ;;  %2915 = vmatprep.subr.mxu0 %v3243_v2  ;;  %v3489_v28 = vld [vmem:[%s3917_s1 + $0xa0] sm:$0xff]  ;;  %v3521_v33 = vld [vmem:[%s3917_s1 + $0xd0] sm:$0xff]  ;;  %v3535_v35 = vld [vmem:[%s3917_s1 + $0xc8] sm:$0xff] }
  0x16   : > { %2926 = vmatprep.subr.mxu1 %v3243_v2  ;;  %2913 = vmatmul.mubr.msk.f32.vlgmr.msra.gmra.mxu1 %vm317_vm0, %v3363_v10  ;;  %v305_v29 = vld [vmem:[%s3345_s20 + $0x60] sm:$0xff]  ;;  %v3526_v34 = vld [vmem:[%s3917_s1 + $0xf0] sm:$0xff]  ;;  %v3540_v36 = vld [vmem:[%s3917_s1 + $0xe8] sm:$0xff] }
  0x17   : > { %2916 = vmatpush3.msra.mxu0 %v3371_v11  ;;  %2927 = vmatpush3.msra.mxu1 %v3376_v12  ;;  %v3550_v38 = vld [vmem:[%s3917_s1 + $0xc0] sm:$0xff]  ;;  %v3570_v41 = vld [vmem:[%s3917_s1 + $0x118] sm:$0xff]  ;;  %v3580_v42 = vld [vmem:[%s3917_s1 + $0x110] sm:$0xff] }
  0x18   : > { %2917 = vmatprep.subr.mxu0 %v3243_v2  ;;  %2928 = vmatprep.subr.mxu1 %v3243_v2  ;;  %v3557_v39 = vld [vmem:[%s3917_s1 + $0xe0] sm:$0xff]  ;;  %v3589_v43 = vld [vmem:[%s3917_s1 + $0x108] sm:$0xff]  ;;  %v3637_v47 = vld [vmem:[%s3345_s20 + $0x10] sm:$0xff] }
  0x19   : > { %2918 = vmatpush3.msra.mxu0 %v3387_v13  ;;  %2929 = vmatpush3.msra.mxu1 %v3392_v14  ;;  %v3599_v45 = vld [vmem:[%s3917_s1 + $0x100] sm:$0xff]  ;;  %v3609_v46 = vld [vmem:[%s3345_s20 + $0x28] sm:$0xff]  ;;  %v3683_v49 = vld [vmem:[%s3345_s20 + $0x50] sm:$0xff]  ;;  %v1611_v51 = vrot.slane %v3637_v47, 1 }
  0x1a   : > { %2919 = vmatprep.subr.mxu0 %v3243_v2  ;;  %2930 = vmatprep.subr.mxu1 %v3243_v2  ;;  %v306_v48 = vld [vmem:[%s3345_s20 + $0x68] sm:$0xff]  ;;  %v1537_v50 = vrot.slane %v3609_v46, 1  ;;  %v1029_v52 = vld [vmem:[%s3919_s3 + $0x18] sm:$0xff]  ;;  %v1028_v53 = vld [vmem:[%s3919_s3 + $0x10] sm:$0xff] }
  0x1b   : > { %2920 = vmatpush3.msra.mxu0 %v3401_v15  ;;  %2931 = vmatpush3.msra.mxu1 %v3406_v16  ;;  %v1027_v54 = vld [vmem:[%s3919_s3 + $0x8] sm:$0xff]  ;;  %v1026_v55 = vld [vmem:[%s3919_s3] sm:$0xff]  ;;  %v2722_v56 = vld [vmem:[%s3919_s3 + $0x38] sm:$0xff] }
  0x1c   : > { %2921 = vmatprep.subr.mxu0 %v3243_v2  ;;  %2932 = vmatprep.subr.mxu1 %v3243_v2  ;;  %v2721_v57 = vld [vmem:[%s3919_s3 + $0x30] sm:$0xff]  ;;  %v2720_v58 = vld [vmem:[%s3919_s3 + $0x28] sm:$0xff]  ;;  %v2719_v59 = vld [vmem:[%s3919_s3 + $0x20] sm:$0xff] }
  0x1d   : > { %2922 = vmatpush3.msra.mxu0 %v3415_v17  ;;  %2923 = vmatprep.mubr.msk.f32.mxu0 %vm3244_vm1, %v3243_v2 }
  0x1e   : > { %2933 = vmatpush3.msra.mxu1 %v3422_v18  ;;  %2924 = vmatmul.mubr.msk.f32.vlgmr.msra.gmra.mxu0 %vm317_vm0, %v3425_v19 }
  0x1f   : > { %2934 = vmatprep.mubr.msk.f32.mxu1 %vm3244_vm1, %v3243_v2  ;;  %2937 = vmatprep.subr.mxu0 %v3243_v2 }
  0x20   : > { %2948 = vmatprep.subr.mxu1 %v3243_v2  ;;  %2935 = vmatmul.mubr.msk.f32.vlgmr.msra.gmra.mxu1 %vm317_vm0, %v301_v20 }
  0x21   : > { %2938 = vmatpush3.msra.mxu0 %v3439_v21  ;;  %2949 = vmatpush3.msra.mxu1 %v3444_v22 }
  0x22   : > { %2939 = vmatprep.subr.mxu0 %v3243_v2  ;;  %2950 = vmatprep.subr.mxu1 %v3243_v2 }
  0x23   : > { %2940 = vmatpush3.msra.mxu0 %v3454_v23  ;;  %2951 = vmatpush3.msra.mxu1 %v3459_v24 }
  0x24   : > { %2941 = vmatprep.subr.mxu0 %v3243_v2  ;;  %2952 = vmatprep.subr.mxu1 %v3243_v2 }
  0x25   : > { %2942 = vmatpush3.msra.mxu0 %v3468_v25  ;;  %2953 = vmatpush3.msra.mxu1 %v3473_v26 }
  0x26   : > { %2943 = vmatprep.subr.mxu0 %v3243_v2  ;;  %2954 = vmatprep.subr.mxu1 %v3243_v2 }
  0x27   : > { %2944 = vmatpush3.msra.mxu0 %v3482_v27  ;;  %2945 = vmatprep.mubr.msk.f32.mxu0 %vm3244_vm1, %v3243_v2 }
  0x28   : > { %2955 = vmatpush3.msra.mxu1 %v3489_v28  ;;  %2946 = vmatmul.mubr.msk.f32.vlgmr.msra.gmra.mxu0 %vm317_vm0, %v305_v29 }
  0x29   : > { %2956 = vmatprep.mubr.msk.f32.mxu1 %vm3244_vm1, %v3243_v2  ;;  %2959 = vmatprep.subr.mxu0 %v3243_v2 }
  0x2a   : > { %2970 = vmatprep.subr.mxu1 %v3243_v2  ;;  %2957 = vmatmul.mubr.msk.f32.vlgmr.msra.gmra.mxu1 %vm317_vm0, %v3498_v30 }
  0x2b   : > { %2960 = vmatpush3.msra.mxu0 %v3505_v31  ;;  %2971 = vmatpush3.msra.mxu1 %v3510_v32 }
  0x2c   : > { %2961 = vmatprep.subr.mxu0 %v3243_v2  ;;  %2972 = vmatprep.subr.mxu1 %v3243_v2 }
  0x2d   : > { %2962 = vmatpush3.msra.mxu0 %v3521_v33  ;;  %2973 = vmatpush3.msra.mxu1 %v3526_v34 }
  0x2e   : > { %2963 = vmatprep.subr.mxu0 %v3243_v2  ;;  %2974 = vmatprep.subr.mxu1 %v3243_v2 }
  0x2f   : > { %2964 = vmatpush3.msra.mxu0 %v3535_v35  ;;  %2975 = vmatpush3.msra.mxu1 %v3540_v36 }
  0x30   : > { %2965 = vmatprep.subr.mxu0 %v3243_v2  ;;  %2976 = vmatprep.subr.mxu1 %v3243_v2 }
  0x31   : > { %2966 = vmatpush3.msra.mxu0 %v3550_v38  ;;  %2967 = vmatprep.mubr.msk.f32.mxu0 %vm3244_vm1, %v3243_v2 }
  0x32   : > { %2977 = vmatpush3.msra.mxu1 %v3557_v39  ;;  %2968 = vmatmul.mubr.msk.f32.vlgmr.msra.gmra.mxu0 %vm317_vm0, %v785_v37 }
  0x33   : > { %2978 = vmatprep.mubr.msk.f32.mxu1 %vm3244_vm1, %v3243_v2  ;;  %2981 = vmatprep.subr.mxu0 %v3243_v2 }
  0x34   : > { %2992 = vmatprep.subr.mxu1 %v3243_v2  ;;  %2979 = vmatmul.mubr.msk.f32.vlgmr.msra.gmra.mxu1 %vm317_vm0, %v864_v40 }
  0x35   : > { %2982 = vmatpush3.msra.mxu0 %v3570_v41  ;;  %2993 = vmatpush3.msra.mxu1 %v3297_v0 }
  0x36   : > { %2983 = vmatprep.subr.mxu0 %v3243_v2  ;;  %2994 = vmatprep.subr.mxu1 %v3243_v2 }
  0x37   : > { %2984 = vmatpush3.msra.mxu0 %v3580_v42  ;;  %2995 = vmatpush3.msra.mxu1 %v3309_v3 }
  0x38   : > { %2985 = vmatprep.subr.mxu0 %v3243_v2  ;;  %2996 = vmatprep.subr.mxu1 %v3243_v2 }
  0x39   : > { %2986 = vmatpush3.msra.mxu0 %v3589_v43  ;;  %2997 = vmatpush3.msra.mxu1 %v3325_v5 }
  0x3a   : > { %2987 = vmatprep.subr.mxu0 %v3243_v2  ;;  %2998 = vmatprep.subr.mxu1 %v3243_v2 }
  0x3b   : > { %2988 = vmatpush3.msra.mxu0 %v3599_v45  ;;  %2989 = vmatprep.mubr.msk.f32.mxu0 %vm3244_vm1, %v3243_v2 }
  0x3c   : > { %2999 = vmatpush3.msra.mxu1 %v3340_v7  ;;  %2990 = vmatmul.mubr.msk.f32.vlgmr.msra.gmra.mxu0 %vm317_vm0, %v943_v44 }
  0x3d   : > { %3000 = vmatprep.mubr.msk.f32.mxu1 %vm3244_vm1, %v3243_v2  ;;  %3003 = vmatprep.subr.mxu0 %v3243_v2 }
  0x3e   : > { %3014 = vmatprep.subr.mxu1 %v3243_v2  ;;  %3001 = vmatmul.mubr.msk.f32.vlgmr.msra.gmra.mxu1 %vm317_vm0, %v3609_v46 }
  0x3f   : > { %3004 = vmatpush3.msra.mxu0 %v3302_v1  ;;  %3015 = vmatpush3.msra.mxu1 %v3371_v11 }
  0x40   : > { %3005 = vmatprep.subr.mxu0 %v3243_v2  ;;  %3016 = vmatprep.subr.mxu1 %v3243_v2 }
  0x41   : > { %3006 = vmatpush3.msra.mxu0 %v3314_v4  ;;  %3017 = vmatpush3.msra.mxu1 %v3387_v13 }
  0x42   : > { %3007 = vmatprep.subr.mxu0 %v3243_v2  ;;  %3018 = vmatprep.subr.mxu1 %v3243_v2 }
  0x43   : > { %3008 = vmatpush3.msra.mxu0 %v3330_v6  ;;  %3019 = vmatpush3.msra.mxu1 %v3401_v15 }
  0x44   : > { %3009 = vmatprep.subr.mxu0 %v3243_v2  ;;  %3020 = vmatprep.subr.mxu1 %v3243_v2 }
  0x45   : > { %3010 = vmatpush3.msra.mxu0 %v3352_v8  ;;  %3011 = vmatprep.mubr.msk.f32.mxu0 %vm3244_vm1, %v3243_v2 }
  0x46   : > { %3021 = vmatpush3.msra.mxu1 %v3415_v17  ;;  %3012 = vmatmul.mubr.msk.f32.vlgmr.msra.gmra.mxu0 %vm317_vm0, %v3425_v19 }
  0x47   : > { %3022 = vmatprep.mubr.msk.f32.mxu1 %vm3244_vm1, %v3243_v2  ;;  %3025 = vmatprep.subr.mxu0 %v3243_v2 }
  0x48   : > { %3036 = vmatprep.subr.mxu1 %v3243_v2  ;;  %3023 = vmatmul.mubr.msk.f32.vlgmr.msra.gmra.mxu1 %vm317_vm0, %v3637_v47 }
  0x49   : > { %3026 = vmatpush3.msra.mxu0 %v3376_v12  ;;  %3037 = vmatpush3.msra.mxu1 %v3439_v21 }
  0x4a   : > { %3027 = vmatprep.subr.mxu0 %v3243_v2  ;;  %3038 = vmatprep.subr.mxu1 %v3243_v2 }
  0x4b   : > { %3028 = vmatpush3.msra.mxu0 %v3392_v14  ;;  %3039 = vmatpush3.msra.mxu1 %v3454_v23 }
  0x4c   : > { %3029 = vmatprep.subr.mxu0 %v3243_v2  ;;  %3040 = vmatprep.subr.mxu1 %v3243_v2 }
  0x4d   : > { %3030 = vmatpush3.msra.mxu0 %v3406_v16  ;;  %3041 = vmatpush3.msra.mxu1 %v3468_v25 }
  0x4e   : > { %3031 = vmatprep.subr.mxu0 %v3243_v2  ;;  %3042 = vmatprep.subr.mxu1 %v3243_v2 }
  0x4f   : > { %3032 = vmatpush3.msra.mxu0 %v3422_v18  ;;  %3033 = vmatprep.mubr.msk.f32.mxu0 %vm3244_vm1, %v3243_v2 }
  0x50   : > { %3043 = vmatpush3.msra.mxu1 %v3482_v27  ;;  %3034 = vmatmul.mubr.msk.f32.vlgmr.msra.gmra.mxu0 %vm317_vm0, %v3498_v30 }
  0x51   : > { %3044 = vmatprep.mubr.msk.f32.mxu1 %vm3244_vm1, %v3243_v2  ;;  %3047 = vmatprep.subr.mxu0 %v3243_v2 }
  0x52   : > { %3058 = vmatprep.subr.mxu1 %v3243_v2  ;;  %3045 = vmatmul.mubr.msk.f32.vlgmr.msra.gmra.mxu1 %vm317_vm0, %v306_v48 }
  0x53   : > { %3048 = vmatpush3.msra.mxu0 %v3444_v22  ;;  %3059 = vmatpush3.msra.mxu1 %v3505_v31 }
  0x54   : > { %3049 = vmatprep.subr.mxu0 %v3243_v2  ;;  %3060 = vmatprep.subr.mxu1 %v3243_v2 }
  0x55   : > { %3050 = vmatpush3.msra.mxu0 %v3459_v24  ;;  %3061 = vmatpush3.msra.mxu1 %v3521_v33 }
  0x56   : > { %3051 = vmatprep.subr.mxu0 %v3243_v2  ;;  %3062 = vmatprep.subr.mxu1 %v3243_v2 }
  0x57   : > { %3052 = vmatpush3.msra.mxu0 %v3473_v26  ;;  %3063 = vmatpush3.msra.mxu1 %v3535_v35 }
  0x58   : > { %3053 = vmatprep.subr.mxu0 %v3243_v2  ;;  %3064 = vmatprep.subr.mxu1 %v3243_v2 }
  0x59   : > { %3054 = vmatpush3.msra.mxu0 %v3489_v28  ;;  %3055 = vmatprep.mubr.msk.f32.mxu0 %vm3244_vm1, %v3243_v2 }
  0x5a   : > { %3065 = vmatpush3.msra.mxu1 %v3550_v38  ;;  %3056 = vmatmul.mubr.msk.f32.vlgmr.msra.gmra.mxu0 %vm317_vm0, %v3683_v49 }
  0x5b   : > { %3066 = vmatprep.mubr.msk.f32.mxu1 %vm3244_vm1, %v3243_v2  ;;  %3069 = vmatprep.subr.mxu0 %v3243_v2 }
  0x5c   : > { %3080 = vmatprep.subr.mxu1 %v3243_v2  ;;  %3067 = vmatmul.mubr.msk.f32.vlgmr.msra.gmra.mxu1 %vm317_vm0, %v943_v44 }
  0x5d   : > { %3070 = vmatpush3.msra.mxu0 %v3510_v32  ;;  %3081 = vmatpush3.msra.mxu1 %v3570_v41 }
  0x5e   : > { %3071 = vmatprep.subr.mxu0 %v3243_v2  ;;  %3082 = vmatprep.subr.mxu1 %v3243_v2 }
  0x5f   : > { %3072 = vmatpush3.msra.mxu0 %v3526_v34  ;;  %3083 = vmatpush3.msra.mxu1 %v3580_v42 }
  0x60   : > { %3073 = vmatprep.subr.mxu0 %v3243_v2  ;;  %3084 = vmatprep.subr.mxu1 %v3243_v2 }
  0x61   : > { %3074 = vmatpush3.msra.mxu0 %v3540_v36  ;;  %3085 = vmatpush3.msra.mxu1 %v3589_v43 }
  0x62   : > { %3075 = vmatprep.subr.mxu0 %v3243_v2  ;;  %3086 = vmatprep.subr.mxu1 %v3243_v2 }
  0x63   : > { %3076 = vmatpush3.msra.mxu0 %v3557_v39  ;;  %3077 = vmatprep.mubr.msk.f32.mxu0 %vm3244_vm1, %v3243_v2 }
  0x64   : > { %3087 = vmatpush3.msra.mxu1 %v3599_v45  ;;  %3088 = vmatprep.mubr.msk.f32.mxu1 %vm3244_vm1, %v3243_v2 }
  0x65   : > { %3078 = vmatmul.mubr.msk.f32.vlgmr.msra.gmra.mxu0 %vm317_vm0, %v1537_v50  ;;  %3089 = vmatmul.mubr.msk.f32.vlgmr.msra.gmra.mxu1 %vm317_vm0, %v1611_v51 }
  0x66   : > { %3102 = vmatprep.subr.mxu1 %v3243_v2  ;;  %3110 = vmatprep.mubr.msk.f32.mxu1 %vm3244_vm1, %v3243_v2 }
  0x67   : > { %3091 = vmatprep.subr.mxu0 %v3243_v2  ;;  %3099 = vmatprep.mubr.msk.f32.mxu0 %vm3244_vm1, %v3243_v2 }
  0x68   : > { %3103 = vmatpush3.msra.mxu1 %v1029_v52  ;;  %3092 = vmatpush3.msra.mxu0 %v2722_v56 }
  0x69   : > { %3104 = vmatprep.subr.mxu1 %v3243_v2  ;;  %3093 = vmatprep.subr.mxu0 %v3243_v2 }
  0x6a   : > { %3105 = vmatpush3.msra.mxu1 %v1028_v53  ;;  %3094 = vmatpush3.msra.mxu0 %v2721_v57 }
  0x6b   : > { %3106 = vmatprep.subr.mxu1 %v3243_v2  ;;  %3095 = vmatprep.subr.mxu0 %v3243_v2 }
  0x6c   : > { %3107 = vmatpush3.msra.mxu1 %v1027_v54  ;;  %3096 = vmatpush3.msra.mxu0 %v2720_v58 }
  0x6d   : > { %3108 = vmatprep.subr.mxu1 %v3243_v2  ;;  %3097 = vmatprep.subr.mxu0 %v3243_v2 }
  0x6e   : > { %3109 = vmatpush3.msra.mxu1 %v1026_v55  ;;  %3098 = vmatpush3.msra.mxu0 %v2719_v59 }
  0x6f   : > { %3124 = vmatprep.subr.mxu1 %v3243_v2  ;;  %3113 = vmatprep.subr.mxu0 %v3243_v2 }
  0xd4   : > { %v387_v60 = vpop.f32.mrf.mxu0 }
  0xd6   : > { %v460_v61 = vpop.f32.mrf.mxu1  ;;  %v2903_v62 = vpop.f32.mrf.mxu0 }
  0xd7   : > { %v461_v30 = vadd.f32 %v460_v61, %v387_v60  ;;  %v3765_v62 = vld [vmem:[%s3918_s2] ss:$0 sm:$0xff] }
  0xd8   : > { %v2914_v63 = vpop.f32.mrf.mxu1 }
  0xde   : > { %v538_v9 = vpop.f32.mrf.mxu0 }
  0xdf   : > { %v542_v44 = vadd.f32 %v538_v9, %v461_v30 }
  0xe0   : > { %v617_v10 = vpop.f32.mrf.mxu1  ;;  %v2925_v19 = vpop.f32.mrf.mxu0 }
  0xe1   : > { %v621_v48 = vadd.f32 %v617_v10, %v542_v44  ;;  %v300_v44 = vld [vmem:[%s3345_s20 + $0x30] sm:$0xff] }
  0xe2   : > { %v2936_v20 = vpop.f32.mrf.mxu1 }
  0xe8   : > { %v696_v29 = vpop.f32.mrf.mxu0 }
  0xe9   : > { %v700_v50 = vadd.f32 %v696_v29, %v621_v48 }
  0xea   : > { %v775_v37 = vpop.f32.mrf.mxu1  ;;  %v2947_v40 = vpop.f32.mrf.mxu0 }
  0xeb   : > { %v779_v55 = vadd.f32 %v775_v37, %v700_v50 }
  0xec   : > { %v2958_v46 = vpop.f32.mrf.mxu1 }
  0xed   : > { %v2345_v46 = vrot.slane %v300_v44, 1 }
  0xf2   : > { %v854_v52 = vpop.f32.mrf.mxu0 }
  0xf3   : > { %v858_v57 = vadd.f32 %v854_v52, %v779_v55 }
  0xf4   : > { %v933_v53 = vpop.f32.mrf.mxu1  ;;  %v2969_v54 = vpop.f32.mrf.mxu0 }
  0xf5   : > { %v937_v58 = vadd.f32 %v933_v53, %v858_v57 }
  0xf6   : > { %v2980_v56 = vpop.f32.mrf.mxu1 }
  0xfc   : > { %v1012_v59 = vpop.f32.mrf.mxu0 }
  0xfd   : > { %v1016_v60 = vadd.f32 %v1012_v59, %v937_v58 }
  0xfe   : > { %v1099_v61 = vpop.f32.mrf.mxu1  ;;  %v2991_v63 = vpop.f32.mrf.mxu0 }
  0xff   : > { %v1024_v9 = vadd.f32 %v3765_v62, %v1016_v60 }
 0x100   : > { %v3002_v10 = vpop.f32.mrf.mxu1 }
 0x101   : > { %v1025_v19 = vmax.f32 %v1024_v9, 0.0 }
 0x103   : > { %3111 = vmatmul.mubr.msk.f32.vlgmr.msra.gmra.mxu1 %vm317_vm0, %v1025_v19 }
 0x104   : > { %3125 = vmatpush3.msra.mxu1 %v3302_v1  ;;  %3132 = vmatprep.mubr.msk.f32.mxu1 %vm3244_vm1, %v3243_v2 }
 0x105   : > { %3126 = vmatprep.subr.mxu1 %v3243_v2 }
 0x106   : > { %v1169_v20 = vpop.f32.mrf.mxu0  ;;  %3127 = vmatpush3.msra.mxu1 %v3314_v4 }
 0x107   : > { %3128 = vmatprep.subr.mxu1 %v3243_v2 }
 0x108   : > { %v1242_v29 = vpop.f32.mrf.mxu1  ;;  %v3013_v30 = vpop.f32.mrf.mxu0  ;;  %3129 = vmatpush3.msra.mxu1 %v3330_v6 }
 0x109   : > { %3130 = vmatprep.subr.mxu1 %v3243_v2 }
 0x10a   : > { %v3024_v37 = vpop.f32.mrf.mxu1  ;;  %3131 = vmatpush3.msra.mxu1 %v3352_v8  ;;  %v1170_v8 = vadd.f32 %v1169_v20, %v1099_v61 }
 0x10b   : > { %3133 = vmatmul.mubr.msk.f32.vlgmr.msra.gmra.mxu1 %vm317_vm0, %v3637_v47  ;;  %3146 = vmatprep.subr.mxu1 %v3243_v2 }
 0x10c   : > { %3147 = vmatpush3.msra.mxu1 %v3376_v12  ;;  %3154 = vmatprep.mubr.msk.f32.mxu1 %vm3244_vm1, %v3243_v2 }
 0x10d   : > { %3148 = vmatprep.subr.mxu1 %v3243_v2 }
 0x10e   : > { %3149 = vmatpush3.msra.mxu1 %v3392_v14  ;;  %v1246_v14 = vadd.f32 %v1242_v29, %v1170_v8 }
 0x10f   : > { %3150 = vmatprep.subr.mxu1 %v3243_v2 }
 0x110   : > { %v1313_v1 = vpop.f32.mrf.mxu0  ;;  %3151 = vmatpush3.msra.mxu1 %v3406_v16  ;;  %v304_v16 = vld [vmem:[%s3345_s20 + $0x58] sm:$0xff] }
 0x111   : > { %3152 = vmatprep.subr.mxu1 %v3243_v2 }
 0x112   : > { %v1387_v4 = vpop.f32.mrf.mxu1  ;;  %v3035_v6 = vpop.f32.mrf.mxu0  ;;  %3153 = vmatpush3.msra.mxu1 %v3422_v18  ;;  %v1317_v18 = vadd.f32 %v1313_v1, %v1246_v14  ;;  %v2739_v14 = vld [vmem:[%s3920_s4] ss:$0 sm:$0xff] }
 0x113   : > { %3155 = vmatmul.mubr.msk.f32.vlgmr.msra.gmra.mxu1 %vm317_vm0, %v3683_v49  ;;  %3168 = vmatprep.subr.mxu1 %v3243_v2 }
 0x114   : > { %v3046_v12 = vpop.f32.mrf.mxu1  ;;  %3169 = vmatpush3.msra.mxu1 %v3444_v22  ;;  %3176 = vmatprep.mubr.msk.f32.mxu1 %vm3244_vm1, %v3243_v2 }
 0x115   : > { %3170 = vmatprep.subr.mxu1 %v3243_v2 }
 0x116   : > { %3171 = vmatpush3.msra.mxu1 %v3459_v24  ;;  %v1391_v24 = vadd.f32 %v1387_v4, %v1317_v18 }
 0x117   : > { %3172 = vmatprep.subr.mxu1 %v3243_v2 }
 0x118   : > { %3173 = vmatpush3.msra.mxu1 %v3473_v26 }
 0x119   : > { %3174 = vmatprep.subr.mxu1 %v3243_v2 }
 0x11a   : > { %v1461_v49 = vpop.f32.mrf.mxu0  ;;  %3175 = vmatpush3.msra.mxu1 %v3489_v28 }
 0x11b   : > { %3177 = vmatmul.mubr.msk.f32.vlgmr.msra.gmra.mxu1 %vm317_vm0, %v304_v16  ;;  %3190 = vmatprep.subr.mxu1 %v3243_v2  ;;  %v1465_v28 = vadd.f32 %v1461_v49, %v1391_v24 }
 0x11c   : > { %v1532_v22 = vpop.f32.mrf.mxu1  ;;  %v3057_v40 = vpop.f32.mrf.mxu0  ;;  %3191 = vmatpush3.msra.mxu1 %v3510_v32  ;;  %3198 = vmatprep.mubr.msk.f32.mxu1 %vm3244_vm1, %v3243_v2 }
 0x11d   : > { %3192 = vmatprep.subr.mxu1 %v3243_v2  ;;  %v1536_v32 = vadd.f32 %v1532_v22, %v1465_v28  ;;  %v2583_v22 = vld [vmem:[%s3921_s5] sm:$0x7f] }
 0x11e   : > { %v3068_v26 = vpop.f32.mrf.mxu1  ;;  %3193 = vmatpush3.msra.mxu1 %v3526_v34 }
 0x11f   : > { %3194 = vmatprep.subr.mxu1 %v3243_v2 }
 0x120   : > { %3195 = vmatpush3.msra.mxu1 %v3540_v36 }
 0x121   : > { %3196 = vmatprep.subr.mxu1 %v3243_v2 }
 0x122   : > { %3197 = vmatpush3.msra.mxu1 %v3557_v39 }
 0x123   : > { %3199 = vmatmul.mubr.msk.f32.vlgmr.msra.gmra.mxu1 %vm317_vm0, %v2345_v46  ;;  %3212 = vmatprep.subr.mxu1 %v3243_v2 }
 0x124   : > { %3220 = vmatprep.mubr.msk.f32.mxu1 %vm3244_vm1, %v3243_v2 }
 0x125   : > { %v1606_v48 = vpop.f32.mrf.mxu0  ;;  %v1680_v34 = vpop.f32.mrf.mxu1 }
 0x126   : > { %v1610_v50 = vadd.f32 %v1606_v48, %v1536_v32 }
 0x127   : > { %v3079_v52 = vpop.f32.mrf.mxu0  ;;  %v3090_v53 = vpop.f32.mrf.mxu1 }
 0x128   : > { %v1684_v54 = vadd.f32 %v1680_v34, %v1610_v50 }
 0x12a   : > { %v1685_v36 = vadd.f32 %v3765_v62, %v1684_v54 }
 0x12c   : > { %v1686_v55 = vmax.f32 %v1685_v36, 0.0 }
 0x12e   : > { %3100 = vmatmul.mubr.msk.f32.vlgmr.msra.gmra.mxu0 %vm317_vm0, %v1686_v55 }
 0x12f   : > { %3114 = vmatpush3.msra.mxu0 %v3297_v0  ;;  %3121 = vmatprep.mubr.msk.f32.mxu0 %vm3244_vm1, %v3243_v2  ;;  %v297_v0 = vld [vmem:[%s3345_s20 + $0x18] sm:$0xff] }
 0x130   : > { %3115 = vmatprep.subr.mxu0 %v3243_v2 }
 0x131   : > { %3116 = vmatpush3.msra.mxu0 %v3309_v3  ;;  %v307_v3 = vld [vmem:[%s3345_s20 + $0x70] sm:$0xff] }
 0x132   : > { %3117 = vmatprep.subr.mxu0 %v3243_v2 }
 0x133   : > { %3118 = vmatpush3.msra.mxu0 %v3325_v5  ;;  %v2419_v5 = vrot.slane %v297_v0, 1 }
 0x134   : > { %3119 = vmatprep.subr.mxu0 %v3243_v2 }
 0x135   : > { %3120 = vmatpush3.msra.mxu0 %v3340_v7  ;;  %v2737_v7 = vld [vmem:[%s3919_s3 + $0x58] sm:$0xff] }
 0x136   : > { %3122 = vmatmul.mubr.msk.f32.vlgmr.msra.gmra.mxu0 %vm317_vm0, %v300_v44  ;;  %3135 = vmatprep.subr.mxu0 %v3243_v2 }
 0x137   : > { %3136 = vmatpush3.msra.mxu0 %v3371_v11  ;;  %3143 = vmatprep.mubr.msk.f32.mxu0 %vm3244_vm1, %v3243_v2  ;;  %v2736_v11 = vld [vmem:[%s3919_s3 + $0x50] sm:$0xff] }
 0x138   : > { %3137 = vmatprep.subr.mxu0 %v3243_v2  ;;  %3213 = vmatpush3.msra.mxu1 %v2737_v7 }
 0x139   : > { %3138 = vmatpush3.msra.mxu0 %v3387_v13  ;;  %3214 = vmatprep.subr.mxu1 %v3243_v2  ;;  %v2735_v13 = vld [vmem:[%s3919_s3 + $0x48] sm:$0xff] }
 0x13a   : > { %3139 = vmatprep.subr.mxu0 %v3243_v2  ;;  %3215 = vmatpush3.msra.mxu1 %v2736_v11 }
 0x13b   : > { %3140 = vmatpush3.msra.mxu0 %v3401_v15  ;;  %3216 = vmatprep.subr.mxu1 %v3243_v2  ;;  %v2734_v15 = vld [vmem:[%s3919_s3 + $0x40] sm:$0xff] }
 0x13c   : > { %3141 = vmatprep.subr.mxu0 %v3243_v2  ;;  %3217 = vmatpush3.msra.mxu1 %v2735_v13 }
 0x13d   : > { %3142 = vmatpush3.msra.mxu0 %v3415_v17  ;;  %3218 = vmatprep.subr.mxu1 %v3243_v2  ;;  %v3245_v17 = vmov 0  }
 0x13e   : > { %3144 = vmatmul.mubr.msk.f32.vlgmr.msra.gmra.mxu0 %vm317_vm0, %v297_v0  ;;  %3157 = vmatprep.subr.mxu0 %v3243_v2 }
 0x13f   : > { %3158 = vmatpush3.msra.mxu0 %v3439_v21  ;;  %3165 = vmatprep.mubr.msk.f32.mxu0 %vm3244_vm1, %v3243_v2  ;;  %v2585_v21 = vld [vmem:[%s289_s29] sm:$0x7f] }
 0x140   : > { %3159 = vmatprep.subr.mxu0 %v3243_v2  ;;  %3219 = vmatpush3.msra.mxu1 %v2734_v15 }
 0x141   : > { %3160 = vmatpush3.msra.mxu0 %v3454_v23  ;;  %3234 = vset.pattern.permute.xlu0 %v3245_v17 }
 0x142   : > { %3161 = vmatprep.subr.mxu0 %v3243_v2  ;;  %2588 = vperm.xlu0 %3234, %v2585_v21  }
 0x143   : > { %3162 = vmatpush3.msra.mxu0 %v3468_v25 }
 0x144   : > { %3163 = vmatprep.subr.mxu0 %v3243_v2 }
 0x145   : > { %3164 = vmatpush3.msra.mxu0 %v3482_v27 }
 0x146   : > { %3166 = vmatmul.mubr.msk.f32.vlgmr.msra.gmra.mxu0 %vm317_vm0, %v307_v3  ;;  %3179 = vmatprep.subr.mxu0 %v3243_v2 }
 0x147   : > { %3180 = vmatpush3.msra.mxu0 %v3505_v31  ;;  %3187 = vmatprep.mubr.msk.f32.mxu0 %vm3244_vm1, %v3243_v2 }
 0x148   : > { %3181 = vmatprep.subr.mxu0 %v3243_v2 }
 0x149   : > { %3182 = vmatpush3.msra.mxu0 %v3521_v33 }
 0x14a   : > { %3183 = vmatprep.subr.mxu0 %v3243_v2 }
 0x14b   : > { %3184 = vmatpush3.msra.mxu0 %v3535_v35 }
 0x14c   : > { %3185 = vmatprep.subr.mxu0 %v3243_v2 }
 0x14d   : > { %3186 = vmatpush3.msra.mxu0 %v3550_v38 }
 0x14e   : > { %3188 = vmatmul.mubr.msk.f32.vlgmr.msra.gmra.mxu0 %vm317_vm0, %v1611_v51  ;;  %3201 = vmatprep.subr.mxu0 %v3243_v2 }
 0x14f   : > { %3202 = vmatpush3.msra.mxu0 %v3570_v41  ;;  %3209 = vmatprep.mubr.msk.f32.mxu0 %vm3244_vm1, %v3243_v2 }
 0x150   : > { %3203 = vmatprep.subr.mxu0 %v3243_v2 }
 0x151   : > { %3204 = vmatpush3.msra.mxu0 %v3580_v42 }
 0x152   : > { %3205 = vmatprep.subr.mxu0 %v3243_v2 }
 0x153   : > { %3206 = vmatpush3.msra.mxu0 %v3589_v43 }
 0x154   : > { %3207 = vmatprep.subr.mxu0 %v3243_v2 }
 0x155   : > { %3208 = vmatpush3.msra.mxu0 %v3599_v45 }
 0x156   : > { %3210 = vmatmul.mubr.msk.f32.vlgmr.msra.gmra.mxu0 %vm317_vm0, %v2419_v5 }
 0x1bd   : > { %v2589_v24 = vpop.permute.xlu0 %2588 }
 0x1c3   : > { %v1834_v23 = vpop.f32.mrf.mxu1 }
 0x1c5   : > { %v3112_v25 = vpop.f32.mrf.mxu1 }
 0x1cb   : > { %v1977_v27 = vpop.f32.mrf.mxu1 }
 0x1cd   : > { %v3134_v31 = vpop.f32.mrf.mxu1 }
 0x1d3   : > { %v2121_v2 = vpop.f32.mrf.mxu1 }
 0x1d5   : > { %v3156_v33 = vpop.f32.mrf.mxu1 }
 0x1db   : > { %v2269_v35 = vpop.f32.mrf.mxu1 }
 0x1dd   : > { %v3178_v38 = vpop.f32.mrf.mxu1 }
 0x1e3   : > { %v2414_v39 = vpop.f32.mrf.mxu1 }
 0x1e5   : > { %v3200_v41 = vpop.f32.mrf.mxu1 }
 0x1ee   : > { %v1761_v42 = vpop.f32.mrf.mxu0 }
 0x1ef   : > { %v1835_v43 = vadd.f32 %v1834_v23, %v1761_v42 }
 0x1f0   : > { %v3101_v45 = vpop.f32.mrf.mxu0 }
 0x1f6   : > { %v1907_v47 = vpop.f32.mrf.mxu0 }
 0x1f7   : > { %v1978_v58 = vadd.f32 %v1977_v27, %v1907_v47 }
 0x1f8   : > { %v3123_v51 = vpop.f32.mrf.mxu0 }
 0x1fe   : > { %v2050_v56 = vpop.f32.mrf.mxu0 }
 0x1ff   : > { %v2054_v59 = vadd.f32 %v2050_v56, %v1978_v58 }
 0x200   : > { %v3145_v57 = vpop.f32.mrf.mxu0 }
 0x201   : > { %v2125_v63 = vadd.f32 %v2121_v2, %v2054_v59 }
 0x206   : > { %v2195_v60 = vpop.f32.mrf.mxu0 }
 0x207   : > { %v2199_v9 = vadd.f32 %v2195_v60, %v2125_v63 }
 0x208   : > { %v3167_v61 = vpop.f32.mrf.mxu0 }
 0x209   : > { %v2273_v19 = vadd.f32 %v2269_v35, %v2199_v9 }
 0x20e   : > { %v2340_v10 = vpop.f32.mrf.mxu0 }
 0x20f   : > { %v2344_v29 = vadd.f32 %v2340_v10, %v2273_v19 }
 0x210   : > { %v3189_v20 = vpop.f32.mrf.mxu0 }
 0x211   : > { %v2418_v30 = vadd.f32 %v2414_v39, %v2344_v29 }
 0x216   : > { %v2488_v37 = vpop.f32.mrf.mxu0 }
 0x217   : > { %v2492_v1 = vadd.f32 %v2488_v37, %v2418_v30 }
 0x218   : > { %v3211_v4 = vpop.f32.mrf.mxu0 }
 0x219   : > { %v2493_v6 = vadd.f32 %v3765_v62, %v2492_v1 }
 0x21b   : > { %v2494_v8 = vmax.f32 %v2493_v6, 0.0 }
 0x21d   : > { %3221 = vmatmul.mubr.msk.f32.vlgmr.msra.gmra.mxu1 %vm317_vm0, %v2494_v8 }
 0x2dd   : > { %v2569_v12 = vpop.f32.mrf.mxu1 }
 0x2de   : > { %v2573_v16 = vadd.f32 %v2569_v12, %v1835_v43 }
 0x2df   : > { %v3222_v18 = vpop.f32.mrf.mxu1 }
 0x2e0   : > { %v2581_v49 = vadd.f32 %v2739_v14, %v2573_v16 }
 0x2e2   : > { %v2582_v40 = vmul.f32 5.656854, %v2581_v49 }
 0x2e4   : > { %v2584_v26 = vadd.f32 %v2583_v22, %v2582_v40 }
 0x2e6   : > { %v2591_v62 = vmul.f32 %v2589_v24, %v2584_v26 }
 0x2e8   : > { %2593 = vst.msk [vmem:[%s293_s13] sm:$0x7f] %vm2592_vm2, %v2591_v62 }
 0x2e9 PF: > { %s17_s24 = sadd.s32 1, %s3241_s24  }
 0x2ea   : > { %p14_p4 = scmp.ge.s32.totalorder %s17_s24, 4  }
 0x2ec   :  { %16 = sbr.rel (!%p14_p4) target bundleno = 1 (0x1), region = 91 }

// kernel: transformer_encoder.3
= control target key start
LH: loop header
LB: loop body
LE: loop exit
PB: predicated region body
PF: predicated region fallthrough
CT: control target
= control target key end

     0   :  { %s4201_s22 = smov 0   ;;  %s4203_s23 = smov 0   ;;  %s4693_s0 = inlined_call_operand.vmem [shape: f32[2,8,32], index: 0, kind: input, shape index: {}]   ;;  %s4694_s1 = inlined_call_operand.vmem [shape: f32[2,1,8], index: 1, kind: input, shape index: {}]   ;;  %s4695_s2 = inlined_call_operand.vmem [shape: f32[2,4,32,8], index: 2, kind: input, shape index: {}]   ;;  %s4696_s3 = inlined_call_operand.vmem [shape: f32[2,4,1,8], index: 3, kind: input, shape index: {}]   ;;  %s4697_s4 = inlined_call_operand.vmem [shape: f32[2,4,32,8], index: 4, kind: input, shape index: {}]   ;;  %s4698_s5 = inlined_call_operand.vmem [shape: f32[2,4,1,8], index: 5, kind: input, shape index: {}]   ;;  %s4699_s6 = inlined_call_operand.vmem [shape: f32[2,4,32,8], index: 6, kind: input, shape index: {}]   ;;  %s4700_s7 = inlined_call_operand.vmem [shape: f32[2,4,1,8], index: 7, kind: input, shape index: {}]   ;;  %s4701_s8 = inlined_call_operand.vmem [shape: f32[2,4,8,32], index: 8, kind: input, shape index: {}]   ;;  %s4702_s9 = inlined_call_operand.vmem [shape: f32[2,1,32], index: 9, kind: input, shape index: {}]   ;;  %s4703_s10 = inlined_call_operand.vmem [shape: f32[2,32,64], index: 10, kind: input, shape index: {}]   ;;  %s4704_s11 = inlined_call_operand.vmem [shape: f32[2,1,64], index: 11, kind: input, shape index: {}]   ;;  %s4705_s12 = inlined_call_operand.vmem [shape: f32[2,32,64], index: 12, kind: input, shape index: {}]   ;;  %s4706_s13 = inlined_call_operand.vmem [shape: f32[2,1,64], index: 13, kind: input, shape index: {}]   ;;  %s4707_s14 = inlined_call_operand.vmem [shape: f32[2,64,32], index: 14, kind: input, shape index: {}]   ;;  %s4708_s15 = inlined_call_operand.vmem [shape: f32[2,1,32], index: 15, kind: input, shape index: {}]   ;;  %s4709_s16 = inlined_call_operand.vmem [shape: f32[2,1,32], index: 16, kind: input, shape index: {}]   ;;  %s4710_s17 = inlined_call_operand.vmem [shape: f32[2,1,32], index: 17, kind: input, shape index: {}]   ;;  %s4711_s18 = inlined_call_operand.vmem [shape: f32[2,1,32], index: 18, kind: input, shape index: {}]   ;;  %s4712_s19 = inlined_call_operand.vmem [shape: f32[2,1,32], index: 19, kind: input, shape index: {}]   ;;  %s4713_s20 = inlined_call_operand.vmem [shape: f32[2,8,32], index: 20, kind: output, shape index: {}]  }
   0x1   :  { %4722 = sst [smem:[#allocation12_spill]] %s4693_s0  ;;  %s4205_s24 = smov 0  }
   0x2   :  { %4723 = sst [smem:[#allocation13_spill]] %s4694_s1  ;;  %s4199_s1 = smov 0  }
   0x3   :  { %4724 = sst [smem:[#allocation14_spill]] %s4695_s2  ;;  %s4207_s2 = smov 0  }
   0x4   :  { %4725 = sst [smem:[#allocation15_spill]] %s4696_s3 }
   0x5   :  { %4726 = sst [smem:[#allocation16_spill]] %s4697_s4 }
   0x6   :  { %4727 = sst [smem:[#allocation17_spill]] %s4698_s5 }
   0x7   :  { %4728 = sst [smem:[#allocation18_spill]] %s4699_s6 }
   0x8   :  { %4729 = sst [smem:[#allocation19_spill]] %s4700_s7 }
   0x9   :  { %4730 = sst [smem:[#allocation20_spill]] %s4701_s8 }
   0xa   :  { %4731 = sst [smem:[#allocation21_spill]] %s4702_s9 }
   0xb   :  { %4732 = sst [smem:[#allocation22_spill]] %s4703_s10 }
   0xc   :  { %4733 = sst [smem:[#allocation23_spill]] %s4704_s11 }
   0xd   :  { %4734 = sst [smem:[#allocation24_spill]] %s4705_s12 }
   0xe   :  { %4735 = sst [smem:[#allocation25_spill]] %s4706_s13 }
   0xf   :  { %4736 = sst [smem:[#allocation26_spill]] %s4707_s14 }
  0x10   :  { %4737 = sst [smem:[#allocation27_spill]] %s4708_s15 }
  0x11   :  { %4738 = sst [smem:[#allocation28_spill]] %s4709_s16 }
  0x12   :  { %4739 = sst [smem:[#allocation29_spill]] %s4710_s17 }
  0x13   :  { %4740 = sst [smem:[#allocation30_spill]] %s4711_s18 }
  0x14   :  { %4741 = sst [smem:[#allocation31_spill]] %s4712_s19 }
  0x15   :  { %4742 = sst [smem:[#allocation32_spill]] %s4713_s20 }
  0x16 LB: > { %4743 = sst [smem:[#allocation2_spill]] %s4073_s1  ;;  %s39_s25 = sadd.s32 1, %s4081_s23  ;;  %s4089_s2 = sphi %s4207_s2, %s30_s2   ;;  %s4085_s24 = sphi %s4205_s24, %s4797_s24   ;;  %s4081_s23 = sphi %s4203_s23, %s4796_s23   ;;  %s4077_s22 = sphi %s4201_s22, %s4795_s22   ;;  %s4073_s1 = sphi %s4199_s1, %s4794_s1  }
  0x17   : > { %4744 = sst [smem:[#allocation3_spill]] %s4081_s23  ;;  %s42_s3 = sadd.s32 1, %s4085_s24 }
  0x18   : > { %4745 = sst [smem:[#allocation4_spill]] %s4085_s24  ;;  %p40_p0 = scmp.ge.s32.totalorder %s39_s25, 2 }
  0x19   : > { %4746 = sst [smem:[#allocation5_spill]] %s4089_s2  ;;  %p3518_p1 = scmp.ge.s32.totalorder %s4089_s2, 1 }
  0x1a   : > { %p742_p2 = scmp.lt.s32.totalorder %s4089_s2, 5  ;;  %s4799_s25 = smov (%p40_p0, %s39_s25), 0 }
  0x1b   : > { %4747 = sst [smem:[#allocation6_spill]] %s4799_s25  ;;  %s4801_s3 = smov (!%p40_p0, %s42_s3), %s4085_s24 }
  0x1c   : > { %p743_p3 = pnand %p3518_p1, %p742_p2  ;;  %p44_p4 = scmp.ge.s32.totalorder %s4801_s3, 2 }
  0x1e   : > { %s4803_s3 = smov (%p44_p4, %s4801_s3), 0  ;;  %746 = sbr.rel (%p743_p3) target bundleno = 4754 (0x1292), region = 100 }
  0x1f   : > { %4748 = sst [smem:[#allocation7_spill]] %s4803_s3 }
  0x23   : > { %p872_p5 = scmp.lt.s32.totalorder %s4077_s22, 1  ;;  %p879_p6 = scmp.lt.s32.totalorder %s4073_s1, 1 }
  0x24   : > { %s4751_s3 = sld [smem:[#allocation12_spill]] }
  0x25   : > { %s4805_s22 = smov (!%p872_p5, %s4077_s22), 1  ;;  %s4753_s16 = sld [smem:[#allocation15_spill]] }
  0x26   : > { %4749 = sst [smem:[#allocation8_spill]] %s4805_s22  ;;  %s3519_s27 = sshll.u32 %s4805_s22, 3 }
  0x27   : > { %s4235_s26 = scalar_select %p879_p6, %s4073_s1, 1 }
  0x28   : > { %s4752_s1 = sld [smem:[#allocation14_spill]] }
  0x29   : > { %s3641_s24 = sshll.u32 %s4235_s26, 7  ;;  %s3522_s19 = sshll.u32 %s4235_s26, 2 }
  0x2a   : > { %s875_s25 = scalar_lea.vmem %s4751_s3, %s3519_s27  ;;  %s4755_s0 = sld [smem:[#allocation16_spill]] }
  0x2b   : > { %s4255_s28 = scalar_lea.vmem %s4753_s16, %s3522_s19  ;;  %s4756_s5 = sld [smem:[#allocation17_spill]] }
  0x2c   : > { %4754 = sst [smem:[#allocation9_spill]] %s4255_s28  ;;  %s3644_s4 = sshll.u32 %s4235_s26, 5 }
  0x2d   : > { %s4758_s6 = sld [smem:[#allocation18_spill]]  ;;  %s3647_s30 = sshll.u32 %s4235_s26, 6 }
  0x2e   : > { %s4249_s20 = scalar_lea.vmem %s4752_s1, %s3641_s24  ;;  %s4759_s7 = sld [smem:[#allocation19_spill]] }
  0x2f   : > { %s4760_s8 = sld [smem:[#allocation20_spill]] }
  0x30   : > { %s4260_s3 = scalar_lea.vmem %s4755_s0, %s3641_s24  ;;  %s4762_s10 = sld [smem:[#allocation22_spill]] }
  0x31   : > { %s4265_s23 = scalar_lea.vmem %s4756_s5, %s3522_s19  ;;  %s4764_s12 = sld [smem:[#allocation24_spill]] }
  0x32   : > { %4757 = sst [smem:[#allocation10_spill]] %s4265_s23 }
  0x33   : > { %s4270_s17 = scalar_lea.vmem %s4758_s6, %s3641_s24  ;;  %s4768_s14 = sld [smem:[#allocation26_spill]] }
  0x34   : > { %s4275_s22 = scalar_lea.vmem %s4759_s7, %s3522_s19  ;;  %s4769_s19 = sld [smem:[#allocation28_spill]] }
  0x35   : > { %s4281_s28 = scalar_lea.vmem %s4760_s8, %s3644_s4  ;;  %s4771_s8 = sld [smem:[#allocation30_spill]] }
  0x36   : > { %s4290_s24 = scalar_lea.vmem %s4762_s10, %s3644_s4  ;;  %s4772_s21 = sld [smem:[#allocation31_spill]] }
  0x37   : > { %s4299_s7 = scalar_lea.vmem %s4764_s12, %s3644_s4  ;;  %s4770_s12 = sld [smem:[#allocation29_spill]] }
  0x38   : > { %4765 = sst [smem:[#allocation11_spill]] %s4299_s7 }
  0x39   : > { %s4313_s9 = scalar_lea.vmem %s4768_s14, %s3647_s30  ;;  %s4773_s30 = sld [smem:[#allocation32_spill]] }
  0x3a   : > { %s940_s16 = scalar_lea.vmem %s4769_s19, %s4235_s26  ;;  %s4774_s14 = sld [smem:[#allocation2_spill]] }
  0x3b   : > { %s946_s13 = scalar_lea.vmem %s4771_s8, %s4235_s26 }
  0x3c   : > { %s949_s23 = scalar_lea.vmem %s4772_s21, %s4235_s26 }
  0x3d   : > { %s943_s11 = scalar_lea.vmem %s4770_s12, %s4235_s26 }
  0x3f   : > { %s4334_s1 = scalar_lea.vmem %s4773_s30, %s3519_s27 }
  0x40   : > { %p3538_p7 = scmp.ne.s32.totalorder %s4774_s14, 0 }
  0x42   : > { %957 = sbr.rel (%p3538_p7) target bundleno = 73 (0x49), region = 104 }
  0x47   : > { %v958_v0 = vld [vmem:[%s875_s25] sm:$0xff]  ;;  %vm959_vm0 = vcmask 261120  }
  0x48   : > { %960 = vst.msk [vmem:[%s4334_s1] sm:$0xff] %vm959_vm0, %v958_v0 }
  0x49 PF: > { %v967_v1 = vld [vmem:[%s4249_s20 + $0x18] sm:$0xff]  ;;  %v4091_v2 = vmov 0.0   ;;  %v966_v3 = vld [vmem:[%s4249_s20 + $0x10] sm:$0xff]  ;;  %vm4092_vm1 = vmmov 0   ;;  %v965_v4 = vld [vmem:[%s4249_s20 + $0x8] sm:$0xff]  ;;  %vm975_vm2 = vcmask 261120   ;;  %v1290_v24 = vlaneseq }
  0x4a   : > { %3751 = vmatprep.subr.mxu1 %v4091_v2  ;;  %3759 = vmatprep.mubr.msk.f32.mxu1 %vm4092_vm1, %v4091_v2  ;;  %v964_v5 = vld [vmem:[%s4249_s20] sm:$0xff]  ;;  %v1053_v7 = vld [vmem:[%s4260_s3 + $0x18] sm:$0xff]  ;;  %v1052_v8 = vld [vmem:[%s4260_s3 + $0x10] sm:$0xff]  ;;  %s4775_s7 = sld [smem:[#allocation9_spill]]  ;;  %vm1212_vm3 = vcmask 64512   ;;  %v4093_v28 = vmov 0  }
  0x4b   : > { %3752 = vmatpush3.msra.mxu1 %v967_v1  ;;  %3773 = vmatprep.subr.mxu0 %v4091_v2  ;;  %s4776_s8 = sld [smem:[#allocation10_spill]]  ;;  %v1051_v9 = vld [vmem:[%s4260_s3 + $0x8] sm:$0xff]  ;;  %v1050_v10 = vld [vmem:[%s4260_s3] sm:$0xff]  ;;  %v1134_v20 = vld [vmem:[%s4270_s17 + $0x18] sm:$0xff]  ;;  %v1291_v26 = vshrl.u32 %v1290_v24, 7  ;;  %vm3144_vm6 = vcmask 523264  }
  0x4c   : > { %3753 = vmatprep.subr.mxu1 %v4091_v2  ;;  %3781 = vmatprep.mubr.msk.f32.mxu0 %vm4092_vm1, %v4091_v2  ;;  %s4777_s12 = sld [smem:[#allocation8_spill]]  ;;  %v1133_v21 = vld [vmem:[%s4270_s17 + $0x10] sm:$0xff]  ;;  %v1132_v22 = vld [vmem:[%s4270_s17 + $0x8] sm:$0xff]  ;;  %v1131_v23 = vld [vmem:[%s4270_s17] sm:$0xff] }
  0x4d   : > { %3754 = vmatpush3.msra.mxu1 %v966_v3  ;;  %3774 = vmatpush3.msra.mxu0 %v1134_v20  ;;  %s4778_s25 = sld [smem:[#allocation13_spill]]  ;;  %v1292_v27 = vsub.s32 0, %v1291_v26  ;;  %v3543_v40 = vld [vmem:[%s4275_s22] ss:$0 sm:$0xff]  ;;  %v3551_v42 = vld [vmem:[%s4249_s20 + $0x38] sm:$0xff]  ;;  %v3550_v45 = vld [vmem:[%s4249_s20 + $0x30] sm:$0xff] }
  0x4e   : > { %3755 = vmatprep.subr.mxu1 %v4091_v2  ;;  %3775 = vmatprep.subr.mxu0 %v4091_v2  ;;  %v3549_v46 = vld [vmem:[%s4249_s20 + $0x28] sm:$0xff]  ;;  %v3548_v47 = vld [vmem:[%s4249_s20 + $0x20] sm:$0xff]  ;;  %v3558_v51 = vld [vmem:[%s4260_s3 + $0x38] sm:$0xff]  ;;  %s4785_s29 = sld [smem:[#allocation25_spill]] }
  0x4f   : > { %3756 = vmatpush3.msra.mxu1 %v965_v4  ;;  %v4351_v6 = vld [vmem:[%s4334_s1] sm:$0xff]  ;;  %3776 = vmatpush3.msra.mxu0 %v1133_v21  ;;  %v3557_v53 = vld [vmem:[%s4260_s3 + $0x30] sm:$0xff]  ;;  %v3556_v54 = vld [vmem:[%s4260_s3 + $0x28] sm:$0xff]  ;;  %s4787_s21 = sld [smem:[#allocation23_spill]] }
  0x50   : > { %3757 = vmatprep.subr.mxu1 %v4091_v2  ;;  %v3539_v13 = vld [vmem:[%s4775_s7] ss:$0 sm:$0xff]  ;;  %3777 = vmatprep.subr.mxu0 %v4091_v2  ;;  %v3553_v60 = vld [vmem:[%s4775_s7 + $0x1] ss:$0 sm:$0xff]  ;;  %v3565_v4 = vld [vmem:[%s4270_s17 + $0x38] sm:$0xff] }
  0x51   : > { %3758 = vmatpush3.msra.mxu1 %v964_v5  ;;  %v3541_v14 = vld [vmem:[%s4776_s8] ss:$0 sm:$0xff]  ;;  %3778 = vmatpush3.msra.mxu0 %v1132_v22  ;;  %v3560_v62 = vld [vmem:[%s4776_s8 + $0x1] ss:$0 sm:$0xff]  ;;  %v3564_v5 = vld [vmem:[%s4270_s17 + $0x30] sm:$0xff] }
  0x52   : > { %3760 = vmatmul.mubr.msk.f32.vlgmr.msra.gmra.mxu1 %vm975_vm2, %v4351_v6  ;;  %3762 = vmatprep.subr.mxu1 %v4091_v2  ;;  %v3555_v55 = vld [vmem:[%s4260_s3 + $0x20] sm:$0xff]  ;;  %v3572_v22 = vld [vmem:[%s4281_s28 + $0x8] sm:$0xff] }
  0x53   : > { %3763 = vmatpush3.msra.mxu1 %v1053_v7  ;;  %3770 = vmatprep.mubr.msk.f32.mxu1 %vm4092_vm1, %v4091_v2  ;;  %s4779_s27 = scalar_lea.vmem %s4778_s25, %s4777_s12  ;;  %v3563_v7 = vld [vmem:[%s4270_s17 + $0x28] sm:$0xff]  ;;  %v1381_v26 = vld [vmem:[%s4281_s28] sm:$0xff] }
  0x54   : > { %3764 = vmatprep.subr.mxu1 %v4091_v2  ;;  %3779 = vmatprep.subr.mxu0 %v4091_v2  ;;  %v962_v25 = vld [vmem:[%s4779_s27] sm:$0x1]  ;;  %s4786_s0 = scalar_lea.vmem %s4785_s29, %s4235_s26 }
  0x55   : > { %3765 = vmatpush3.msra.mxu1 %v1052_v8  ;;  %3780 = vmatpush3.msra.mxu0 %v1131_v23  ;;  %vm963_vm4 = vcmp.eq.f32.partialorder %v962_v25, 0.0  ;;  %v3562_v8 = vld [vmem:[%s4270_s17 + $0x20] sm:$0xff]  ;;  %s4788_s10 = scalar_lea.vmem %s4787_s21, %s4235_s26 }
  0x56   : > { %3766 = vmatprep.subr.mxu1 %v4091_v2  ;;  %3782 = vmatmul.mubr.msk.f32.vlgmr.msra.gmra.mxu0 %vm975_vm2, %v4351_v6  ;;  %v1289_v29 = vsel %vm963_vm4, 1, %v4093_v28  ;;  %v3585_v28 = vld [vmem:[%s4260_s3 + $0x58] sm:$0xff] }
  0x57   : > { %3767 = vmatpush3.msra.mxu1 %v1051_v9  ;;  %3794 = vmatprep.subr.mxu0 %v4091_v2  ;;  %v4395_v30 = vrot.slane %v1289_v29, %v1292_v27  ;;  %v3584_v29 = vld [vmem:[%s4260_s3 + $0x50] sm:$0xff] }
  0x58   : > { %3768 = vmatprep.subr.mxu1 %v4091_v2  ;;  %3802 = vmatprep.mubr.msk.f32.mxu0 %vm4092_vm1, %v4091_v2 }
  0x59   : > { %3769 = vmatpush3.msra.mxu1 %v1050_v10  ;;  %vm1294_vm5 = vcmp.eq.s32.totalorder %v4395_v30, 1  ;;  %3795 = vmatpush3.msra.mxu0 %v3551_v42 }
  0x5a   : > { %3771 = vmatmul.mubr.msk.f32.vlgmr.msra.gmra.mxu1 %vm975_vm2, %v4351_v6  ;;  %3784 = vmatprep.subr.mxu1 %v4091_v2 }
  0x5b   : > { %3786 = vmatprep.mubr.msk.f32.mxu1 %vm4092_vm1, %v4091_v2  ;;  %3796 = vmatprep.subr.mxu0 %v4091_v2 }
  0x5c   : > { %3797 = vmatpush3.msra.mxu0 %v3550_v45 }
  0x5d   : > { %3798 = vmatprep.subr.mxu0 %v4091_v2 }
  0x5e   : > { %3799 = vmatpush3.msra.mxu0 %v3549_v46 }
  0x5f   : > { %3800 = vmatprep.subr.mxu0 %v4091_v2 }
  0x60   : > { %3801 = vmatpush3.msra.mxu0 %v3548_v47  ;;  %v3580_v47 = vld [vmem:[%s4775_s7 + $0x2] ss:$0 sm:$0xff] }
  0x61   : > { %3803 = vmatmul.mubr.msk.f32.vlgmr.msra.gmra.mxu0 %vm975_vm2, %v4351_v6  ;;  %3816 = vmatprep.subr.mxu0 %v4091_v2 }
  0x62   : > { %3824 = vmatprep.mubr.msk.f32.mxu0 %vm4092_vm1, %v4091_v2  ;;  %3817 = vmatpush3.msra.mxu0 %v3565_v4 }
  0x63   : > { %3818 = vmatprep.subr.mxu0 %v4091_v2 }
  0x64   : > { %3819 = vmatpush3.msra.mxu0 %v3564_v5 }
  0x65   : > { %3820 = vmatprep.subr.mxu0 %v4091_v2 }
  0x66   : > { %3821 = vmatpush3.msra.mxu0 %v3563_v7  ;;  %v3599_v7 = vld [vmem:[%s4281_s28 + $0x10] sm:$0xff] }
  0x67   : > { %3822 = vmatprep.subr.mxu0 %v4091_v2 }
  0x68   : > { %3823 = vmatpush3.msra.mxu0 %v3562_v8 }
  0x69   : > { %3825 = vmatmul.mubr.msk.f32.vlgmr.msra.gmra.mxu0 %vm975_vm2, %v4351_v6  ;;  %3837 = vmatprep.subr.mxu0 %v4091_v2 }
  0x6a   : > { %3839 = vmatprep.mubr.msk.f32.mxu0 %vm4092_vm1, %v4091_v2  ;;  %3838 = vmatpush3.msra.mxu0 %v3572_v22 }
  0x6b   : > { %3847 = vmatprep.subr.mxu0 %v4091_v2 }
 0x112   : > { %v1045_v11 = vpop.f32.mrf.mxu1 }
 0x113   : > { %v1046_v15 = vadd.f32 %v3539_v13, %v1045_v11 }
 0x114   : > { %v3761_v12 = vpop.f32.mrf.mxu1 }
 0x115   : > { %v1049_v19 = vmul.f32 0.35355338, %v1046_v15 }
 0x116   : > { %v1208_v41 = vpop.f32.mrf.mxu0 }
 0x117   : > { %v1209_v43 = vadd.f32 %v3543_v40, %v1208_v41  ;;  %v3587_v41 = vld [vmem:[%s4776_s8 + $0x2] ss:$0 sm:$0xff] }
 0x118   : > { %v3783_v44 = vpop.f32.mrf.mxu0 }
 0x11a   : > { %v1127_v16 = vpop.f32.mrf.mxu1 }
 0x11b   : > { %v1128_v17 = vadd.f32 %v3541_v14, %v1127_v16 }
 0x11c   : > { %v3772_v18 = vpop.f32.mrf.mxu1 }
 0x11d   : > { %3785 = vmatpush3.xpose.msk.msra.mxu1 %vm1212_vm3, %v1128_v17  ;;  %v3567_v18 = vld [vmem:[%s4275_s22 + $0x1] ss:$0 sm:$0xff] }
 0x11e   : > { %3789 = vmatprep.subr.mxu1 %v4091_v2 }
 0x120   : > { %3787 = vmatmul.mubr.msk.f32.vlgmr.msra.gmra.mxu1 %vm1212_vm3, %v1049_v19 }
 0x121   : > { %3791 = vmatprep.mubr.msk.f32.mxu1 %vm4092_vm1, %v4091_v2  ;;  %3790 = vmatpush3.msra.mxu1 %v1209_v43  ;;  %v1461_v56 = vpop.f32.mrf.mxu0 }
 0x122   : > { %3805 = vmatprep.subr.mxu1 %v4091_v2  ;;  %v1462_v61 = vadd.f32 %v3553_v60, %v1461_v56 }
 0x123   : > { %v3804_v57 = vpop.f32.mrf.mxu0 }
 0x124   : > { %v1465_v1 = vmul.f32 0.35355338, %v1462_v61 }
 0x129   : > { %v1628_v19 = vpop.f32.mrf.mxu0 }
 0x12a   : > { %v1629_v20 = vadd.f32 %v3567_v18, %v1628_v19  ;;  %v3610_v18 = vld [vmem:[%s4260_s3 + $0x70] sm:$0xff] }
 0x12b   : > { %v3826_v21 = vpop.f32.mrf.mxu0 }
 0x12c   : > { %v3608_v21 = vld [vmem:[%s4260_s3 + $0x60] sm:$0xff] }
 0x1e0   : > { %v1285_v31 = vpop.f32.mrf.mxu1 }
 0x1e1   : > { %v1295_v32 = vsel %vm1294_vm5, -3.4028235e+38, %v1285_v31  ;;  %v3583_v31 = vld [vmem:[%s4260_s3 + $0x48] sm:$0xff] }
 0x1e2   : > { %v3788_v33 = vpop.f32.mrf.mxu1  ;;  %v1296_v34 = vsel %vm1212_vm3, %v1295_v32, -inf }
 0x1e3   : > { %1297 = vmax.xlane.f32.xlu0 %v1296_v34  ;;  %v3578_v33 = vld [vmem:[%s4249_s20 + $0x58] sm:$0xff] }
 0x26c   : > { %v1298_v35 = vpop.xlane.xlu0 %1297 }
 0x26d   : > { %v1299_v36 = vsub.f32 %v1295_v32, %v1298_v35  ;;  %v3582_v32 = vld [vmem:[%s4260_s3 + $0x40] sm:$0xff]  ;;  %v3577_v35 = vld [vmem:[%s4249_s20 + $0x50] sm:$0xff] }
 0x26f   : > { %v1300_v37 = vmul.f32 1.442695, %v1299_v36 }
 0x271   : > { %4027 = vpow2.f32 %v1300_v37  ;;  %v3576_v37 = vld [vmem:[%s4249_s20 + $0x48] sm:$0xff] }
 0x27e   : > { %v4028_v38 = vpop.eup %4027 }
 0x27f   : > { %v1302_v39 = vsel %vm1212_vm3, %v4028_v38, 0.0 }
 0x280   : > { %1303 = vadd.xlane.f32.xlu0 %v1302_v39  ;;  %v3575_v39 = vld [vmem:[%s4249_s20 + $0x40] sm:$0xff] }
 0x309   : > { %v1304_v48 = vpop.xlane.xlu0 %1303 }
 0x30a   : > { %4029 = vrcp.f32 %v1304_v48 }
 0x317   : > { %v4030_v49 = vpop.eup %4029 }
 0x318   : > { %v1306_v50 = vmul.f32 %v4030_v49, %v4028_v38 }
 0x31a   : > { %v1307_v52 = vsel %vm1294_vm5, 0.0, %v1306_v50 }
 0x31b   : > { %3792 = vmatmul.mubr.msk.f32.vlgmr.msra.gmra.mxu1 %vm1212_vm3, %v1307_v52  ;;  %v3592_v52 = vld [vmem:[%s4270_s17 + $0x58] sm:$0xff] }
 0x31c   : > { %3806 = vmatpush3.msra.mxu1 %v3558_v51  ;;  %3813 = vmatprep.mubr.msk.f32.mxu1 %vm4092_vm1, %v4091_v2 }
 0x31d   : > { %3807 = vmatprep.subr.mxu1 %v4091_v2 }
 0x31e   : > { %3808 = vmatpush3.msra.mxu1 %v3557_v53  ;;  %v3591_v53 = vld [vmem:[%s4270_s17 + $0x50] sm:$0xff] }
 0x31f   : > { %3809 = vmatprep.subr.mxu1 %v4091_v2 }
 0x320   : > { %3810 = vmatpush3.msra.mxu1 %v3556_v54  ;;  %v3590_v54 = vld [vmem:[%s4270_s17 + $0x48] sm:$0xff] }
 0x321   : > { %3811 = vmatprep.subr.mxu1 %v4091_v2 }
 0x322   : > { %3812 = vmatpush3.msra.mxu1 %v3555_v55  ;;  %v3589_v55 = vld [vmem:[%s4270_s17 + $0x40] sm:$0xff] }
 0x323   : > { %3814 = vmatmul.mubr.msk.f32.vlgmr.msra.gmra.mxu1 %vm975_vm2, %v4351_v6  ;;  %3827 = vmatprep.subr.mxu1 %v4091_v2 }
 0x324   : > { %3829 = vmatprep.mubr.msk.f32.mxu1 %vm4092_vm1, %v4091_v2 }
 0x3db   : > { %v1377_v58 = vpop.f32.mrf.mxu1 }
 0x3dd   : > { %v3793_v59 = vpop.f32.mrf.mxu1 }
 0x3e3   : > { %v1545_v63 = vpop.f32.mrf.mxu1 }
 0x3e4   : > { %v1546_v0 = vadd.f32 %v3560_v62, %v1545_v63 }
 0x3e5   : > { %v3815_v3 = vpop.f32.mrf.mxu1 }
 0x3e6   : > { %3828 = vmatpush3.xpose.msk.msra.mxu1 %vm1212_vm3, %v1546_v0 }
 0x3e7   : > { %3832 = vmatprep.subr.mxu1 %v4091_v2 }
 0x3e9   : > { %3830 = vmatmul.mubr.msk.f32.vlgmr.msra.gmra.mxu1 %vm1212_vm3, %v1465_v1  ;;  %v3594_v1 = vld [vmem:[%s4275_s22 + $0x2] ss:$0 sm:$0xff] }
 0x3ea   : > { %3834 = vmatprep.mubr.msk.f32.mxu1 %vm4092_vm1, %v4091_v2  ;;  %3833 = vmatpush3.msra.mxu1 %v1629_v20  ;;  %v3609_v20 = vld [vmem:[%s4260_s3 + $0x68] sm:$0xff] }
 0x3eb   : > { %3842 = vmatprep.subr.mxu1 %v4091_v2 }
 0x4a9   : > { %v1704_v9 = vpop.f32.mrf.mxu1 }
 0x4aa   : > { %v1708_v10 = vsel %vm1294_vm5, -3.4028235e+38, %v1704_v9 }
 0x4ab   : > { %v3831_v11 = vpop.f32.mrf.mxu1  ;;  %v1709_v12 = vsel %vm1212_vm3, %v1708_v10, -inf }
 0x4ac   : > { %1710 = vmax.xlane.f32.xlu1 %v1709_v12  ;;  %v3604_v12 = vld [vmem:[%s4249_s20 + $0x78] sm:$0xff] }
 0x535   : > { %v1711_v13 = vpop.xlane.xlu1 %1710 }
 0x536   : > { %v1712_v14 = vsub.f32 %v1708_v10, %v1711_v13  ;;  %v3603_v13 = vld [vmem:[%s4249_s20 + $0x70] sm:$0xff] }
 0x538   : > { %v1713_v15 = vmul.f32 1.442695, %v1712_v14  ;;  %v3602_v14 = vld [vmem:[%s4249_s20 + $0x68] sm:$0xff] }
 0x53a   : > { %4031 = vpow2.f32 %v1713_v15  ;;  %v3601_v15 = vld [vmem:[%s4249_s20 + $0x60] sm:$0xff]  ;;  %s4780_s20 = sld [smem:[#allocation11_spill]] }
 0x547   : > { %v4032_v16 = vpop.eup %4031 }
 0x548   : > { %v1715_v17 = vsel %vm1212_vm3, %v4032_v16, 0.0 }
 0x549   : > { %1716 = vadd.xlane.f32.xlu1 %v1715_v17 }
 0x5d2   : > { %v1717_v23 = vpop.xlane.xlu1 %1716 }
 0x5d3   : > { %4033 = vrcp.f32 %v1717_v23 }
 0x5e0   : > { %v4034_v24 = vpop.eup %4033 }
 0x5e1   : > { %v1719_v25 = vmul.f32 %v4034_v24, %v4032_v16  ;;  %v3611_v16 = vld [vmem:[%s4260_s3 + $0x78] sm:$0xff]  ;;  %s4781_s3 = sld [smem:[#allocation21_spill]] }
 0x5e3   : > { %v1720_v27 = vsel %vm1294_vm5, 0.0, %v1719_v25 }
 0x5e4   : > { %3835 = vmatmul.mubr.msk.f32.vlgmr.msra.gmra.mxu1 %vm1212_vm3, %v1720_v27 }
 0x5e5   : > { %3843 = vmatpush3.msra.mxu1 %v1381_v26  ;;  %3844 = vmatprep.mubr.msk.f32.mxu1 %vm4092_vm1, %v4091_v2 }
 0x5e6   : > { %3858 = vmatprep.subr.mxu1 %v4091_v2 }
 0x5e8   : > { %3845 = vmatmul.mubr.msk.f32.vlgmr.msra.gmra.mxu1 %vm1212_vm3, %v1377_v58 }
 0x5e9   : > { %3859 = vmatpush3.msra.mxu1 %v3585_v28  ;;  %3866 = vmatprep.mubr.msk.f32.mxu1 %vm4092_vm1, %v4091_v2  ;;  %v3606_v28 = vld [vmem:[%s4775_s7 + $0x3] ss:$0 sm:$0xff] }
 0x5ea   : > { %3860 = vmatprep.subr.mxu1 %v4091_v2 }
 0x5eb   : > { %3861 = vmatpush3.msra.mxu1 %v3584_v29 }
 0x5ec   : > { %3862 = vmatprep.subr.mxu1 %v4091_v2 }
 0x5ed   : > { %3863 = vmatpush3.msra.mxu1 %v3583_v31  ;;  %v3613_v31 = vld [vmem:[%s4776_s8 + $0x3] ss:$0 sm:$0xff]  ;;  %s4789_s8 = sld [smem:[#allocation27_spill]] }
 0x5ee   : > { %3864 = vmatprep.subr.mxu1 %v4091_v2 }
 0x5ef   : > { %3865 = vmatpush3.msra.mxu1 %v3582_v32 }
 0x5f0   : > { %3867 = vmatmul.mubr.msk.f32.vlgmr.msra.gmra.mxu1 %vm975_vm2, %v4351_v6  ;;  %3880 = vmatprep.subr.mxu1 %v4091_v2 }
 0x5f1   : > { %3882 = vmatprep.mubr.msk.f32.mxu1 %vm4092_vm1, %v4091_v2 }
 0x5f3   : > { %s4790_s12 = scalar_lea.vmem %s4789_s8, %s4235_s26 }
 0x6a4   : > { %v1790_v34 = vpop.f32.mrf.mxu1 }
 0x6a5   : > { %3840 = vmatmul.mubr.msk.f32.vlgmr.msra.gmra.mxu0 %vm1212_vm3, %v1790_v34 }
 0x6a6   : > { %3848 = vmatpush3.msra.mxu0 %v3578_v33  ;;  %v3836_v36 = vpop.f32.mrf.mxu1  ;;  %3855 = vmatprep.mubr.msk.f32.mxu0 %vm4092_vm1, %v4091_v2 }
 0x6a7   : > { %3849 = vmatprep.subr.mxu0 %v4091_v2  ;;  %v3618_v36 = vld [vmem:[%s4270_s17 + $0x78] sm:$0xff] }
 0x6a8   : > { %3850 = vmatpush3.msra.mxu0 %v3577_v35  ;;  %v4489_v38 = vpop.f32.mrf.mxu1 }
 0x6a9   : > { %3851 = vmatprep.subr.mxu0 %v4091_v2 }
 0x6aa   : > { %3852 = vmatpush3.msra.mxu0 %v3576_v37  ;;  %v3846_v40 = vpop.f32.mrf.mxu1  ;;  %v3617_v37 = vld [vmem:[%s4270_s17 + $0x70] sm:$0xff] }
 0x6ab   : > { %3853 = vmatprep.subr.mxu0 %v4091_v2 }
 0x6ac   : > { %3854 = vmatpush3.msra.mxu0 %v3575_v39  ;;  %v3615_v39 = vld [vmem:[%s4270_s17 + $0x60] sm:$0xff] }
 0x6ad   : > { %3856 = vmatmul.mubr.msk.f32.vlgmr.msra.gmra.mxu0 %vm975_vm2, %v4351_v6  ;;  %3869 = vmatprep.subr.mxu0 %v4091_v2 }
 0x6ae   : > { %3877 = vmatprep.mubr.msk.f32.mxu0 %vm4092_vm1, %v4091_v2  ;;  %3870 = vmatpush3.msra.mxu0 %v3592_v52 }
 0x6af   : > { %3871 = vmatprep.subr.mxu0 %v4091_v2 }
 0x6b0   : > { %v2105_v42 = vpop.f32.mrf.mxu1  ;;  %3872 = vmatpush3.msra.mxu0 %v3591_v53  ;;  %v3625_v53 = vld [vmem:[%s4281_s28 + $0x18] sm:$0xff] }
 0x6b1   : > { %v2106_v43 = vadd.f32 %v3587_v41, %v2105_v42  ;;  %3873 = vmatprep.subr.mxu0 %v4091_v2 }
 0x6b2   : > { %v3868_v44 = vpop.f32.mrf.mxu1  ;;  %3874 = vmatpush3.msra.mxu0 %v3590_v54 }
 0x6b3   : > { %3881 = vmatpush3.xpose.msk.msra.mxu1 %vm1212_vm3, %v2106_v43  ;;  %3875 = vmatprep.subr.mxu0 %v4091_v2 }
 0x6b4   : > { %3885 = vmatprep.subr.mxu1 %v4091_v2  ;;  %3876 = vmatpush3.msra.mxu0 %v3589_v55 }
 0x6b5   : > { %3878 = vmatmul.mubr.msk.f32.vlgmr.msra.gmra.mxu0 %vm975_vm2, %v4351_v6  ;;  %3890 = vmatprep.subr.mxu0 %v4091_v2 }
 0x6b6   : > { %3892 = vmatprep.mubr.msk.f32.mxu0 %vm4092_vm1, %v4091_v2  ;;  %3891 = vmatpush3.msra.mxu0 %v3599_v7 }
 0x6b7   : > { %3906 = vmatprep.subr.mxu0 %v4091_v2 }
 0x765   : > { %v4502_v45 = vpop.f32.mrf.mxu0 }
 0x766   : > { %v1939_v24 = vadd.f32 %v4489_v38, %v4502_v45  ;;  %v3616_v38 = vld [vmem:[%s4270_s17 + $0x68] sm:$0xff]  ;;  %s4782_s17 = scalar_lea.vmem %s4781_s3, %s4235_s26 }
 0x767   : > { %v3841_v46 = vpop.f32.mrf.mxu0  ;;  %v3627_v30 = vld [vmem:[%s4782_s17] ss:$0 sm:$0xff] }
 0x76d   : > { %v2021_v48 = vpop.f32.mrf.mxu0 }
 0x76e   : > { %v2022_v49 = vadd.f32 %v3580_v47, %v2021_v48 }
 0x76f   : > { %v3857_v50 = vpop.f32.mrf.mxu0 }
 0x770   : > { %v2025_v51 = vmul.f32 0.35355338, %v2022_v49  ;;  %v3620_v49 = vld [vmem:[%s4275_s22 + $0x3] ss:$0 sm:$0xff] }
 0x772   : > { %3883 = vmatmul.mubr.msk.f32.vlgmr.msra.gmra.mxu1 %vm1212_vm3, %v2025_v51 }
 0x773   : > { %3887 = vmatprep.mubr.msk.f32.mxu1 %vm4092_vm1, %v4091_v2 }
 0x775   : > { %v2188_v3 = vpop.f32.mrf.mxu0 }
 0x776   : > { %v2189_v4 = vadd.f32 %v3594_v1, %v2188_v3 }
 0x777   : > { %v3879_v5 = vpop.f32.mrf.mxu0 }
 0x778   : > { %3886 = vmatpush3.msra.mxu1 %v2189_v4 }
 0x779   : > { %3895 = vmatprep.subr.mxu1 %v4091_v2 }
 0x832   : > { %v2264_v56 = vpop.f32.mrf.mxu1 }
 0x833   : > { %v2268_v57 = vsel %vm1294_vm5, -3.4028235e+38, %v2264_v56 }
 0x834   : > { %v3884_v58 = vpop.f32.mrf.mxu1  ;;  %v2269_v59 = vsel %vm1212_vm3, %v2268_v57, -inf }
 0x835   : > { %2270 = vmax.xlane.f32.xlu0 %v2269_v59 }
 0x8be   : > { %v2271_v60 = vpop.xlane.xlu0 %2270 }
 0x8bf   : > { %v2272_v61 = vsub.f32 %v2268_v57, %v2271_v60 }
 0x8c1   : > { %v2273_v62 = vmul.f32 1.442695, %v2272_v61 }
 0x8c3   : > { %4035 = vpow2.f32 %v2273_v62 }
 0x8d0   : > { %v4036_v63 = vpop.eup %4035 }
 0x8d1   : > { %v2275_v0 = vsel %vm1212_vm3, %v4036_v63, 0.0 }
 0x8d2   : > { %2276 = vadd.xlane.f32.xlu1 %v2275_v0 }
 0x95b   : > { %v2277_v8 = vpop.xlane.xlu1 %2276 }
 0x95c   : > { %4037 = vrcp.f32 %v2277_v8 }
 0x969   : > { %v4038_v9 = vpop.eup %4037 }
 0x96a   : > { %v2279_v10 = vmul.f32 %v4038_v9, %v4036_v63  ;;  %v2960_v9 = vld [vmem:[%s4290_s24 + $0x18] sm:$0xff] }
 0x96c   : > { %v2280_v11 = vsel %vm1294_vm5, 0.0, %v2279_v10  ;;  %v3044_v10 = vld [vmem:[%s4780_s20 + $0x18] sm:$0xff] }
 0x96d   : > { %3888 = vmatmul.mubr.msk.f32.vlgmr.msra.gmra.mxu1 %vm1212_vm3, %v2280_v11  ;;  %v3043_v11 = vld [vmem:[%s4780_s20 + $0x10] sm:$0xff] }
 0x96e   : > { %3903 = vmatprep.mubr.msk.f32.mxu1 %vm4092_vm1, %v4091_v2  ;;  %3896 = vmatpush3.msra.mxu1 %v3604_v12  ;;  %v2958_v12 = vld [vmem:[%s4290_s24 + $0x8] sm:$0xff] }
 0x96f   : > { %3897 = vmatprep.subr.mxu1 %v4091_v2 }
 0x970   : > { %3898 = vmatpush3.msra.mxu1 %v3603_v13  ;;  %v3042_v13 = vld [vmem:[%s4780_s20 + $0x8] sm:$0xff] }
 0x971   : > { %3899 = vmatprep.subr.mxu1 %v4091_v2 }
 0x972   : > { %3900 = vmatpush3.msra.mxu1 %v3602_v14  ;;  %v2957_v14 = vld [vmem:[%s4290_s24] sm:$0xff] }
 0x973   : > { %3901 = vmatprep.subr.mxu1 %v4091_v2 }
 0x974   : > { %3902 = vmatpush3.msra.mxu1 %v3601_v15  ;;  %v3041_v15 = vld [vmem:[%s4780_s20] sm:$0xff] }
 0x975   : > { %3904 = vmatmul.mubr.msk.f32.vlgmr.msra.gmra.mxu1 %vm975_vm2, %v4351_v6  ;;  %3917 = vmatprep.subr.mxu1 %v4091_v2 }
 0x976   : > { %3925 = vmatprep.mubr.msk.f32.mxu1 %vm4092_vm1, %v4091_v2  ;;  %3918 = vmatpush3.msra.mxu1 %v3618_v36 }
 0x977   : > { %3919 = vmatprep.subr.mxu1 %v4091_v2 }
 0x978   : > { %3920 = vmatpush3.msra.mxu1 %v3617_v37 }
 0x979   : > { %3921 = vmatprep.subr.mxu1 %v4091_v2 }
 0x97a   : > { %3922 = vmatpush3.msra.mxu1 %v3616_v38 }
 0x97b   : > { %3923 = vmatprep.subr.mxu1 %v4091_v2 }
 0x97c   : > { %3924 = vmatpush3.msra.mxu1 %v3615_v39 }
 0x97d   : > { %3926 = vmatmul.mubr.msk.f32.vlgmr.msra.gmra.mxu1 %vm975_vm2, %v4351_v6  ;;  %3938 = vmatprep.subr.mxu1 %v4091_v2 }
 0x97e   : > { %3940 = vmatprep.mubr.msk.f32.mxu1 %vm4092_vm1, %v4091_v2  ;;  %3939 = vmatpush3.msra.mxu1 %v3625_v53 }
 0x97f   : > { %3954 = vmatprep.subr.mxu1 %v4091_v2 }
 0xa2d   : > { %v2350_v17 = vpop.f32.mrf.mxu1 }
 0xa2e   : > { %3893 = vmatmul.mubr.msk.f32.vlgmr.msra.gmra.mxu0 %vm1212_vm3, %v2350_v17 }
 0xa2f   : > { %3907 = vmatpush3.msra.mxu0 %v3611_v16  ;;  %v3889_v19 = vpop.f32.mrf.mxu1  ;;  %3914 = vmatprep.mubr.msk.f32.mxu0 %vm4092_vm1, %v4091_v2 }
 0xa30   : > { %3908 = vmatprep.subr.mxu0 %v4091_v2 }
 0xa31   : > { %3909 = vmatpush3.msra.mxu0 %v3610_v18 }
 0xa32   : > { %3910 = vmatprep.subr.mxu0 %v4091_v2 }
 0xa33   : > { %3911 = vmatpush3.msra.mxu0 %v3609_v20  ;;  %v3628_v20 = vld [vmem:[%s940_s16] ss:$0 sm:$0xff] }
 0xa34   : > { %3912 = vmatprep.subr.mxu0 %v4091_v2 }
 0xa35   : > { %3913 = vmatpush3.msra.mxu0 %v3608_v21  ;;  %v2509_v22 = vpop.f32.mrf.mxu1 }
 0xa36   : > { %3915 = vmatmul.mubr.msk.f32.vlgmr.msra.gmra.mxu0 %vm975_vm2, %v4351_v6  ;;  %3928 = vmatprep.subr.mxu0 %v4091_v2  ;;  %v2510_v29 = vadd.f32 %v3606_v28, %v2509_v22  ;;  %v3629_v22 = vld [vmem:[%s943_s11] ss:$0 sm:$0xff] }
 0xa37   : > { %3930 = vmatprep.mubr.msk.f32.mxu0 %vm4092_vm1, %v4091_v2  ;;  %v3905_v23 = vpop.f32.mrf.mxu1  ;;  %v3133_v28 = vld [vmem:[%s4313_s9 + $0x20] sm:$0xff] }
 0xa38   : > { %v2513_v34 = vmul.f32 0.35355338, %v2510_v29  ;;  %v3132_v29 = vld [vmem:[%s4313_s9 + $0x18] sm:$0xff] }
 0xa3d   : > { %v2676_v50 = vpop.f32.mrf.mxu1 }
 0xa3e   : > { %v2677_v51 = vadd.f32 %v3620_v49, %v2676_v50 }
 0xa3f   : > { %v3927_v52 = vpop.f32.mrf.mxu1 }
 0xaee   : > { %v2425_v25 = vpop.f32.mrf.mxu0 }
 0xaef   : > { %v2429_v26 = vadd.f32 %v2425_v25, %v1939_v24  ;;  %v3136_v25 = vld [vmem:[%s4313_s9 + $0x38] sm:$0xff] }
 0xaf0   : > { %v3894_v27 = vpop.f32.mrf.mxu0 }
 0xaf1   : > { %v3134_v27 = vld [vmem:[%s4313_s9 + $0x28] sm:$0xff] }
 0xaf6   : > { %v2593_v32 = vpop.f32.mrf.mxu0 }
 0xaf7   : > { %v2594_v33 = vadd.f32 %v3613_v31, %v2593_v32  ;;  %v3131_v31 = vld [vmem:[%s4313_s9 + $0x10] sm:$0xff]  ;;  %v3130_v32 = vld [vmem:[%s4313_s9 + $0x8] sm:$0xff] }
 0xaf8   : > { %v3916_v35 = vpop.f32.mrf.mxu0 }
 0xaf9   : > { %3929 = vmatpush3.xpose.msk.msra.mxu0 %vm1212_vm3, %v2594_v33  ;;  %v3129_v33 = vld [vmem:[%s4313_s9] sm:$0xff] }
 0xafa   : > { %3933 = vmatprep.subr.mxu0 %v4091_v2 }
 0xafc   : > { %3931 = vmatmul.mubr.msk.f32.vlgmr.msra.gmra.mxu0 %vm1212_vm3, %v2513_v34  ;;  %v3632_v34 = vld [vmem:[%s4786_s0] ss:$0 sm:$0xff] }
 0xafd   : > { %3935 = vmatprep.mubr.msk.f32.mxu0 %vm4092_vm1, %v4091_v2  ;;  %3934 = vmatpush3.msra.mxu0 %v2677_v51 }
 0xafe   : > { %3943 = vmatprep.subr.mxu0 %v4091_v2 }
 0xbbc   : > { %v2752_v40 = vpop.f32.mrf.mxu0 }
 0xbbd   : > { %v2756_v41 = vsel %vm1294_vm5, -3.4028235e+38, %v2752_v40 }
 0xbbe   : > { %v3932_v42 = vpop.f32.mrf.mxu0  ;;  %v2757_v43 = vsel %vm1212_vm3, %v2756_v41, -inf }
 0xbbf   : > { %2758 = vmax.xlane.f32.xlu0 %v2757_v43 }
 0xc48   : > { %v2759_v44 = vpop.xlane.xlu0 %2758 }
 0xc49   : > { %v2760_v45 = vsub.f32 %v2756_v41, %v2759_v44 }
 0xc4b   : > { %v2761_v46 = vmul.f32 1.442695, %v2760_v45 }
 0xc4d   : > { %4039 = vpow2.f32 %v2761_v46  ;;  %v3635_v46 = vld [vmem:[%s4790_s12] ss:$0 sm:$0xff] }
 0xc5a   : > { %v4040_v47 = vpop.eup %4039 }
 0xc5b   : > { %v2763_v48 = vsel %vm1212_vm3, %v4040_v47, 0.0 }
 0xc5c   : > { %2764 = vadd.xlane.f32.xlu1 %v2763_v48 }
 0xce5   : > { %v2765_v54 = vpop.xlane.xlu1 %2764 }
 0xce6   : > { %4041 = vrcp.f32 %v2765_v54 }
 0xcf3   : > { %v4042_v55 = vpop.eup %4041 }
 0xcf4   : > { %v2767_v56 = vmul.f32 %v4042_v55, %v4040_v47 }
 0xcf6   : > { %v2768_v57 = vsel %vm1294_vm5, 0.0, %v2767_v56 }
 0xcf7   : > { %3936 = vmatmul.mubr.msk.f32.vlgmr.msra.gmra.mxu0 %vm1212_vm3, %v2768_v57 }
 0xcf8   : > { %3951 = vmatprep.mubr.msk.f32.mxu0 %vm4092_vm1, %v4091_v2  ;;  %3944 = vmatpush3.msra.mxu0 %v2960_v9 }
 0xcf9   : > { %3945 = vmatprep.subr.mxu0 %v4091_v2 }
 0xdb7   : > { %v2838_v58 = vpop.f32.mrf.mxu0 }
 0xdb8   : > { %3941 = vmatmul.mubr.msk.f32.vlgmr.msra.gmra.mxu1 %vm1212_vm3, %v2838_v58 }
 0xdb9   : > { %v3937_v59 = vpop.f32.mrf.mxu0  ;;  %3962 = vmatprep.mubr.msk.f32.mxu1 %vm4092_vm1, %v4091_v2  ;;  %3955 = vmatpush3.msra.mxu1 %v3044_v10 }
 0xdba   : > { %3956 = vmatprep.subr.mxu1 %v4091_v2 }
 0xdbb   : > { %3957 = vmatpush3.msra.mxu1 %v3043_v11 }
 0xdbc   : > { %3958 = vmatprep.subr.mxu1 %v4091_v2 }
 0xdbd   : > { %3959 = vmatpush3.msra.mxu1 %v3042_v13 }
 0xdbe   : > { %3960 = vmatprep.subr.mxu1 %v4091_v2 }
 0xdbf   : > { %3961 = vmatpush3.msra.mxu1 %v3041_v15 }
 0xe78   : > { %v2913_v60 = vpop.f32.mrf.mxu1 }
 0xe79   : > { %v2917_v61 = vadd.f32 %v2913_v60, %v2429_v26  ;;  %v3135_v26 = vld [vmem:[%s4313_s9 + $0x30] sm:$0xff] }
 0xe7a   : > { %v3942_v62 = vpop.f32.mrf.mxu1 }
 0xe7b   : > { %v2925_v63 = vadd.f32 %v3627_v30, %v2917_v61  ;;  %v3637_v30 = vld [vmem:[%s946_s13] ss:$0 sm:$0xff] }
 0xe7c   : > { %v3638_v62 = vld [vmem:[%s949_s23] ss:$0 sm:$0xff] }
 0xe7d   : > { %v2926_v0 = vadd.f32 %v2925_v63, %v4351_v6  ;;  %v2959_v6 = vld [vmem:[%s4290_s24 + $0x10] sm:$0xff] }
 0xe7e   : > { %3946 = vmatpush3.msra.mxu0 %v2959_v6 }
 0xe7f   : > { %v2929_v1 = vsel %vm975_vm2, %v2926_v0, 0.0  ;;  %3947 = vmatprep.subr.mxu0 %v4091_v2 }
 0xe80   : > { %2930 = vadd.xlane.f32.xlu0 %v2929_v1  ;;  %3948 = vmatpush3.msra.mxu0 %v2958_v12 }
 0xe81   : > { %3949 = vmatprep.subr.mxu0 %v4091_v2 }
 0xe82   : > { %3950 = vmatpush3.msra.mxu0 %v2957_v14 }
 0xe83   : > { %3965 = vmatprep.subr.mxu0 %v4091_v2 }
 0xf09   : > { %v2931_v3 = vpop.xlane.xlu0 %2930 }
 0xf0a   : > { %v2933_v4 = vmul.f32 0.03125, %v2931_v3 }
 0xf0c   : > { %v2934_v5 = vsub.f32 %v2926_v0, %v2933_v4 }
 0xf0e   : > { %v2935_v7 = vmul.f32 %v2934_v5, %v2934_v5 }
 0xf10   : > { %v2936_v8 = vsel %vm975_vm2, %v2935_v7, 0.0 }
 0xf11   : > { %2937 = vadd.xlane.f32.xlu1 %v2936_v8 }
 0xf9a   : > { %v2938_v16 = vpop.xlane.xlu1 %2937 }
 0xf9b   : > { %v2939_v17 = vmul.f32 0.03125, %v2938_v16 }
 0xf9d   : > { %v2940_v18 = vadd.f32 1e-05, %v2939_v17 }
 0xf9f   : > { %4043 = vrsqrt.f32 %v2940_v18 }
 0xfac   : > { %v4044_v19 = vpop.eup %4043 }
 0xfad   : > { %v2942_v21 = vmul.f32 %v4044_v19, %v2934_v5 }
 0xfaf   : > { %v2949_v23 = vmul.f32 %v3628_v20, %v2942_v21 }
 0xfb1   : > { %v2956_v24 = vadd.f32 %v3629_v22, %v2949_v23 }
 0xfb3   : > { %3952 = vmatmul.mubr.msk.f32.vlgmr.msra.gmra.mxu0 %vm975_vm2, %v2956_v24  ;;  %3963 = vmatmul.mubr.msk.f32.vlgmr.msra.gmra.mxu1 %vm975_vm2, %v2956_v24 }
 0xfb4   : > { %3981 = vmatprep.mubr.msk.f32.mxu0 %vm4092_vm1, %v4091_v2  ;;  %3966 = vmatpush3.msra.mxu0 %v3136_v25 }
 0xfb5   : > { %3967 = vmatprep.subr.mxu0 %v4091_v2 }
 0xfb6   : > { %3968 = vmatpush3.msra.mxu0 %v3135_v26 }
 0xfb7   : > { %3969 = vmatprep.subr.mxu0 %v4091_v2 }
 0xfb8   : > { %3970 = vmatpush3.msra.mxu0 %v3134_v27 }
 0xfb9   : > { %3971 = vmatprep.subr.mxu0 %v4091_v2 }
 0xfba   : > { %3972 = vmatpush3.msra.mxu0 %v3133_v28 }
 0xfbb   : > { %3973 = vmatprep.subr.mxu0 %v4091_v2 }
 0xfbc   : > { %3974 = vmatpush3.msra.mxu0 %v3132_v29 }
 0xfbd   : > { %3975 = vmatprep.subr.mxu0 %v4091_v2 }
 0xfbe   : > { %3976 = vmatpush3.msra.mxu0 %v3131_v31 }
 0xfbf   : > { %3977 = vmatprep.subr.mxu0 %v4091_v2 }
 0xfc0   : > { %3978 = vmatpush3.msra.mxu0 %v3130_v32 }
 0xfc1   : > { %3979 = vmatprep.subr.mxu0 %v4091_v2  ;;  %v3630_v2 = vld [vmem:[%s4788_s10] ss:$0 sm:$0xff] }
 0xfc2   : > { %3980 = vmatpush3.msra.mxu0 %v3129_v33 }
0x1073   : > { %v3037_v35 = vpop.f32.mrf.mxu0  ;;  %v3118_v36 = vpop.f32.mrf.mxu1 }
0x1074   : > { %v3119_v37 = vadd.f32 %v3632_v34, %v3118_v36  ;;  %v3038_v43 = vadd.f32 %v3630_v2, %v3037_v35 }
0x1075   : > { %v3953_v38 = vpop.f32.mrf.mxu0  ;;  %v3964_v39 = vpop.f32.mrf.mxu1 }
0x1076   : > { %v3634_v40 = vmul.f32 -1.442695, %v3119_v37 }
0x1078   : > { %4045 = vpow2.f32 %v3634_v40 }
0x1085   : > { %v4046_v41 = vpop.eup %4045 }
0x1086   : > { %v3125_v42 = vadd.f32 1.0, %v4046_v41 }
0x1088   : > { %4047 = vrcp.f32 %v3125_v42 }
0x1095   : > { %v4048_v44 = vpop.eup %4047 }
0x1096   : > { %v3128_v45 = vmul.f32 %v4048_v44, %v3038_v43 }
0x1098   : > { %3982 = vmatmul.mubr.msk.f32.vlgmr.msra.gmra.mxu0 %vm3144_vm6, %v3128_v45 }
0x1158   : > { %v3214_v47 = vpop.f32.mrf.mxu0 }
0x1159   : > { %v3215_v48 = vadd.f32 %v3635_v46, %v3214_v47 }
0x115a   : > { %v3983_v49 = vpop.f32.mrf.mxu0 }
0x115b   : > { %v3218_v50 = vadd.f32 %v3215_v48, %v2956_v24 }
0x115d   : > { %v3221_v51 = vsel %vm975_vm2, %v3218_v50, 0.0 }
0x115e   : > { %3222 = vadd.xlane.f32.xlu0 %v3221_v51 }
0x11e7   : > { %v3223_v52 = vpop.xlane.xlu0 %3222 }
0x11e8   : > { %v3224_v53 = vmul.f32 0.03125, %v3223_v52 }
0x11ea   : > { %v3225_v54 = vsub.f32 %v3218_v50, %v3224_v53 }
0x11ec   : > { %v3226_v55 = vmul.f32 %v3225_v54, %v3225_v54 }
0x11ee   : > { %v3227_v56 = vsel %vm975_vm2, %v3226_v55, 0.0 }
0x11ef   : > { %3228 = vadd.xlane.f32.xlu1 %v3227_v56 }
0x1278   : > { %v3229_v57 = vpop.xlane.xlu1 %3228 }
0x1279   : > { %v3230_v58 = vmul.f32 0.03125, %v3229_v57 }
0x127b   : > { %v3231_v59 = vadd.f32 1e-05, %v3230_v58 }
0x127d   : > { %4049 = vrsqrt.f32 %v3231_v59 }
0x128a   : > { %v4050_v60 = vpop.eup %4049 }
0x128b   : > { %v3233_v61 = vmul.f32 %v4050_v60, %v3225_v54 }
0x128d   : > { %v3240_v63 = vmul.f32 %v3637_v30, %v3233_v61 }
0x128f   : > { %v3247_v0 = vadd.f32 %v3638_v62, %v3240_v63 }
0x1291   : > { %3248 = vst.msk [vmem:[%s4334_s1] sm:$0xff] %vm975_vm2, %v3247_v0 }
0x1292 PF: > { %s4793_s28 = sld [smem:[#allocation5_spill]] }
0x1293   : > { %s4794_s1 = sld [smem:[#allocation3_spill]] }
0x1294   : > { %s4795_s22 = sld [smem:[#allocation4_spill]] }
0x1295   : > { %s4796_s23 = sld [smem:[#allocation6_spill]] }
0x1296   : > { %s4797_s24 = sld [smem:[#allocation7_spill]] }
0x1298   : > { %s30_s2 = sadd.s32 1, %s4793_s28  }
0x1299   : > { %p27_p8 = scmp.ge.s32.totalorder %s30_s2, 6  }
0x129b   :  { %29 = sbr.rel (!%p27_p8) target bundleno = 22 (0x16), region = 212 }

</bundles_post_ra>
